<compile_context>
chip_gen: v7x
topology: tpu7x:2x2x1
jax: 0.10.0
libtpu: 0.0.40
codegen_flags: <defaults>
</compile_context>

<pallas_src>
import math

import jax
import jax.numpy as jnp
from jax.experimental import pallas as pl
from jax.experimental.pallas import tpu as pltpu

_LANE = 128
_SUBLANE = 8
_OUTP = 128  # padded width of the final (1-wide) linear output


def _ceil_to(x, m):
    return ((x + m - 1) // m) * m


# -----------------------------------------------------------------------------
# Fused kernel
# -----------------------------------------------------------------------------
def _make_fused_kernel(num_layers, S, Bp, Hp):
    def kernel(tok_ref, emb_ref, *args):
        # args layout: [wih_0, whh_0, bias_0, ..., wih_{L-1}, whh_{L-1}, bias_{L-1},
        #               w1, b1, w2, b2, w3, b3, out_ref]
        lstm = []
        k = 0
        for _ in range(num_layers):
            lstm.append((args[k], args[k + 1], args[k + 2]))
            k += 3
        w1_ref, b1_ref, w2_ref, b2_ref, w3_ref, b3_ref = args[k:k + 6]
        out_ref = args[k + 6]

        Vp = emb_ref.shape[0]

        # ---- embedding lookup as a one-hot matmul (no dynamic gather) ----
        tok = tok_ref[...]                                           # (S*Bp, 1) i32
        lane = jax.lax.broadcasted_iota(jnp.int32, (S * Bp, Vp), 1)  # (S*Bp, Vp)
        onehot = (tok == lane).astype(jnp.float32)
        x_all = jnp.dot(onehot, emb_ref[...],
                        preferred_element_type=jnp.float32)          # (S*Bp, Ep)

        # ---- stacked LSTM: time fully unrolled, layers chained per step ----
        # PyTorch packed gate order is [i, f, g, o]; each gate block is padded
        # to Hp=128 lanes so the slices below are whole-vreg slices.
        h = [jnp.zeros((Bp, Hp), jnp.float32) for _ in range(num_layers)]
        c = [jnp.zeros((Bp, Hp), jnp.float32) for _ in range(num_layers)]

        for t in range(S):                               # static unroll
            inp = x_all[t * Bp:(t + 1) * Bp, :]          # (Bp, Ep) static slice
            for l in range(num_layers):
                wih_ref, whh_ref, b_ref = lstm[l]
                gates = (jnp.dot(inp, wih_ref[...],
                                 preferred_element_type=jnp.float32)
                         + jnp.dot(h[l], whh_ref[...],
                                   preferred_element_type=jnp.float32)
                         + b_ref[...])                   # (Bp, 4*Hp)
                i_g = jax.nn.sigmoid(gates[:, 0 * Hp:1 * Hp])
                f_g = jax.nn.sigmoid(gates[:, 1 * Hp:2 * Hp])
                g_g = jnp.tanh(gates[:, 2 * Hp:3 * Hp])
                o_g = jax.nn.sigmoid(gates[:, 3 * Hp:4 * Hp])
                c[l] = f_g * c[l] + i_g * g_g
                h[l] = o_g * jnp.tanh(c[l])
                inp = h[l]           # inter-layer dropout == identity at eval

        # feat = cat(outputs[-1], hidden[-1], cell[-1]); outputs[-1] == h[-1]
        # for this model, so fc1 is done as three row-block dots (no concat).
        z1 = (jnp.dot(h[-1], w1_ref[0 * Hp:1 * Hp, :],
                      preferred_element_type=jnp.float32)
              + jnp.dot(h[-1], w1_ref[1 * Hp:2 * Hp, :],
                        preferred_element_type=jnp.float32)
              + jnp.dot(c[-1], w1_ref[2 * Hp:3 * Hp, :],
                        preferred_element_type=jnp.float32)
              + b1_ref[...])
        z1 = jnp.maximum(z1, 0.0)                        # relu(dropout(fc1)) @ eval
        z2 = (jnp.dot(z1, w2_ref[...], preferred_element_type=jnp.float32)
              + b2_ref[...])
        out_ref[...] = (jnp.dot(z2, w3_ref[...], preferred_element_type=jnp.float32)
                        + b3_ref[...])                   # (Bp, 128) lane dense

    return kernel


def _fused_call(tok_flat, packed, Bp):
    lstm = packed["lstm"]
    head = packed["head"]
    num_layers = len(lstm)
    Hp = lstm[0]["whh"].shape[0]
    SB = tok_flat.shape[0]
    S = SB // Bp

    inputs = [tok_flat, packed["emb"]]
    for lyr in lstm:
        inputs += [lyr["wih"], lyr["whh"], lyr["bias"]]
    inputs += list(head)

    kernel = _make_fused_kernel(num_layers, S, Bp, Hp)
    return pl.pallas_call(
        kernel,
        out_shape=jax.ShapeDtypeStruct((Bp, _OUTP), jnp.float32),
        in_specs=[pl.BlockSpec(memory_space=pltpu.MemorySpace.VMEM)
                  for _ in inputs],
        out_specs=pl.BlockSpec(memory_space=pltpu.MemorySpace.VMEM),
    )(*inputs)


# -----------------------------------------------------------------------------
# Parameters: PyTorch-style init, then pack (transpose + lane padding)
# -----------------------------------------------------------------------------
def init_params(key, vocab_size, emb_size, hidden_size, num_layers):
    keys = jax.random.split(key, 1 + 4 * num_layers + 6)
    ki = iter(keys)

    params = {"embedding": jax.random.normal(
        next(ki), (vocab_size, emb_size), jnp.float32)}

    k_lstm = 1.0 / math.sqrt(hidden_size)
    layers = []
    for layer in range(num_layers):
        in_size = emb_size if layer == 0 else hidden_size
        layers.append(dict(
            w_ih=jax.random.uniform(next(ki), (4 * hidden_size, in_size),
                                    jnp.float32, -k_lstm, k_lstm),
            w_hh=jax.random.uniform(next(ki), (4 * hidden_size, hidden_size),
                                    jnp.float32, -k_lstm, k_lstm),
            b_ih=jax.random.uniform(next(ki), (4 * hidden_size,),
                                    jnp.float32, -k_lstm, k_lstm),
            b_hh=jax.random.uniform(next(ki), (4 * hidden_size,),
                                    jnp.float32, -k_lstm, k_lstm),
        ))
    params["lstm"] = layers

    def linear(fan_in, fan_out):
        k = 1.0 / math.sqrt(fan_in)
        w = jax.random.uniform(next(ki), (fan_out, fan_in), jnp.float32, -k, k)
        b = jax.random.uniform(next(ki), (fan_out,), jnp.float32, -k, k)
        return w, b

    params["fc1"] = linear(3 * hidden_size, 2 * hidden_size)
    params["fc2"] = linear(2 * hidden_size, hidden_size)
    params["linear"] = linear(hidden_size, 1)
    return params


def pack_params(params):
    """Transpose to (in, out) and pad every feature axis to 128 lanes so the
    kernel only ever touches whole-vreg tiles.  Padded rows/cols are zero."""
    emb = params["embedding"]
    V, E = emb.shape
    H = params["lstm"][0]["w_hh"].shape[1]
    Vp, Ep, Hp = _ceil_to(V, _LANE), _ceil_to(E, _LANE), _ceil_to(H, _LANE)
    H2p = _ceil_to(2 * H, _LANE)

    emb_pad = jnp.zeros((Vp, Ep), jnp.float32).at[:V, :E].set(emb)

    def pad_gate_cols(w_t, rows_pad):
        # w_t: (In, 4H) -> (rows_pad, 4*Hp); gate g's real columns land at
        # lanes [g*Hp, g*Hp + H) so gate slices are vreg aligned.
        In = w_t.shape[0]
        out = jnp.zeros((rows_pad, 4 * Hp), jnp.float32)
        for g in range(4):
            out = out.at[:In, g * Hp:g * Hp + H].set(w_t[:, g * H:(g + 1) * H])
        return out

    lstm_packed = []
    for li, lyr in enumerate(params["lstm"]):
        rows_pad = Ep if li == 0 else Hp
        wih = pad_gate_cols(jnp.transpose(lyr["w_ih"]), rows_pad)
        whh = pad_gate_cols(jnp.transpose(lyr["w_hh"]), Hp)
        b = lyr["b_ih"] + lyr["b_hh"]
        bias = jnp.zeros((1, 4 * Hp), jnp.float32)
        for g in range(4):
            bias = bias.at[0, g * Hp:g * Hp + H].set(b[g * H:(g + 1) * H])
        lstm_packed.append(dict(wih=wih, whh=whh, bias=bias))

    w1, b1 = params["fc1"]      # (2H, 3H), (2H,)
    w2, b2 = params["fc2"]      # (H, 2H), (H,)
    w3, b3 = params["linear"]   # (1, H), (1,)

    w1_t = jnp.transpose(w1)    # (3H, 2H) ; row blocks: [out_last | h_last | c_last]
    w1_pad = jnp.zeros((3 * Hp, H2p), jnp.float32)
    for blk in range(3):
        w1_pad = w1_pad.at[blk * Hp:blk * Hp + H, :2 * H].set(
            w1_t[blk * H:(blk + 1) * H, :])
    b1_pad = jnp.zeros((1, H2p), jnp.float32).at[0, :2 * H].set(b1)

    w2_pad = jnp.zeros((H2p, Hp), jnp.float32).at[:2 * H, :H].set(jnp.transpose(w2))
    b2_pad = jnp.zeros((1, Hp), jnp.float32).at[0, :H].set(b2)

    w3_pad = jnp.zeros((Hp, _OUTP), jnp.float32).at[:H, :1].set(jnp.transpose(w3))
    b3_pad = jnp.zeros((1, _OUTP), jnp.float32).at[0, :1].set(b3)

    return dict(emb=emb_pad, lstm=lstm_packed,
                head=(w1_pad, b1_pad, w2_pad, b2_pad, w3_pad, b3_pad))


# -----------------------------------------------------------------------------
# Forward pass (thin JAX glue around one fused Pallas launch)
# -----------------------------------------------------------------------------
@jax.jit
def title_predictor_forward(packed, tokens):
    """tokens: (S, B) int32 indices, time-major (PyTorch nn.LSTM default)."""
    S, B = tokens.shape
    Bp = _ceil_to(B, _SUBLANE)
    tok_p = jnp.zeros((S, Bp), jnp.int32).at[:, :B].set(tokens)
    tok_flat = tok_p.reshape(S * Bp, 1)
    out = _fused_call(tok_flat, packed, Bp)   # (Bp, 128)
    return out[:B, 0:1]                       # (B, 1)


# -----------------------------------------------------------------------------
# Pure-JAX reference (matches PyTorch eval semantics) for a sanity check
# -----------------------------------------------------------------------------
def reference_forward(params, tokens):
    emb = params["embedding"]
    x = emb[tokens]                                  # (S, B, E)
    S, B = tokens.shape
    H = params["lstm"][0]["w_hh"].shape[1]
    outputs = x
    h_last = c_last = None
    for lyr in params["lstm"]:
        w_ih, w_hh = lyr["w_ih"], lyr["w_hh"]
        b = lyr["b_ih"] + lyr["b_hh"]
        h = jnp.zeros((B, H), jnp.float32)
        c = jnp.zeros((B, H), jnp.float32)
        outs = []
        for t in range(S):
            g = outputs[t] @ w_ih.T + h @ w_hh.T + b
            i_g = jax.nn.sigmoid(g[:, 0 * H:1 * H])
            f_g = jax.nn.sigmoid(g[:, 1 * H:2 * H])
            g_g = jnp.tanh(g[:, 2 * H:3 * H])
            o_g = jax.nn.sigmoid(g[:, 3 * H:4 * H])
            c = f_g * c + i_g * g_g
            h = o_g * jnp.tanh(c)
            outs.append(h)
        outputs = jnp.stack(outs, axis=0)
        h_last, c_last = h, c
    feat = jnp.concatenate([outputs[-1], h_last, c_last], axis=1)
    w1, b1 = params["fc1"]
    w2, b2 = params["fc2"]
    w3, b3 = params["linear"]
    z = jnp.maximum(feat @ w1.T + b1, 0.0)
    z = z @ w2.T + b2
    return z @ w3.T + b3


if __name__ == "__main__":
    VOCAB = 100
    EMB = 32
    HIDDEN = 32
    NUM_LAYERS = 2
    SEQ = 8
    BATCH = 4

    key = jax.random.PRNGKey(0)
    pkey, dkey = jax.random.split(key)
    params = init_params(pkey, VOCAB, EMB, HIDDEN, NUM_LAYERS)
    packed = pack_params(params)

    tokens = jax.random.randint(dkey, (SEQ, BATCH), 0, VOCAB, dtype=jnp.int32)

    pred = title_predictor_forward(packed, tokens)
    jax.block_until_ready(pred)
    assert pred.shape == (BATCH, 1)

    ref = reference_forward(params, tokens)
    err = float(jnp.max(jnp.abs(pred - ref)))
    assert err < 1e-2, f"kernel/reference mismatch: max abs err = {err}"

    print("KERNEL_OK")
</pallas_src>

<mosaic_0001>
module attributes {stable_mosaic.version = 11 : i64} {
  func.func @kernel(%arg0: memref<64x1xi32, #tpu.memory_space<vmem>>, %arg1: memref<128x128xf32, #tpu.memory_space<vmem>>, %arg2: memref<128x512xf32, #tpu.memory_space<vmem>>, %arg3: memref<128x512xf32, #tpu.memory_space<vmem>>, %arg4: memref<1x512xf32, #tpu.memory_space<vmem>>, %arg5: memref<128x512xf32, #tpu.memory_space<vmem>>, %arg6: memref<128x512xf32, #tpu.memory_space<vmem>>, %arg7: memref<1x512xf32, #tpu.memory_space<vmem>>, %arg8: memref<384x128xf32, #tpu.memory_space<vmem>>, %arg9: memref<1x128xf32, #tpu.memory_space<vmem>>, %arg10: memref<128x128xf32, #tpu.memory_space<vmem>>, %arg11: memref<1x128xf32, #tpu.memory_space<vmem>>, %arg12: memref<128x128xf32, #tpu.memory_space<vmem>>, %arg13: memref<1x128xf32, #tpu.memory_space<vmem>>, %arg14: memref<8x128xf32, #tpu.memory_space<vmem>>) attributes {dimension_semantics = [], scalar_prefetch = 0 : i64, scratch_operands = 0 : i64, tpu.core_type = #tpu.core_type<tc>} {
    %c0 = arith.constant 0 : index
    %c0_0 = arith.constant 0 : index
    %0 = vector.load %arg0[%c0, %c0_0] : memref<64x1xi32, #tpu.memory_space<vmem>>, vector<64x1xi32>
    %1 = tpu.iota {dimensions = array<i32: 1>} : vector<64x128xi32>
    %2 = vector.broadcast %0 : vector<64x1xi32> to vector<64x128xi32>
    %3 = arith.cmpi eq, %2, %1 : vector<64x128xi32>
    %4 = arith.extui %3 : vector<64x128xi1> to vector<64x128xi32>
    %5 = arith.sitofp %4 : vector<64x128xi32> to vector<64x128xf32>
    %c0_1 = arith.constant 0 : index
    %c0_2 = arith.constant 0 : index
    %6 = vector.load %arg1[%c0_1, %c0_2] : memref<128x128xf32, #tpu.memory_space<vmem>>, vector<128x128xf32>
    %cst = arith.constant dense<0.000000e+00> : vector<64x128xf32>
    %7 = tpu.matmul %5, %6, %cst {dimension_numbers = #tpu.dot_dimension_numbers<[1], [0], [0], [1], [0, 0, 1, 1], [], []>} : vector<64x128xf32>, vector<128x128xf32>, vector<64x128xf32> -> vector<64x128xf32>
    %cst_3 = arith.constant 0.000000e+00 : f32
    %8 = vector.broadcast %cst_3 : f32 to vector<8x128xf32>
    %cst_4 = arith.constant 0.000000e+00 : f32
    %9 = vector.broadcast %cst_4 : f32 to vector<8x128xf32>
    %cst_5 = arith.constant 0.000000e+00 : f32
    %10 = vector.broadcast %cst_5 : f32 to vector<8x128xf32>
    %cst_6 = arith.constant 0.000000e+00 : f32
    %11 = vector.broadcast %cst_6 : f32 to vector<8x128xf32>
    %12 = vector.extract_strided_slice %7 {offsets = [0, 0], sizes = [8, 128], strides = [1, 1]} : vector<64x128xf32> to vector<8x128xf32>
    %c0_7 = arith.constant 0 : index
    %c0_8 = arith.constant 0 : index
    %13 = vector.load %arg2[%c0_7, %c0_8] : memref<128x512xf32, #tpu.memory_space<vmem>>, vector<128x512xf32>
    %cst_9 = arith.constant dense<0.000000e+00> : vector<8x512xf32>
    %14 = tpu.matmul %12, %13, %cst_9 {dimension_numbers = #tpu.dot_dimension_numbers<[1], [0], [0], [1], [0, 0, 1, 1], [], []>} : vector<8x128xf32>, vector<128x512xf32>, vector<8x512xf32> -> vector<8x512xf32>
    %c0_10 = arith.constant 0 : index
    %c0_11 = arith.constant 0 : index
    %15 = vector.load %arg3[%c0_10, %c0_11] : memref<128x512xf32, #tpu.memory_space<vmem>>, vector<128x512xf32>
    %cst_12 = arith.constant dense<0.000000e+00> : vector<8x512xf32>
    %16 = tpu.matmul %8, %15, %cst_12 {dimension_numbers = #tpu.dot_dimension_numbers<[1], [0], [0], [1], [0, 0, 1, 1], [], []>} : vector<8x128xf32>, vector<128x512xf32>, vector<8x512xf32> -> vector<8x512xf32>
    %17 = arith.addf %14, %16 : vector<8x512xf32>
    %c0_13 = arith.constant 0 : index
    %c0_14 = arith.constant 0 : index
    %18 = vector.load %arg4[%c0_13, %c0_14] : memref<1x512xf32, #tpu.memory_space<vmem>>, vector<1x512xf32>
    %19 = vector.broadcast %18 : vector<1x512xf32> to vector<8x512xf32>
    %20 = arith.addf %17, %19 : vector<8x512xf32>
    %21 = vector.extract_strided_slice %20 {offsets = [0, 0], sizes = [8, 128], strides = [1, 1]} : vector<8x512xf32> to vector<8x128xf32>
    %22 = arith.negf %21 : vector<8x128xf32>
    %23 = math.exp %22 : vector<8x128xf32>
    %cst_15 = arith.constant 1.000000e+00 : f32
    %24 = vector.broadcast %cst_15 : f32 to vector<8x128xf32>
    %25 = arith.addf %24, %23 : vector<8x128xf32>
    %26 = arith.divf %24, %25 : vector<8x128xf32>
    %27 = vector.extract_strided_slice %20 {offsets = [0, 128], sizes = [8, 128], strides = [1, 1]} : vector<8x512xf32> to vector<8x128xf32>
    %28 = arith.negf %27 : vector<8x128xf32>
    %29 = math.exp %28 : vector<8x128xf32>
    %cst_16 = arith.constant 1.000000e+00 : f32
    %30 = vector.broadcast %cst_16 : f32 to vector<8x128xf32>
    %31 = arith.addf %30, %29 : vector<8x128xf32>
    %32 = arith.divf %30, %31 : vector<8x128xf32>
    %33 = vector.extract_strided_slice %20 {offsets = [0, 256], sizes = [8, 128], strides = [1, 1]} : vector<8x512xf32> to vector<8x128xf32>
    %34 = math.tanh %33 : vector<8x128xf32>
    %35 = vector.extract_strided_slice %20 {offsets = [0, 384], sizes = [8, 128], strides = [1, 1]} : vector<8x512xf32> to vector<8x128xf32>
    %36 = arith.negf %35 : vector<8x128xf32>
    %37 = math.exp %36 : vector<8x128xf32>
    %cst_17 = arith.constant 1.000000e+00 : f32
    %38 = vector.broadcast %cst_17 : f32 to vector<8x128xf32>
    %39 = arith.addf %38, %37 : vector<8x128xf32>
    %40 = arith.divf %38, %39 : vector<8x128xf32>
    %41 = arith.mulf %32, %10 : vector<8x128xf32>
    %42 = arith.mulf %26, %34 : vector<8x128xf32>
    %43 = arith.addf %41, %42 : vector<8x128xf32>
    %44 = math.tanh %43 : vector<8x128xf32>
    %45 = arith.mulf %40, %44 : vector<8x128xf32>
    %c0_18 = arith.constant 0 : index
    %c0_19 = arith.constant 0 : index
    %46 = vector.load %arg5[%c0_18, %c0_19] : memref<128x512xf32, #tpu.memory_space<vmem>>, vector<128x512xf32>
    %cst_20 = arith.constant dense<0.000000e+00> : vector<8x512xf32>
    %47 = tpu.matmul %45, %46, %cst_20 {dimension_numbers = #tpu.dot_dimension_numbers<[1], [0], [0], [1], [0, 0, 1, 1], [], []>} : vector<8x128xf32>, vector<128x512xf32>, vector<8x512xf32> -> vector<8x512xf32>
    %c0_21 = arith.constant 0 : index
    %c0_22 = arith.constant 0 : index
    %48 = vector.load %arg6[%c0_21, %c0_22] : memref<128x512xf32, #tpu.memory_space<vmem>>, vector<128x512xf32>
    %cst_23 = arith.constant dense<0.000000e+00> : vector<8x512xf32>
    %49 = tpu.matmul %9, %48, %cst_23 {dimension_numbers = #tpu.dot_dimension_numbers<[1], [0], [0], [1], [0, 0, 1, 1], [], []>} : vector<8x128xf32>, vector<128x512xf32>, vector<8x512xf32> -> vector<8x512xf32>
    %50 = arith.addf %47, %49 : vector<8x512xf32>
    %c0_24 = arith.constant 0 : index
    %c0_25 = arith.constant 0 : index
    %51 = vector.load %arg7[%c0_24, %c0_25] : memref<1x512xf32, #tpu.memory_space<vmem>>, vector<1x512xf32>
    %52 = vector.broadcast %51 : vector<1x512xf32> to vector<8x512xf32>
    %53 = arith.addf %50, %52 : vector<8x512xf32>
    %54 = vector.extract_strided_slice %53 {offsets = [0, 0], sizes = [8, 128], strides = [1, 1]} : vector<8x512xf32> to vector<8x128xf32>
    %55 = arith.negf %54 : vector<8x128xf32>
    %56 = math.exp %55 : vector<8x128xf32>
    %cst_26 = arith.constant 1.000000e+00 : f32
    %57 = vector.broadcast %cst_26 : f32 to vector<8x128xf32>
    %58 = arith.addf %57, %56 : vector<8x128xf32>
    %59 = arith.divf %57, %58 : vector<8x128xf32>
    %60 = vector.extract_strided_slice %53 {offsets = [0, 128], sizes = [8, 128], strides = [1, 1]} : vector<8x512xf32> to vector<8x128xf32>
    %61 = arith.negf %60 : vector<8x128xf32>
    %62 = math.exp %61 : vector<8x128xf32>
    %cst_27 = arith.constant 1.000000e+00 : f32
    %63 = vector.broadcast %cst_27 : f32 to vector<8x128xf32>
    %64 = arith.addf %63, %62 : vector<8x128xf32>
    %65 = arith.divf %63, %64 : vector<8x128xf32>
    %66 = vector.extract_strided_slice %53 {offsets = [0, 256], sizes = [8, 128], strides = [1, 1]} : vector<8x512xf32> to vector<8x128xf32>
    %67 = math.tanh %66 : vector<8x128xf32>
    %68 = vector.extract_strided_slice %53 {offsets = [0, 384], sizes = [8, 128], strides = [1, 1]} : vector<8x512xf32> to vector<8x128xf32>
    %69 = arith.negf %68 : vector<8x128xf32>
    %70 = math.exp %69 : vector<8x128xf32>
    %cst_28 = arith.constant 1.000000e+00 : f32
    %71 = vector.broadcast %cst_28 : f32 to vector<8x128xf32>
    %72 = arith.addf %71, %70 : vector<8x128xf32>
    %73 = arith.divf %71, %72 : vector<8x128xf32>
    %74 = arith.mulf %65, %11 : vector<8x128xf32>
    %75 = arith.mulf %59, %67 : vector<8x128xf32>
    %76 = arith.addf %74, %75 : vector<8x128xf32>
    %77 = math.tanh %76 : vector<8x128xf32>
    %78 = arith.mulf %73, %77 : vector<8x128xf32>
    %79 = vector.extract_strided_slice %7 {offsets = [8, 0], sizes = [8, 128], strides = [1, 1]} : vector<64x128xf32> to vector<8x128xf32>
    %c0_29 = arith.constant 0 : index
    %c0_30 = arith.constant 0 : index
    %80 = vector.load %arg2[%c0_29, %c0_30] : memref<128x512xf32, #tpu.memory_space<vmem>>, vector<128x512xf32>
    %cst_31 = arith.constant dense<0.000000e+00> : vector<8x512xf32>
    %81 = tpu.matmul %79, %80, %cst_31 {dimension_numbers = #tpu.dot_dimension_numbers<[1], [0], [0], [1], [0, 0, 1, 1], [], []>} : vector<8x128xf32>, vector<128x512xf32>, vector<8x512xf32> -> vector<8x512xf32>
    %c0_32 = arith.constant 0 : index
    %c0_33 = arith.constant 0 : index
    %82 = vector.load %arg3[%c0_32, %c0_33] : memref<128x512xf32, #tpu.memory_space<vmem>>, vector<128x512xf32>
    %cst_34 = arith.constant dense<0.000000e+00> : vector<8x512xf32>
    %83 = tpu.matmul %45, %82, %cst_34 {dimension_numbers = #tpu.dot_dimension_numbers<[1], [0], [0], [1], [0, 0, 1, 1], [], []>} : vector<8x128xf32>, vector<128x512xf32>, vector<8x512xf32> -> vector<8x512xf32>
    %84 = arith.addf %81, %83 : vector<8x512xf32>
    %c0_35 = arith.constant 0 : index
    %c0_36 = arith.constant 0 : index
    %85 = vector.load %arg4[%c0_35, %c0_36] : memref<1x512xf32, #tpu.memory_space<vmem>>, vector<1x512xf32>
    %86 = vector.broadcast %85 : vector<1x512xf32> to vector<8x512xf32>
    %87 = arith.addf %84, %86 : vector<8x512xf32>
    %88 = vector.extract_strided_slice %87 {offsets = [0, 0], sizes = [8, 128], strides = [1, 1]} : vector<8x512xf32> to vector<8x128xf32>
    %89 = arith.negf %88 : vector<8x128xf32>
    %90 = math.exp %89 : vector<8x128xf32>
    %cst_37 = arith.constant 1.000000e+00 : f32
    %91 = vector.broadcast %cst_37 : f32 to vector<8x128xf32>
    %92 = arith.addf %91, %90 : vector<8x128xf32>
    %93 = arith.divf %91, %92 : vector<8x128xf32>
    %94 = vector.extract_strided_slice %87 {offsets = [0, 128], sizes = [8, 128], strides = [1, 1]} : vector<8x512xf32> to vector<8x128xf32>
    %95 = arith.negf %94 : vector<8x128xf32>
    %96 = math.exp %95 : vector<8x128xf32>
    %cst_38 = arith.constant 1.000000e+00 : f32
    %97 = vector.broadcast %cst_38 : f32 to vector<8x128xf32>
    %98 = arith.addf %97, %96 : vector<8x128xf32>
    %99 = arith.divf %97, %98 : vector<8x128xf32>
    %100 = vector.extract_strided_slice %87 {offsets = [0, 256], sizes = [8, 128], strides = [1, 1]} : vector<8x512xf32> to vector<8x128xf32>
    %101 = math.tanh %100 : vector<8x128xf32>
    %102 = vector.extract_strided_slice %87 {offsets = [0, 384], sizes = [8, 128], strides = [1, 1]} : vector<8x512xf32> to vector<8x128xf32>
    %103 = arith.negf %102 : vector<8x128xf32>
    %104 = math.exp %103 : vector<8x128xf32>
    %cst_39 = arith.constant 1.000000e+00 : f32
    %105 = vector.broadcast %cst_39 : f32 to vector<8x128xf32>
    %106 = arith.addf %105, %104 : vector<8x128xf32>
    %107 = arith.divf %105, %106 : vector<8x128xf32>
    %108 = arith.mulf %99, %43 : vector<8x128xf32>
    %109 = arith.mulf %93, %101 : vector<8x128xf32>
    %110 = arith.addf %108, %109 : vector<8x128xf32>
    %111 = math.tanh %110 : vector<8x128xf32>
    %112 = arith.mulf %107, %111 : vector<8x128xf32>
    %c0_40 = arith.constant 0 : index
    %c0_41 = arith.constant 0 : index
    %113 = vector.load %arg5[%c0_40, %c0_41] : memref<128x512xf32, #tpu.memory_space<vmem>>, vector<128x512xf32>
    %cst_42 = arith.constant dense<0.000000e+00> : vector<8x512xf32>
    %114 = tpu.matmul %112, %113, %cst_42 {dimension_numbers = #tpu.dot_dimension_numbers<[1], [0], [0], [1], [0, 0, 1, 1], [], []>} : vector<8x128xf32>, vector<128x512xf32>, vector<8x512xf32> -> vector<8x512xf32>
    %c0_43 = arith.constant 0 : index
    %c0_44 = arith.constant 0 : index
    %115 = vector.load %arg6[%c0_43, %c0_44] : memref<128x512xf32, #tpu.memory_space<vmem>>, vector<128x512xf32>
    %cst_45 = arith.constant dense<0.000000e+00> : vector<8x512xf32>
    %116 = tpu.matmul %78, %115, %cst_45 {dimension_numbers = #tpu.dot_dimension_numbers<[1], [0], [0], [1], [0, 0, 1, 1], [], []>} : vector<8x128xf32>, vector<128x512xf32>, vector<8x512xf32> -> vector<8x512xf32>
    %117 = arith.addf %114, %116 : vector<8x512xf32>
    %c0_46 = arith.constant 0 : index
    %c0_47 = arith.constant 0 : index
    %118 = vector.load %arg7[%c0_46, %c0_47] : memref<1x512xf32, #tpu.memory_space<vmem>>, vector<1x512xf32>
    %119 = vector.broadcast %118 : vector<1x512xf32> to vector<8x512xf32>
    %120 = arith.addf %117, %119 : vector<8x512xf32>
    %121 = vector.extract_strided_slice %120 {offsets = [0, 0], sizes = [8, 128], strides = [1, 1]} : vector<8x512xf32> to vector<8x128xf32>
    %122 = arith.negf %121 : vector<8x128xf32>
    %123 = math.exp %122 : vector<8x128xf32>
    %cst_48 = arith.constant 1.000000e+00 : f32
    %124 = vector.broadcast %cst_48 : f32 to vector<8x128xf32>
    %125 = arith.addf %124, %123 : vector<8x128xf32>
    %126 = arith.divf %124, %125 : vector<8x128xf32>
    %127 = vector.extract_strided_slice %120 {offsets = [0, 128], sizes = [8, 128], strides = [1, 1]} : vector<8x512xf32> to vector<8x128xf32>
    %128 = arith.negf %127 : vector<8x128xf32>
    %129 = math.exp %128 : vector<8x128xf32>
    %cst_49 = arith.constant 1.000000e+00 : f32
    %130 = vector.broadcast %cst_49 : f32 to vector<8x128xf32>
    %131 = arith.addf %130, %129 : vector<8x128xf32>
    %132 = arith.divf %130, %131 : vector<8x128xf32>
    %133 = vector.extract_strided_slice %120 {offsets = [0, 256], sizes = [8, 128], strides = [1, 1]} : vector<8x512xf32> to vector<8x128xf32>
    %134 = math.tanh %133 : vector<8x128xf32>
    %135 = vector.extract_strided_slice %120 {offsets = [0, 384], sizes = [8, 128], strides = [1, 1]} : vector<8x512xf32> to vector<8x128xf32>
    %136 = arith.negf %135 : vector<8x128xf32>
    %137 = math.exp %136 : vector<8x128xf32>
    %cst_50 = arith.constant 1.000000e+00 : f32
    %138 = vector.broadcast %cst_50 : f32 to vector<8x128xf32>
    %139 = arith.addf %138, %137 : vector<8x128xf32>
    %140 = arith.divf %138, %139 : vector<8x128xf32>
    %141 = arith.mulf %132, %76 : vector<8x128xf32>
    %142 = arith.mulf %126, %134 : vector<8x128xf32>
    %143 = arith.addf %141, %142 : vector<8x128xf32>
    %144 = math.tanh %143 : vector<8x128xf32>
    %145 = arith.mulf %140, %144 : vector<8x128xf32>
    %146 = vector.extract_strided_slice %7 {offsets = [16, 0], sizes = [8, 128], strides = [1, 1]} : vector<64x128xf32> to vector<8x128xf32>
    %c0_51 = arith.constant 0 : index
    %c0_52 = arith.constant 0 : index
    %147 = vector.load %arg2[%c0_51, %c0_52] : memref<128x512xf32, #tpu.memory_space<vmem>>, vector<128x512xf32>
    %cst_53 = arith.constant dense<0.000000e+00> : vector<8x512xf32>
    %148 = tpu.matmul %146, %147, %cst_53 {dimension_numbers = #tpu.dot_dimension_numbers<[1], [0], [0], [1], [0, 0, 1, 1], [], []>} : vector<8x128xf32>, vector<128x512xf32>, vector<8x512xf32> -> vector<8x512xf32>
    %c0_54 = arith.constant 0 : index
    %c0_55 = arith.constant 0 : index
    %149 = vector.load %arg3[%c0_54, %c0_55] : memref<128x512xf32, #tpu.memory_space<vmem>>, vector<128x512xf32>
    %cst_56 = arith.constant dense<0.000000e+00> : vector<8x512xf32>
    %150 = tpu.matmul %112, %149, %cst_56 {dimension_numbers = #tpu.dot_dimension_numbers<[1], [0], [0], [1], [0, 0, 1, 1], [], []>} : vector<8x128xf32>, vector<128x512xf32>, vector<8x512xf32> -> vector<8x512xf32>
    %151 = arith.addf %148, %150 : vector<8x512xf32>
    %c0_57 = arith.constant 0 : index
    %c0_58 = arith.constant 0 : index
    %152 = vector.load %arg4[%c0_57, %c0_58] : memref<1x512xf32, #tpu.memory_space<vmem>>, vector<1x512xf32>
    %153 = vector.broadcast %152 : vector<1x512xf32> to vector<8x512xf32>
    %154 = arith.addf %151, %153 : vector<8x512xf32>
    %155 = vector.extract_strided_slice %154 {offsets = [0, 0], sizes = [8, 128], strides = [1, 1]} : vector<8x512xf32> to vector<8x128xf32>
    %156 = arith.negf %155 : vector<8x128xf32>
    %157 = math.exp %156 : vector<8x128xf32>
    %cst_59 = arith.constant 1.000000e+00 : f32
    %158 = vector.broadcast %cst_59 : f32 to vector<8x128xf32>
    %159 = arith.addf %158, %157 : vector<8x128xf32>
    %160 = arith.divf %158, %159 : vector<8x128xf32>
    %161 = vector.extract_strided_slice %154 {offsets = [0, 128], sizes = [8, 128], strides = [1, 1]} : vector<8x512xf32> to vector<8x128xf32>
    %162 = arith.negf %161 : vector<8x128xf32>
    %163 = math.exp %162 : vector<8x128xf32>
    %cst_60 = arith.constant 1.000000e+00 : f32
    %164 = vector.broadcast %cst_60 : f32 to vector<8x128xf32>
    %165 = arith.addf %164, %163 : vector<8x128xf32>
    %166 = arith.divf %164, %165 : vector<8x128xf32>
    %167 = vector.extract_strided_slice %154 {offsets = [0, 256], sizes = [8, 128], strides = [1, 1]} : vector<8x512xf32> to vector<8x128xf32>
    %168 = math.tanh %167 : vector<8x128xf32>
    %169 = vector.extract_strided_slice %154 {offsets = [0, 384], sizes = [8, 128], strides = [1, 1]} : vector<8x512xf32> to vector<8x128xf32>
    %170 = arith.negf %169 : vector<8x128xf32>
    %171 = math.exp %170 : vector<8x128xf32>
    %cst_61 = arith.constant 1.000000e+00 : f32
    %172 = vector.broadcast %cst_61 : f32 to vector<8x128xf32>
    %173 = arith.addf %172, %171 : vector<8x128xf32>
    %174 = arith.divf %172, %173 : vector<8x128xf32>
    %175 = arith.mulf %166, %110 : vector<8x128xf32>
    %176 = arith.mulf %160, %168 : vector<8x128xf32>
    %177 = arith.addf %175, %176 : vector<8x128xf32>
    %178 = math.tanh %177 : vector<8x128xf32>
    %179 = arith.mulf %174, %178 : vector<8x128xf32>
    %c0_62 = arith.constant 0 : index
    %c0_63 = arith.constant 0 : index
    %180 = vector.load %arg5[%c0_62, %c0_63] : memref<128x512xf32, #tpu.memory_space<vmem>>, vector<128x512xf32>
    %cst_64 = arith.constant dense<0.000000e+00> : vector<8x512xf32>
    %181 = tpu.matmul %179, %180, %cst_64 {dimension_numbers = #tpu.dot_dimension_numbers<[1], [0], [0], [1], [0, 0, 1, 1], [], []>} : vector<8x128xf32>, vector<128x512xf32>, vector<8x512xf32> -> vector<8x512xf32>
    %c0_65 = arith.constant 0 : index
    %c0_66 = arith.constant 0 : index
    %182 = vector.load %arg6[%c0_65, %c0_66] : memref<128x512xf32, #tpu.memory_space<vmem>>, vector<128x512xf32>
    %cst_67 = arith.constant dense<0.000000e+00> : vector<8x512xf32>
    %183 = tpu.matmul %145, %182, %cst_67 {dimension_numbers = #tpu.dot_dimension_numbers<[1], [0], [0], [1], [0, 0, 1, 1], [], []>} : vector<8x128xf32>, vector<128x512xf32>, vector<8x512xf32> -> vector<8x512xf32>
    %184 = arith.addf %181, %183 : vector<8x512xf32>
    %c0_68 = arith.constant 0 : index
    %c0_69 = arith.constant 0 : index
    %185 = vector.load %arg7[%c0_68, %c0_69] : memref<1x512xf32, #tpu.memory_space<vmem>>, vector<1x512xf32>
    %186 = vector.broadcast %185 : vector<1x512xf32> to vector<8x512xf32>
    %187 = arith.addf %184, %186 : vector<8x512xf32>
    %188 = vector.extract_strided_slice %187 {offsets = [0, 0], sizes = [8, 128], strides = [1, 1]} : vector<8x512xf32> to vector<8x128xf32>
    %189 = arith.negf %188 : vector<8x128xf32>
    %190 = math.exp %189 : vector<8x128xf32>
    %cst_70 = arith.constant 1.000000e+00 : f32
    %191 = vector.broadcast %cst_70 : f32 to vector<8x128xf32>
    %192 = arith.addf %191, %190 : vector<8x128xf32>
    %193 = arith.divf %191, %192 : vector<8x128xf32>
    %194 = vector.extract_strided_slice %187 {offsets = [0, 128], sizes = [8, 128], strides = [1, 1]} : vector<8x512xf32> to vector<8x128xf32>
    %195 = arith.negf %194 : vector<8x128xf32>
    %196 = math.exp %195 : vector<8x128xf32>
    %cst_71 = arith.constant 1.000000e+00 : f32
    %197 = vector.broadcast %cst_71 : f32 to vector<8x128xf32>
    %198 = arith.addf %197, %196 : vector<8x128xf32>
    %199 = arith.divf %197, %198 : vector<8x128xf32>
    %200 = vector.extract_strided_slice %187 {offsets = [0, 256], sizes = [8, 128], strides = [1, 1]} : vector<8x512xf32> to vector<8x128xf32>
    %201 = math.tanh %200 : vector<8x128xf32>
    %202 = vector.extract_strided_slice %187 {offsets = [0, 384], sizes = [8, 128], strides = [1, 1]} : vector<8x512xf32> to vector<8x128xf32>
    %203 = arith.negf %202 : vector<8x128xf32>
    %204 = math.exp %203 : vector<8x128xf32>
    %cst_72 = arith.constant 1.000000e+00 : f32
    %205 = vector.broadcast %cst_72 : f32 to vector<8x128xf32>
    %206 = arith.addf %205, %204 : vector<8x128xf32>
    %207 = arith.divf %205, %206 : vector<8x128xf32>
    %208 = arith.mulf %199, %143 : vector<8x128xf32>
    %209 = arith.mulf %193, %201 : vector<8x128xf32>
    %210 = arith.addf %208, %209 : vector<8x128xf32>
    %211 = math.tanh %210 : vector<8x128xf32>
    %212 = arith.mulf %207, %211 : vector<8x128xf32>
    %213 = vector.extract_strided_slice %7 {offsets = [24, 0], sizes = [8, 128], strides = [1, 1]} : vector<64x128xf32> to vector<8x128xf32>
    %c0_73 = arith.constant 0 : index
    %c0_74 = arith.constant 0 : index
    %214 = vector.load %arg2[%c0_73, %c0_74] : memref<128x512xf32, #tpu.memory_space<vmem>>, vector<128x512xf32>
    %cst_75 = arith.constant dense<0.000000e+00> : vector<8x512xf32>
    %215 = tpu.matmul %213, %214, %cst_75 {dimension_numbers = #tpu.dot_dimension_numbers<[1], [0], [0], [1], [0, 0, 1, 1], [], []>} : vector<8x128xf32>, vector<128x512xf32>, vector<8x512xf32> -> vector<8x512xf32>
    %c0_76 = arith.constant 0 : index
    %c0_77 = arith.constant 0 : index
    %216 = vector.load %arg3[%c0_76, %c0_77] : memref<128x512xf32, #tpu.memory_space<vmem>>, vector<128x512xf32>
    %cst_78 = arith.constant dense<0.000000e+00> : vector<8x512xf32>
    %217 = tpu.matmul %179, %216, %cst_78 {dimension_numbers = #tpu.dot_dimension_numbers<[1], [0], [0], [1], [0, 0, 1, 1], [], []>} : vector<8x128xf32>, vector<128x512xf32>, vector<8x512xf32> -> vector<8x512xf32>
    %218 = arith.addf %215, %217 : vector<8x512xf32>
    %c0_79 = arith.constant 0 : index
    %c0_80 = arith.constant 0 : index
    %219 = vector.load %arg4[%c0_79, %c0_80] : memref<1x512xf32, #tpu.memory_space<vmem>>, vector<1x512xf32>
    %220 = vector.broadcast %219 : vector<1x512xf32> to vector<8x512xf32>
    %221 = arith.addf %218, %220 : vector<8x512xf32>
    %222 = vector.extract_strided_slice %221 {offsets = [0, 0], sizes = [8, 128], strides = [1, 1]} : vector<8x512xf32> to vector<8x128xf32>
    %223 = arith.negf %222 : vector<8x128xf32>
    %224 = math.exp %223 : vector<8x128xf32>
    %cst_81 = arith.constant 1.000000e+00 : f32
    %225 = vector.broadcast %cst_81 : f32 to vector<8x128xf32>
    %226 = arith.addf %225, %224 : vector<8x128xf32>
    %227 = arith.divf %225, %226 : vector<8x128xf32>
    %228 = vector.extract_strided_slice %221 {offsets = [0, 128], sizes = [8, 128], strides = [1, 1]} : vector<8x512xf32> to vector<8x128xf32>
    %229 = arith.negf %228 : vector<8x128xf32>
    %230 = math.exp %229 : vector<8x128xf32>
    %cst_82 = arith.constant 1.000000e+00 : f32
    %231 = vector.broadcast %cst_82 : f32 to vector<8x128xf32>
    %232 = arith.addf %231, %230 : vector<8x128xf32>
    %233 = arith.divf %231, %232 : vector<8x128xf32>
    %234 = vector.extract_strided_slice %221 {offsets = [0, 256], sizes = [8, 128], strides = [1, 1]} : vector<8x512xf32> to vector<8x128xf32>
    %235 = math.tanh %234 : vector<8x128xf32>
    %236 = vector.extract_strided_slice %221 {offsets = [0, 384], sizes = [8, 128], strides = [1, 1]} : vector<8x512xf32> to vector<8x128xf32>
    %237 = arith.negf %236 : vector<8x128xf32>
    %238 = math.exp %237 : vector<8x128xf32>
    %cst_83 = arith.constant 1.000000e+00 : f32
    %239 = vector.broadcast %cst_83 : f32 to vector<8x128xf32>
    %240 = arith.addf %239, %238 : vector<8x128xf32>
    %241 = arith.divf %239, %240 : vector<8x128xf32>
    %242 = arith.mulf %233, %177 : vector<8x128xf32>
    %243 = arith.mulf %227, %235 : vector<8x128xf32>
    %244 = arith.addf %242, %243 : vector<8x128xf32>
    %245 = math.tanh %244 : vector<8x128xf32>
    %246 = arith.mulf %241, %245 : vector<8x128xf32>
    %c0_84 = arith.constant 0 : index
    %c0_85 = arith.constant 0 : index
    %247 = vector.load %arg5[%c0_84, %c0_85] : memref<128x512xf32, #tpu.memory_space<vmem>>, vector<128x512xf32>
    %cst_86 = arith.constant dense<0.000000e+00> : vector<8x512xf32>
    %248 = tpu.matmul %246, %247, %cst_86 {dimension_numbers = #tpu.dot_dimension_numbers<[1], [0], [0], [1], [0, 0, 1, 1], [], []>} : vector<8x128xf32>, vector<128x512xf32>, vector<8x512xf32> -> vector<8x512xf32>
    %c0_87 = arith.constant 0 : index
    %c0_88 = arith.constant 0 : index
    %249 = vector.load %arg6[%c0_87, %c0_88] : memref<128x512xf32, #tpu.memory_space<vmem>>, vector<128x512xf32>
    %cst_89 = arith.constant dense<0.000000e+00> : vector<8x512xf32>
    %250 = tpu.matmul %212, %249, %cst_89 {dimension_numbers = #tpu.dot_dimension_numbers<[1], [0], [0], [1], [0, 0, 1, 1], [], []>} : vector<8x128xf32>, vector<128x512xf32>, vector<8x512xf32> -> vector<8x512xf32>
    %251 = arith.addf %248, %250 : vector<8x512xf32>
    %c0_90 = arith.constant 0 : index
    %c0_91 = arith.constant 0 : index
    %252 = vector.load %arg7[%c0_90, %c0_91] : memref<1x512xf32, #tpu.memory_space<vmem>>, vector<1x512xf32>
    %253 = vector.broadcast %252 : vector<1x512xf32> to vector<8x512xf32>
    %254 = arith.addf %251, %253 : vector<8x512xf32>
    %255 = vector.extract_strided_slice %254 {offsets = [0, 0], sizes = [8, 128], strides = [1, 1]} : vector<8x512xf32> to vector<8x128xf32>
    %256 = arith.negf %255 : vector<8x128xf32>
    %257 = math.exp %256 : vector<8x128xf32>
    %cst_92 = arith.constant 1.000000e+00 : f32
    %258 = vector.broadcast %cst_92 : f32 to vector<8x128xf32>
    %259 = arith.addf %258, %257 : vector<8x128xf32>
    %260 = arith.divf %258, %259 : vector<8x128xf32>
    %261 = vector.extract_strided_slice %254 {offsets = [0, 128], sizes = [8, 128], strides = [1, 1]} : vector<8x512xf32> to vector<8x128xf32>
    %262 = arith.negf %261 : vector<8x128xf32>
    %263 = math.exp %262 : vector<8x128xf32>
    %cst_93 = arith.constant 1.000000e+00 : f32
    %264 = vector.broadcast %cst_93 : f32 to vector<8x128xf32>
    %265 = arith.addf %264, %263 : vector<8x128xf32>
    %266 = arith.divf %264, %265 : vector<8x128xf32>
    %267 = vector.extract_strided_slice %254 {offsets = [0, 256], sizes = [8, 128], strides = [1, 1]} : vector<8x512xf32> to vector<8x128xf32>
    %268 = math.tanh %267 : vector<8x128xf32>
    %269 = vector.extract_strided_slice %254 {offsets = [0, 384], sizes = [8, 128], strides = [1, 1]} : vector<8x512xf32> to vector<8x128xf32>
    %270 = arith.negf %269 : vector<8x128xf32>
    %271 = math.exp %270 : vector<8x128xf32>
    %cst_94 = arith.constant 1.000000e+00 : f32
    %272 = vector.broadcast %cst_94 : f32 to vector<8x128xf32>
    %273 = arith.addf %272, %271 : vector<8x128xf32>
    %274 = arith.divf %272, %273 : vector<8x128xf32>
    %275 = arith.mulf %266, %210 : vector<8x128xf32>
    %276 = arith.mulf %260, %268 : vector<8x128xf32>
    %277 = arith.addf %275, %276 : vector<8x128xf32>
    %278 = math.tanh %277 : vector<8x128xf32>
    %279 = arith.mulf %274, %278 : vector<8x128xf32>
    %280 = vector.extract_strided_slice %7 {offsets = [32, 0], sizes = [8, 128], strides = [1, 1]} : vector<64x128xf32> to vector<8x128xf32>
    %c0_95 = arith.constant 0 : index
    %c0_96 = arith.constant 0 : index
    %281 = vector.load %arg2[%c0_95, %c0_96] : memref<128x512xf32, #tpu.memory_space<vmem>>, vector<128x512xf32>
    %cst_97 = arith.constant dense<0.000000e+00> : vector<8x512xf32>
    %282 = tpu.matmul %280, %281, %cst_97 {dimension_numbers = #tpu.dot_dimension_numbers<[1], [0], [0], [1], [0, 0, 1, 1], [], []>} : vector<8x128xf32>, vector<128x512xf32>, vector<8x512xf32> -> vector<8x512xf32>
    %c0_98 = arith.constant 0 : index
    %c0_99 = arith.constant 0 : index
    %283 = vector.load %arg3[%c0_98, %c0_99] : memref<128x512xf32, #tpu.memory_space<vmem>>, vector<128x512xf32>
    %cst_100 = arith.constant dense<0.000000e+00> : vector<8x512xf32>
    %284 = tpu.matmul %246, %283, %cst_100 {dimension_numbers = #tpu.dot_dimension_numbers<[1], [0], [0], [1], [0, 0, 1, 1], [], []>} : vector<8x128xf32>, vector<128x512xf32>, vector<8x512xf32> -> vector<8x512xf32>
    %285 = arith.addf %282, %284 : vector<8x512xf32>
    %c0_101 = arith.constant 0 : index
    %c0_102 = arith.constant 0 : index
    %286 = vector.load %arg4[%c0_101, %c0_102] : memref<1x512xf32, #tpu.memory_space<vmem>>, vector<1x512xf32>
    %287 = vector.broadcast %286 : vector<1x512xf32> to vector<8x512xf32>
    %288 = arith.addf %285, %287 : vector<8x512xf32>
    %289 = vector.extract_strided_slice %288 {offsets = [0, 0], sizes = [8, 128], strides = [1, 1]} : vector<8x512xf32> to vector<8x128xf32>
    %290 = arith.negf %289 : vector<8x128xf32>
    %291 = math.exp %290 : vector<8x128xf32>
    %cst_103 = arith.constant 1.000000e+00 : f32
    %292 = vector.broadcast %cst_103 : f32 to vector<8x128xf32>
    %293 = arith.addf %292, %291 : vector<8x128xf32>
    %294 = arith.divf %292, %293 : vector<8x128xf32>
    %295 = vector.extract_strided_slice %288 {offsets = [0, 128], sizes = [8, 128], strides = [1, 1]} : vector<8x512xf32> to vector<8x128xf32>
    %296 = arith.negf %295 : vector<8x128xf32>
    %297 = math.exp %296 : vector<8x128xf32>
    %cst_104 = arith.constant 1.000000e+00 : f32
    %298 = vector.broadcast %cst_104 : f32 to vector<8x128xf32>
    %299 = arith.addf %298, %297 : vector<8x128xf32>
    %300 = arith.divf %298, %299 : vector<8x128xf32>
    %301 = vector.extract_strided_slice %288 {offsets = [0, 256], sizes = [8, 128], strides = [1, 1]} : vector<8x512xf32> to vector<8x128xf32>
    %302 = math.tanh %301 : vector<8x128xf32>
    %303 = vector.extract_strided_slice %288 {offsets = [0, 384], sizes = [8, 128], strides = [1, 1]} : vector<8x512xf32> to vector<8x128xf32>
    %304 = arith.negf %303 : vector<8x128xf32>
    %305 = math.exp %304 : vector<8x128xf32>
    %cst_105 = arith.constant 1.000000e+00 : f32
    %306 = vector.broadcast %cst_105 : f32 to vector<8x128xf32>
    %307 = arith.addf %306, %305 : vector<8x128xf32>
    %308 = arith.divf %306, %307 : vector<8x128xf32>
    %309 = arith.mulf %300, %244 : vector<8x128xf32>
    %310 = arith.mulf %294, %302 : vector<8x128xf32>
    %311 = arith.addf %309, %310 : vector<8x128xf32>
    %312 = math.tanh %311 : vector<8x128xf32>
    %313 = arith.mulf %308, %312 : vector<8x128xf32>
    %c0_106 = arith.constant 0 : index
    %c0_107 = arith.constant 0 : index
    %314 = vector.load %arg5[%c0_106, %c0_107] : memref<128x512xf32, #tpu.memory_space<vmem>>, vector<128x512xf32>
    %cst_108 = arith.constant dense<0.000000e+00> : vector<8x512xf32>
    %315 = tpu.matmul %313, %314, %cst_108 {dimension_numbers = #tpu.dot_dimension_numbers<[1], [0], [0], [1], [0, 0, 1, 1], [], []>} : vector<8x128xf32>, vector<128x512xf32>, vector<8x512xf32> -> vector<8x512xf32>
    %c0_109 = arith.constant 0 : index
    %c0_110 = arith.constant 0 : index
    %316 = vector.load %arg6[%c0_109, %c0_110] : memref<128x512xf32, #tpu.memory_space<vmem>>, vector<128x512xf32>
    %cst_111 = arith.constant dense<0.000000e+00> : vector<8x512xf32>
    %317 = tpu.matmul %279, %316, %cst_111 {dimension_numbers = #tpu.dot_dimension_numbers<[1], [0], [0], [1], [0, 0, 1, 1], [], []>} : vector<8x128xf32>, vector<128x512xf32>, vector<8x512xf32> -> vector<8x512xf32>
    %318 = arith.addf %315, %317 : vector<8x512xf32>
    %c0_112 = arith.constant 0 : index
    %c0_113 = arith.constant 0 : index
    %319 = vector.load %arg7[%c0_112, %c0_113] : memref<1x512xf32, #tpu.memory_space<vmem>>, vector<1x512xf32>
    %320 = vector.broadcast %319 : vector<1x512xf32> to vector<8x512xf32>
    %321 = arith.addf %318, %320 : vector<8x512xf32>
    %322 = vector.extract_strided_slice %321 {offsets = [0, 0], sizes = [8, 128], strides = [1, 1]} : vector<8x512xf32> to vector<8x128xf32>
    %323 = arith.negf %322 : vector<8x128xf32>
    %324 = math.exp %323 : vector<8x128xf32>
    %cst_114 = arith.constant 1.000000e+00 : f32
    %325 = vector.broadcast %cst_114 : f32 to vector<8x128xf32>
    %326 = arith.addf %325, %324 : vector<8x128xf32>
    %327 = arith.divf %325, %326 : vector<8x128xf32>
    %328 = vector.extract_strided_slice %321 {offsets = [0, 128], sizes = [8, 128], strides = [1, 1]} : vector<8x512xf32> to vector<8x128xf32>
    %329 = arith.negf %328 : vector<8x128xf32>
    %330 = math.exp %329 : vector<8x128xf32>
    %cst_115 = arith.constant 1.000000e+00 : f32
    %331 = vector.broadcast %cst_115 : f32 to vector<8x128xf32>
    %332 = arith.addf %331, %330 : vector<8x128xf32>
    %333 = arith.divf %331, %332 : vector<8x128xf32>
    %334 = vector.extract_strided_slice %321 {offsets = [0, 256], sizes = [8, 128], strides = [1, 1]} : vector<8x512xf32> to vector<8x128xf32>
    %335 = math.tanh %334 : vector<8x128xf32>
    %336 = vector.extract_strided_slice %321 {offsets = [0, 384], sizes = [8, 128], strides = [1, 1]} : vector<8x512xf32> to vector<8x128xf32>
    %337 = arith.negf %336 : vector<8x128xf32>
    %338 = math.exp %337 : vector<8x128xf32>
    %cst_116 = arith.constant 1.000000e+00 : f32
    %339 = vector.broadcast %cst_116 : f32 to vector<8x128xf32>
    %340 = arith.addf %339, %338 : vector<8x128xf32>
    %341 = arith.divf %339, %340 : vector<8x128xf32>
    %342 = arith.mulf %333, %277 : vector<8x128xf32>
    %343 = arith.mulf %327, %335 : vector<8x128xf32>
    %344 = arith.addf %342, %343 : vector<8x128xf32>
    %345 = math.tanh %344 : vector<8x128xf32>
    %346 = arith.mulf %341, %345 : vector<8x128xf32>
    %347 = vector.extract_strided_slice %7 {offsets = [40, 0], sizes = [8, 128], strides = [1, 1]} : vector<64x128xf32> to vector<8x128xf32>
    %c0_117 = arith.constant 0 : index
    %c0_118 = arith.constant 0 : index
    %348 = vector.load %arg2[%c0_117, %c0_118] : memref<128x512xf32, #tpu.memory_space<vmem>>, vector<128x512xf32>
    %cst_119 = arith.constant dense<0.000000e+00> : vector<8x512xf32>
    %349 = tpu.matmul %347, %348, %cst_119 {dimension_numbers = #tpu.dot_dimension_numbers<[1], [0], [0], [1], [0, 0, 1, 1], [], []>} : vector<8x128xf32>, vector<128x512xf32>, vector<8x512xf32> -> vector<8x512xf32>
    %c0_120 = arith.constant 0 : index
    %c0_121 = arith.constant 0 : index
    %350 = vector.load %arg3[%c0_120, %c0_121] : memref<128x512xf32, #tpu.memory_space<vmem>>, vector<128x512xf32>
    %cst_122 = arith.constant dense<0.000000e+00> : vector<8x512xf32>
    %351 = tpu.matmul %313, %350, %cst_122 {dimension_numbers = #tpu.dot_dimension_numbers<[1], [0], [0], [1], [0, 0, 1, 1], [], []>} : vector<8x128xf32>, vector<128x512xf32>, vector<8x512xf32> -> vector<8x512xf32>
    %352 = arith.addf %349, %351 : vector<8x512xf32>
    %c0_123 = arith.constant 0 : index
    %c0_124 = arith.constant 0 : index
    %353 = vector.load %arg4[%c0_123, %c0_124] : memref<1x512xf32, #tpu.memory_space<vmem>>, vector<1x512xf32>
    %354 = vector.broadcast %353 : vector<1x512xf32> to vector<8x512xf32>
    %355 = arith.addf %352, %354 : vector<8x512xf32>
    %356 = vector.extract_strided_slice %355 {offsets = [0, 0], sizes = [8, 128], strides = [1, 1]} : vector<8x512xf32> to vector<8x128xf32>
    %357 = arith.negf %356 : vector<8x128xf32>
    %358 = math.exp %357 : vector<8x128xf32>
    %cst_125 = arith.constant 1.000000e+00 : f32
    %359 = vector.broadcast %cst_125 : f32 to vector<8x128xf32>
    %360 = arith.addf %359, %358 : vector<8x128xf32>
    %361 = arith.divf %359, %360 : vector<8x128xf32>
    %362 = vector.extract_strided_slice %355 {offsets = [0, 128], sizes = [8, 128], strides = [1, 1]} : vector<8x512xf32> to vector<8x128xf32>
    %363 = arith.negf %362 : vector<8x128xf32>
    %364 = math.exp %363 : vector<8x128xf32>
    %cst_126 = arith.constant 1.000000e+00 : f32
    %365 = vector.broadcast %cst_126 : f32 to vector<8x128xf32>
    %366 = arith.addf %365, %364 : vector<8x128xf32>
    %367 = arith.divf %365, %366 : vector<8x128xf32>
    %368 = vector.extract_strided_slice %355 {offsets = [0, 256], sizes = [8, 128], strides = [1, 1]} : vector<8x512xf32> to vector<8x128xf32>
    %369 = math.tanh %368 : vector<8x128xf32>
    %370 = vector.extract_strided_slice %355 {offsets = [0, 384], sizes = [8, 128], strides = [1, 1]} : vector<8x512xf32> to vector<8x128xf32>
    %371 = arith.negf %370 : vector<8x128xf32>
    %372 = math.exp %371 : vector<8x128xf32>
    %cst_127 = arith.constant 1.000000e+00 : f32
    %373 = vector.broadcast %cst_127 : f32 to vector<8x128xf32>
    %374 = arith.addf %373, %372 : vector<8x128xf32>
    %375 = arith.divf %373, %374 : vector<8x128xf32>
    %376 = arith.mulf %367, %311 : vector<8x128xf32>
    %377 = arith.mulf %361, %369 : vector<8x128xf32>
    %378 = arith.addf %376, %377 : vector<8x128xf32>
    %379 = math.tanh %378 : vector<8x128xf32>
    %380 = arith.mulf %375, %379 : vector<8x128xf32>
    %c0_128 = arith.constant 0 : index
    %c0_129 = arith.constant 0 : index
    %381 = vector.load %arg5[%c0_128, %c0_129] : memref<128x512xf32, #tpu.memory_space<vmem>>, vector<128x512xf32>
    %cst_130 = arith.constant dense<0.000000e+00> : vector<8x512xf32>
    %382 = tpu.matmul %380, %381, %cst_130 {dimension_numbers = #tpu.dot_dimension_numbers<[1], [0], [0], [1], [0, 0, 1, 1], [], []>} : vector<8x128xf32>, vector<128x512xf32>, vector<8x512xf32> -> vector<8x512xf32>
    %c0_131 = arith.constant 0 : index
    %c0_132 = arith.constant 0 : index
    %383 = vector.load %arg6[%c0_131, %c0_132] : memref<128x512xf32, #tpu.memory_space<vmem>>, vector<128x512xf32>
    %cst_133 = arith.constant dense<0.000000e+00> : vector<8x512xf32>
    %384 = tpu.matmul %346, %383, %cst_133 {dimension_numbers = #tpu.dot_dimension_numbers<[1], [0], [0], [1], [0, 0, 1, 1], [], []>} : vector<8x128xf32>, vector<128x512xf32>, vector<8x512xf32> -> vector<8x512xf32>
    %385 = arith.addf %382, %384 : vector<8x512xf32>
    %c0_134 = arith.constant 0 : index
    %c0_135 = arith.constant 0 : index
    %386 = vector.load %arg7[%c0_134, %c0_135] : memref<1x512xf32, #tpu.memory_space<vmem>>, vector<1x512xf32>
    %387 = vector.broadcast %386 : vector<1x512xf32> to vector<8x512xf32>
    %388 = arith.addf %385, %387 : vector<8x512xf32>
    %389 = vector.extract_strided_slice %388 {offsets = [0, 0], sizes = [8, 128], strides = [1, 1]} : vector<8x512xf32> to vector<8x128xf32>
    %390 = arith.negf %389 : vector<8x128xf32>
    %391 = math.exp %390 : vector<8x128xf32>
    %cst_136 = arith.constant 1.000000e+00 : f32
    %392 = vector.broadcast %cst_136 : f32 to vector<8x128xf32>
    %393 = arith.addf %392, %391 : vector<8x128xf32>
    %394 = arith.divf %392, %393 : vector<8x128xf32>
    %395 = vector.extract_strided_slice %388 {offsets = [0, 128], sizes = [8, 128], strides = [1, 1]} : vector<8x512xf32> to vector<8x128xf32>
    %396 = arith.negf %395 : vector<8x128xf32>
    %397 = math.exp %396 : vector<8x128xf32>
    %cst_137 = arith.constant 1.000000e+00 : f32
    %398 = vector.broadcast %cst_137 : f32 to vector<8x128xf32>
    %399 = arith.addf %398, %397 : vector<8x128xf32>
    %400 = arith.divf %398, %399 : vector<8x128xf32>
    %401 = vector.extract_strided_slice %388 {offsets = [0, 256], sizes = [8, 128], strides = [1, 1]} : vector<8x512xf32> to vector<8x128xf32>
    %402 = math.tanh %401 : vector<8x128xf32>
    %403 = vector.extract_strided_slice %388 {offsets = [0, 384], sizes = [8, 128], strides = [1, 1]} : vector<8x512xf32> to vector<8x128xf32>
    %404 = arith.negf %403 : vector<8x128xf32>
    %405 = math.exp %404 : vector<8x128xf32>
    %cst_138 = arith.constant 1.000000e+00 : f32
    %406 = vector.broadcast %cst_138 : f32 to vector<8x128xf32>
    %407 = arith.addf %406, %405 : vector<8x128xf32>
    %408 = arith.divf %406, %407 : vector<8x128xf32>
    %409 = arith.mulf %400, %344 : vector<8x128xf32>
    %410 = arith.mulf %394, %402 : vector<8x128xf32>
    %411 = arith.addf %409, %410 : vector<8x128xf32>
    %412 = math.tanh %411 : vector<8x128xf32>
    %413 = arith.mulf %408, %412 : vector<8x128xf32>
    %414 = vector.extract_strided_slice %7 {offsets = [48, 0], sizes = [8, 128], strides = [1, 1]} : vector<64x128xf32> to vector<8x128xf32>
    %c0_139 = arith.constant 0 : index
    %c0_140 = arith.constant 0 : index
    %415 = vector.load %arg2[%c0_139, %c0_140] : memref<128x512xf32, #tpu.memory_space<vmem>>, vector<128x512xf32>
    %cst_141 = arith.constant dense<0.000000e+00> : vector<8x512xf32>
    %416 = tpu.matmul %414, %415, %cst_141 {dimension_numbers = #tpu.dot_dimension_numbers<[1], [0], [0], [1], [0, 0, 1, 1], [], []>} : vector<8x128xf32>, vector<128x512xf32>, vector<8x512xf32> -> vector<8x512xf32>
    %c0_142 = arith.constant 0 : index
    %c0_143 = arith.constant 0 : index
    %417 = vector.load %arg3[%c0_142, %c0_143] : memref<128x512xf32, #tpu.memory_space<vmem>>, vector<128x512xf32>
    %cst_144 = arith.constant dense<0.000000e+00> : vector<8x512xf32>
    %418 = tpu.matmul %380, %417, %cst_144 {dimension_numbers = #tpu.dot_dimension_numbers<[1], [0], [0], [1], [0, 0, 1, 1], [], []>} : vector<8x128xf32>, vector<128x512xf32>, vector<8x512xf32> -> vector<8x512xf32>
    %419 = arith.addf %416, %418 : vector<8x512xf32>
    %c0_145 = arith.constant 0 : index
    %c0_146 = arith.constant 0 : index
    %420 = vector.load %arg4[%c0_145, %c0_146] : memref<1x512xf32, #tpu.memory_space<vmem>>, vector<1x512xf32>
    %421 = vector.broadcast %420 : vector<1x512xf32> to vector<8x512xf32>
    %422 = arith.addf %419, %421 : vector<8x512xf32>
    %423 = vector.extract_strided_slice %422 {offsets = [0, 0], sizes = [8, 128], strides = [1, 1]} : vector<8x512xf32> to vector<8x128xf32>
    %424 = arith.negf %423 : vector<8x128xf32>
    %425 = math.exp %424 : vector<8x128xf32>
    %cst_147 = arith.constant 1.000000e+00 : f32
    %426 = vector.broadcast %cst_147 : f32 to vector<8x128xf32>
    %427 = arith.addf %426, %425 : vector<8x128xf32>
    %428 = arith.divf %426, %427 : vector<8x128xf32>
    %429 = vector.extract_strided_slice %422 {offsets = [0, 128], sizes = [8, 128], strides = [1, 1]} : vector<8x512xf32> to vector<8x128xf32>
    %430 = arith.negf %429 : vector<8x128xf32>
    %431 = math.exp %430 : vector<8x128xf32>
    %cst_148 = arith.constant 1.000000e+00 : f32
    %432 = vector.broadcast %cst_148 : f32 to vector<8x128xf32>
    %433 = arith.addf %432, %431 : vector<8x128xf32>
    %434 = arith.divf %432, %433 : vector<8x128xf32>
    %435 = vector.extract_strided_slice %422 {offsets = [0, 256], sizes = [8, 128], strides = [1, 1]} : vector<8x512xf32> to vector<8x128xf32>
    %436 = math.tanh %435 : vector<8x128xf32>
    %437 = vector.extract_strided_slice %422 {offsets = [0, 384], sizes = [8, 128], strides = [1, 1]} : vector<8x512xf32> to vector<8x128xf32>
    %438 = arith.negf %437 : vector<8x128xf32>
    %439 = math.exp %438 : vector<8x128xf32>
    %cst_149 = arith.constant 1.000000e+00 : f32
    %440 = vector.broadcast %cst_149 : f32 to vector<8x128xf32>
    %441 = arith.addf %440, %439 : vector<8x128xf32>
    %442 = arith.divf %440, %441 : vector<8x128xf32>
    %443 = arith.mulf %434, %378 : vector<8x128xf32>
    %444 = arith.mulf %428, %436 : vector<8x128xf32>
    %445 = arith.addf %443, %444 : vector<8x128xf32>
    %446 = math.tanh %445 : vector<8x128xf32>
    %447 = arith.mulf %442, %446 : vector<8x128xf32>
    %c0_150 = arith.constant 0 : index
    %c0_151 = arith.constant 0 : index
    %448 = vector.load %arg5[%c0_150, %c0_151] : memref<128x512xf32, #tpu.memory_space<vmem>>, vector<128x512xf32>
    %cst_152 = arith.constant dense<0.000000e+00> : vector<8x512xf32>
    %449 = tpu.matmul %447, %448, %cst_152 {dimension_numbers = #tpu.dot_dimension_numbers<[1], [0], [0], [1], [0, 0, 1, 1], [], []>} : vector<8x128xf32>, vector<128x512xf32>, vector<8x512xf32> -> vector<8x512xf32>
    %c0_153 = arith.constant 0 : index
    %c0_154 = arith.constant 0 : index
    %450 = vector.load %arg6[%c0_153, %c0_154] : memref<128x512xf32, #tpu.memory_space<vmem>>, vector<128x512xf32>
    %cst_155 = arith.constant dense<0.000000e+00> : vector<8x512xf32>
    %451 = tpu.matmul %413, %450, %cst_155 {dimension_numbers = #tpu.dot_dimension_numbers<[1], [0], [0], [1], [0, 0, 1, 1], [], []>} : vector<8x128xf32>, vector<128x512xf32>, vector<8x512xf32> -> vector<8x512xf32>
    %452 = arith.addf %449, %451 : vector<8x512xf32>
    %c0_156 = arith.constant 0 : index
    %c0_157 = arith.constant 0 : index
    %453 = vector.load %arg7[%c0_156, %c0_157] : memref<1x512xf32, #tpu.memory_space<vmem>>, vector<1x512xf32>
    %454 = vector.broadcast %453 : vector<1x512xf32> to vector<8x512xf32>
    %455 = arith.addf %452, %454 : vector<8x512xf32>
    %456 = vector.extract_strided_slice %455 {offsets = [0, 0], sizes = [8, 128], strides = [1, 1]} : vector<8x512xf32> to vector<8x128xf32>
    %457 = arith.negf %456 : vector<8x128xf32>
    %458 = math.exp %457 : vector<8x128xf32>
    %cst_158 = arith.constant 1.000000e+00 : f32
    %459 = vector.broadcast %cst_158 : f32 to vector<8x128xf32>
    %460 = arith.addf %459, %458 : vector<8x128xf32>
    %461 = arith.divf %459, %460 : vector<8x128xf32>
    %462 = vector.extract_strided_slice %455 {offsets = [0, 128], sizes = [8, 128], strides = [1, 1]} : vector<8x512xf32> to vector<8x128xf32>
    %463 = arith.negf %462 : vector<8x128xf32>
    %464 = math.exp %463 : vector<8x128xf32>
    %cst_159 = arith.constant 1.000000e+00 : f32
    %465 = vector.broadcast %cst_159 : f32 to vector<8x128xf32>
    %466 = arith.addf %465, %464 : vector<8x128xf32>
    %467 = arith.divf %465, %466 : vector<8x128xf32>
    %468 = vector.extract_strided_slice %455 {offsets = [0, 256], sizes = [8, 128], strides = [1, 1]} : vector<8x512xf32> to vector<8x128xf32>
    %469 = math.tanh %468 : vector<8x128xf32>
    %470 = vector.extract_strided_slice %455 {offsets = [0, 384], sizes = [8, 128], strides = [1, 1]} : vector<8x512xf32> to vector<8x128xf32>
    %471 = arith.negf %470 : vector<8x128xf32>
    %472 = math.exp %471 : vector<8x128xf32>
    %cst_160 = arith.constant 1.000000e+00 : f32
    %473 = vector.broadcast %cst_160 : f32 to vector<8x128xf32>
    %474 = arith.addf %473, %472 : vector<8x128xf32>
    %475 = arith.divf %473, %474 : vector<8x128xf32>
    %476 = arith.mulf %467, %411 : vector<8x128xf32>
    %477 = arith.mulf %461, %469 : vector<8x128xf32>
    %478 = arith.addf %476, %477 : vector<8x128xf32>
    %479 = math.tanh %478 : vector<8x128xf32>
    %480 = arith.mulf %475, %479 : vector<8x128xf32>
    %481 = vector.extract_strided_slice %7 {offsets = [56, 0], sizes = [8, 128], strides = [1, 1]} : vector<64x128xf32> to vector<8x128xf32>
    %c0_161 = arith.constant 0 : index
    %c0_162 = arith.constant 0 : index
    %482 = vector.load %arg2[%c0_161, %c0_162] : memref<128x512xf32, #tpu.memory_space<vmem>>, vector<128x512xf32>
    %cst_163 = arith.constant dense<0.000000e+00> : vector<8x512xf32>
    %483 = tpu.matmul %481, %482, %cst_163 {dimension_numbers = #tpu.dot_dimension_numbers<[1], [0], [0], [1], [0, 0, 1, 1], [], []>} : vector<8x128xf32>, vector<128x512xf32>, vector<8x512xf32> -> vector<8x512xf32>
    %c0_164 = arith.constant 0 : index
    %c0_165 = arith.constant 0 : index
    %484 = vector.load %arg3[%c0_164, %c0_165] : memref<128x512xf32, #tpu.memory_space<vmem>>, vector<128x512xf32>
    %cst_166 = arith.constant dense<0.000000e+00> : vector<8x512xf32>
    %485 = tpu.matmul %447, %484, %cst_166 {dimension_numbers = #tpu.dot_dimension_numbers<[1], [0], [0], [1], [0, 0, 1, 1], [], []>} : vector<8x128xf32>, vector<128x512xf32>, vector<8x512xf32> -> vector<8x512xf32>
    %486 = arith.addf %483, %485 : vector<8x512xf32>
    %c0_167 = arith.constant 0 : index
    %c0_168 = arith.constant 0 : index
    %487 = vector.load %arg4[%c0_167, %c0_168] : memref<1x512xf32, #tpu.memory_space<vmem>>, vector<1x512xf32>
    %488 = vector.broadcast %487 : vector<1x512xf32> to vector<8x512xf32>
    %489 = arith.addf %486, %488 : vector<8x512xf32>
    %490 = vector.extract_strided_slice %489 {offsets = [0, 0], sizes = [8, 128], strides = [1, 1]} : vector<8x512xf32> to vector<8x128xf32>
    %491 = arith.negf %490 : vector<8x128xf32>
    %492 = math.exp %491 : vector<8x128xf32>
    %cst_169 = arith.constant 1.000000e+00 : f32
    %493 = vector.broadcast %cst_169 : f32 to vector<8x128xf32>
    %494 = arith.addf %493, %492 : vector<8x128xf32>
    %495 = arith.divf %493, %494 : vector<8x128xf32>
    %496 = vector.extract_strided_slice %489 {offsets = [0, 128], sizes = [8, 128], strides = [1, 1]} : vector<8x512xf32> to vector<8x128xf32>
    %497 = arith.negf %496 : vector<8x128xf32>
    %498 = math.exp %497 : vector<8x128xf32>
    %cst_170 = arith.constant 1.000000e+00 : f32
    %499 = vector.broadcast %cst_170 : f32 to vector<8x128xf32>
    %500 = arith.addf %499, %498 : vector<8x128xf32>
    %501 = arith.divf %499, %500 : vector<8x128xf32>
    %502 = vector.extract_strided_slice %489 {offsets = [0, 256], sizes = [8, 128], strides = [1, 1]} : vector<8x512xf32> to vector<8x128xf32>
    %503 = math.tanh %502 : vector<8x128xf32>
    %504 = vector.extract_strided_slice %489 {offsets = [0, 384], sizes = [8, 128], strides = [1, 1]} : vector<8x512xf32> to vector<8x128xf32>
    %505 = arith.negf %504 : vector<8x128xf32>
    %506 = math.exp %505 : vector<8x128xf32>
    %cst_171 = arith.constant 1.000000e+00 : f32
    %507 = vector.broadcast %cst_171 : f32 to vector<8x128xf32>
    %508 = arith.addf %507, %506 : vector<8x128xf32>
    %509 = arith.divf %507, %508 : vector<8x128xf32>
    %510 = arith.mulf %501, %445 : vector<8x128xf32>
    %511 = arith.mulf %495, %503 : vector<8x128xf32>
    %512 = arith.addf %510, %511 : vector<8x128xf32>
    %513 = math.tanh %512 : vector<8x128xf32>
    %514 = arith.mulf %509, %513 : vector<8x128xf32>
    %c0_172 = arith.constant 0 : index
    %c0_173 = arith.constant 0 : index
    %515 = vector.load %arg5[%c0_172, %c0_173] : memref<128x512xf32, #tpu.memory_space<vmem>>, vector<128x512xf32>
    %cst_174 = arith.constant dense<0.000000e+00> : vector<8x512xf32>
    %516 = tpu.matmul %514, %515, %cst_174 {dimension_numbers = #tpu.dot_dimension_numbers<[1], [0], [0], [1], [0, 0, 1, 1], [], []>} : vector<8x128xf32>, vector<128x512xf32>, vector<8x512xf32> -> vector<8x512xf32>
    %c0_175 = arith.constant 0 : index
    %c0_176 = arith.constant 0 : index
    %517 = vector.load %arg6[%c0_175, %c0_176] : memref<128x512xf32, #tpu.memory_space<vmem>>, vector<128x512xf32>
    %cst_177 = arith.constant dense<0.000000e+00> : vector<8x512xf32>
    %518 = tpu.matmul %480, %517, %cst_177 {dimension_numbers = #tpu.dot_dimension_numbers<[1], [0], [0], [1], [0, 0, 1, 1], [], []>} : vector<8x128xf32>, vector<128x512xf32>, vector<8x512xf32> -> vector<8x512xf32>
    %519 = arith.addf %516, %518 : vector<8x512xf32>
    %c0_178 = arith.constant 0 : index
    %c0_179 = arith.constant 0 : index
    %520 = vector.load %arg7[%c0_178, %c0_179] : memref<1x512xf32, #tpu.memory_space<vmem>>, vector<1x512xf32>
    %521 = vector.broadcast %520 : vector<1x512xf32> to vector<8x512xf32>
    %522 = arith.addf %519, %521 : vector<8x512xf32>
    %523 = vector.extract_strided_slice %522 {offsets = [0, 0], sizes = [8, 128], strides = [1, 1]} : vector<8x512xf32> to vector<8x128xf32>
    %524 = arith.negf %523 : vector<8x128xf32>
    %525 = math.exp %524 : vector<8x128xf32>
    %cst_180 = arith.constant 1.000000e+00 : f32
    %526 = vector.broadcast %cst_180 : f32 to vector<8x128xf32>
    %527 = arith.addf %526, %525 : vector<8x128xf32>
    %528 = arith.divf %526, %527 : vector<8x128xf32>
    %529 = vector.extract_strided_slice %522 {offsets = [0, 128], sizes = [8, 128], strides = [1, 1]} : vector<8x512xf32> to vector<8x128xf32>
    %530 = arith.negf %529 : vector<8x128xf32>
    %531 = math.exp %530 : vector<8x128xf32>
    %cst_181 = arith.constant 1.000000e+00 : f32
    %532 = vector.broadcast %cst_181 : f32 to vector<8x128xf32>
    %533 = arith.addf %532, %531 : vector<8x128xf32>
    %534 = arith.divf %532, %533 : vector<8x128xf32>
    %535 = vector.extract_strided_slice %522 {offsets = [0, 256], sizes = [8, 128], strides = [1, 1]} : vector<8x512xf32> to vector<8x128xf32>
    %536 = math.tanh %535 : vector<8x128xf32>
    %537 = vector.extract_strided_slice %522 {offsets = [0, 384], sizes = [8, 128], strides = [1, 1]} : vector<8x512xf32> to vector<8x128xf32>
    %538 = arith.negf %537 : vector<8x128xf32>
    %539 = math.exp %538 : vector<8x128xf32>
    %cst_182 = arith.constant 1.000000e+00 : f32
    %540 = vector.broadcast %cst_182 : f32 to vector<8x128xf32>
    %541 = arith.addf %540, %539 : vector<8x128xf32>
    %542 = arith.divf %540, %541 : vector<8x128xf32>
    %543 = arith.mulf %534, %478 : vector<8x128xf32>
    %544 = arith.mulf %528, %536 : vector<8x128xf32>
    %545 = arith.addf %543, %544 : vector<8x128xf32>
    %546 = math.tanh %545 : vector<8x128xf32>
    %547 = arith.mulf %542, %546 : vector<8x128xf32>
    %c0_183 = arith.constant 0 : index
    %c0_184 = arith.constant 0 : index
    %548 = vector.load %arg8[%c0_183, %c0_184] : memref<384x128xf32, #tpu.memory_space<vmem>>, vector<128x128xf32>
    %cst_185 = arith.constant dense<0.000000e+00> : vector<8x128xf32>
    %549 = tpu.matmul %547, %548, %cst_185 {dimension_numbers = #tpu.dot_dimension_numbers<[1], [0], [0], [1], [0, 0, 1, 1], [], []>} : vector<8x128xf32>, vector<128x128xf32>, vector<8x128xf32> -> vector<8x128xf32>
    %c128 = arith.constant 128 : index
    %c0_186 = arith.constant 0 : index
    %550 = vector.load %arg8[%c128, %c0_186] : memref<384x128xf32, #tpu.memory_space<vmem>>, vector<128x128xf32>
    %cst_187 = arith.constant dense<0.000000e+00> : vector<8x128xf32>
    %551 = tpu.matmul %547, %550, %cst_187 {dimension_numbers = #tpu.dot_dimension_numbers<[1], [0], [0], [1], [0, 0, 1, 1], [], []>} : vector<8x128xf32>, vector<128x128xf32>, vector<8x128xf32> -> vector<8x128xf32>
    %552 = arith.addf %549, %551 : vector<8x128xf32>
    %c256 = arith.constant 256 : index
    %c0_188 = arith.constant 0 : index
    %553 = vector.load %arg8[%c256, %c0_188] : memref<384x128xf32, #tpu.memory_space<vmem>>, vector<128x128xf32>
    %cst_189 = arith.constant dense<0.000000e+00> : vector<8x128xf32>
    %554 = tpu.matmul %545, %553, %cst_189 {dimension_numbers = #tpu.dot_dimension_numbers<[1], [0], [0], [1], [0, 0, 1, 1], [], []>} : vector<8x128xf32>, vector<128x128xf32>, vector<8x128xf32> -> vector<8x128xf32>
    %555 = arith.addf %552, %554 : vector<8x128xf32>
    %c0_190 = arith.constant 0 : index
    %c0_191 = arith.constant 0 : index
    %556 = vector.load %arg9[%c0_190, %c0_191] : memref<1x128xf32, #tpu.memory_space<vmem>>, vector<1x128xf32>
    %557 = vector.broadcast %556 : vector<1x128xf32> to vector<8x128xf32>
    %558 = arith.addf %555, %557 : vector<8x128xf32>
    %cst_192 = arith.constant 0.000000e+00 : f32
    %559 = vector.broadcast %cst_192 : f32 to vector<8x128xf32>
    %560 = arith.maximumf %558, %559 : vector<8x128xf32>
    %c0_193 = arith.constant 0 : index
    %c0_194 = arith.constant 0 : index
    %561 = vector.load %arg10[%c0_193, %c0_194] : memref<128x128xf32, #tpu.memory_space<vmem>>, vector<128x128xf32>
    %cst_195 = arith.constant dense<0.000000e+00> : vector<8x128xf32>
    %562 = tpu.matmul %560, %561, %cst_195 {dimension_numbers = #tpu.dot_dimension_numbers<[1], [0], [0], [1], [0, 0, 1, 1], [], []>} : vector<8x128xf32>, vector<128x128xf32>, vector<8x128xf32> -> vector<8x128xf32>
    %c0_196 = arith.constant 0 : index
    %c0_197 = arith.constant 0 : index
    %563 = vector.load %arg11[%c0_196, %c0_197] : memref<1x128xf32, #tpu.memory_space<vmem>>, vector<1x128xf32>
    %564 = vector.broadcast %563 : vector<1x128xf32> to vector<8x128xf32>
    %565 = arith.addf %562, %564 : vector<8x128xf32>
    %c0_198 = arith.constant 0 : index
    %c0_199 = arith.constant 0 : index
    %566 = vector.load %arg12[%c0_198, %c0_199] : memref<128x128xf32, #tpu.memory_space<vmem>>, vector<128x128xf32>
    %cst_200 = arith.constant dense<0.000000e+00> : vector<8x128xf32>
    %567 = tpu.matmul %565, %566, %cst_200 {dimension_numbers = #tpu.dot_dimension_numbers<[1], [0], [0], [1], [0, 0, 1, 1], [], []>} : vector<8x128xf32>, vector<128x128xf32>, vector<8x128xf32> -> vector<8x128xf32>
    %c0_201 = arith.constant 0 : index
    %c0_202 = arith.constant 0 : index
    %568 = vector.load %arg13[%c0_201, %c0_202] : memref<1x128xf32, #tpu.memory_space<vmem>>, vector<1x128xf32>
    %569 = vector.broadcast %568 : vector<1x128xf32> to vector<8x128xf32>
    %570 = arith.addf %567, %569 : vector<8x128xf32>
    %c0_203 = arith.constant 0 : index
    %c0_204 = arith.constant 0 : index
    %571 = vector.load %arg14[%c0_203, %c0_204] : memref<8x128xf32, #tpu.memory_space<vmem>>, vector<8x128xf32>
    tpu.vector_store %arg14[%c0_203, %c0_204], %570 {strides = array<i32>} : memref<8x128xf32, #tpu.memory_space<vmem>>, vector<8x128xf32>,
    return
  }
}

</mosaic_0001>

<bundles_post_ra>
// kernel: title_predictor_forward.1
= control target key start
LH: loop header
LB: loop body
LE: loop exit
PB: predicated region body
PF: predicated region fallthrough
CT: control target
= control target key end

     0   :  { %19 = vsyncpa [#allocation3], 0  ;;  %s11197_s0 = inlined_call_operand.vmem [shape: s32[64,1], index: 0, kind: input, shape index: {}]   ;;  %s11198_s1 = inlined_call_operand.hbm [shape: f32[128,128], index: 1, kind: input, shape index: {}]   ;;  %s11199_s2 = inlined_call_operand.hbm [shape: f32[128,512], index: 2, kind: input, shape index: {}]   ;;  %s11200_s3 = inlined_call_operand.hbm [shape: f32[128,512], index: 3, kind: input, shape index: {}]   ;;  %s11201_s4 = inlined_call_operand.vmem [shape: f32[1,512], index: 4, kind: input, shape index: {}]   ;;  %s11202_s5 = inlined_call_operand.hbm [shape: f32[128,512], index: 5, kind: input, shape index: {}]   ;;  %s11203_s6 = inlined_call_operand.hbm [shape: f32[128,512], index: 6, kind: input, shape index: {}]   ;;  %s11204_s7 = inlined_call_operand.vmem [shape: f32[1,512], index: 7, kind: input, shape index: {}]   ;;  %s11205_s8 = inlined_call_operand.hbm [shape: f32[384,128], index: 8, kind: input, shape index: {}]   ;;  %s11206_s9 = inlined_call_operand.hbm [shape: f32[1,128], index: 9, kind: input, shape index: {}]   ;;  %s11207_s10 = inlined_call_operand.hbm [shape: f32[128,128], index: 10, kind: input, shape index: {}]   ;;  %s11208_s11 = inlined_call_operand.hbm [shape: f32[1,128], index: 11, kind: input, shape index: {}]   ;;  %s11209_s12 = inlined_call_operand.vmem [shape: f32[128,128], index: 12, kind: input, shape index: {}]   ;;  %s11210_s13 = inlined_call_operand.hbm [shape: f32[1,128], index: 13, kind: input, shape index: {}]   ;;  %s11211_s14 = inlined_call_operand.vmem [shape: f32[8,128], index: 14, kind: output, shape index: {}]  }
   0x1   :  { %20 = vsyncpa [#allocation5], 0 }
   0x2   :  { %21 = vsyncpa [#allocation8], 0 }
   0x3   :  { %22 = vsyncpa [#allocation11], 0 }
   0x4   :  { %23 = vsyncpa [#allocation14], 0 }
   0x5   :  { %24 = vsyncpa [#allocation17], 0  ;;  %s9281_s29 = smov [#allocation4]   ;;  %s9049_s17 = scalar_lea.hbm %s11199_s2, 8192 }
   0x6   :  { %s44_s30 = sshll.u32 %s9281_s29, 4  ;;  %p9050_p0 = scmp.ne.s32.totalorder %s11199_s2, %s9049_s17  ;;  %s45_s30 = int_to_ptr.vmem [resolvable:$true] %s44_s30 }
   0x7   :  { %p9053_p1 = scmp.lt.u32.totalorder %s9049_s17, %s11199_s2 }
   0x9   :  { %p9055_p2 = pnand %p9053_p1, %p9050_p0 }
   0xb   :  { %9058 = shalt.err (!%p9055_p2)
}
   0xc   :  { %s9059_s22 = scalar_lea.vmem %s45_s30, 8192  ;;  %p9064_p4 = scmp.lt.s32.totalorder %s45_s30, %s45_s30 }
   0xd   :  { %p9060_p3 = scmp.ne.s32.totalorder %s45_s30, %s9059_s22  ;;  %p9065_p5 = scmp.lt.s32.totalorder %s9059_s22, %s9059_s22 }
   0xf   :  { %p9066_p6 = por %p9065_p5, %p9064_p4 }
  0x11   :  { %p9067_p7 = pnand %p9066_p6, %p9060_p3 }
  0x13   :  { %9070 = shalt.err (!%p9067_p7)
}
  0x14   :  { %s9282_s23 = smov 512   ;;  %s9283_s24 = smov 32  }
  0x15   :  { %50 = dma.hbm_to_vmem [thread:$0]  %s11199_s2, 8192, %s45_s30, [#allocation5], %s9282_s23, %s9282_s23, %s9283_s24  }
  0x16   :  { %s9284_s27 = smov [#allocation7]   ;;  %s9071_s16 = scalar_lea.hbm %s11202_s5, 8192 }
  0x17   :  { %s70_s28 = sshll.u32 %s9284_s27, 4  ;;  %p9072_p8 = scmp.ne.s32.totalorder %s11202_s5, %s9071_s16  ;;  %s71_s28 = int_to_ptr.vmem [resolvable:$true] %s70_s28 }
  0x18   :  { %p9075_p9 = scmp.lt.u32.totalorder %s9071_s16, %s11202_s5 }
  0x1a   :  { %p9077_p10 = pnand %p9075_p9, %p9072_p8 }
  0x1c   :  { %9080 = shalt.err (!%p9077_p10)
}
  0x1d   :  { %s9081_s21 = scalar_lea.vmem %s71_s28, 8192  ;;  %p9086_p12 = scmp.lt.s32.totalorder %s71_s28, %s71_s28 }
  0x1e   :  { %p9082_p11 = scmp.ne.s32.totalorder %s71_s28, %s9081_s21  ;;  %p9087_p13 = scmp.lt.s32.totalorder %s9081_s21, %s9081_s21 }
  0x20   :  { %p9088_p0 = por %p9087_p13, %p9086_p12 }
  0x22   :  { %p9089_p1 = pnand %p9088_p0, %p9082_p11 }
  0x24   :  { %9092 = shalt.err (!%p9089_p1)
}
  0x25   :  { %76 = dma.hbm_to_vmem [thread:$0]  %s11202_s5, 8192, %s71_s28, [#allocation8], %s9282_s23, %s9282_s23, %s9283_s24  }
  0x26   :  { %s9285_s22 = smov [#allocation10]   ;;  %s9286_s26 = smov [#allocation13]  }
  0x27   :  { %s96_s25 = sshll.u32 %s9285_s22, 4  ;;  %s118_s27 = sshll.u32 %s9286_s26, 4  ;;  %s97_s25 = int_to_ptr.vmem [resolvable:$true] %s96_s25  ;;  %s9405_s27 = int_to_ptr.vmem [resolvable:$true] %s118_s27 }
  0x28   :  { %s9093_s16 = scalar_lea.hbm %s11205_s8, 6144 }
  0x29   :  { %p9094_p2 = scmp.ne.s32.totalorder %s11205_s8, %s9093_s16  ;;  %p9097_p3 = scmp.lt.u32.totalorder %s9093_s16, %s11205_s8 }
  0x2b   :  { %p9099_p4 = pnand %p9097_p3, %p9094_p2 }
  0x2d   :  { %9102 = shalt.err (!%p9099_p4)
}
  0x2e   :  { %s9103_s5 = scalar_lea.vmem %s97_s25, 6144  ;;  %p9108_p6 = scmp.lt.s32.totalorder %s97_s25, %s97_s25 }
  0x2f   :  { %p9104_p5 = scmp.ne.s32.totalorder %s97_s25, %s9103_s5  ;;  %p9109_p7 = scmp.lt.s32.totalorder %s9103_s5, %s9103_s5 }
  0x31   :  { %p9110_p8 = por %p9109_p7, %p9108_p6 }
  0x33   :  { %p9111_p9 = pnand %p9110_p8, %p9104_p5 }
  0x35   :  { %9114 = shalt.err (!%p9111_p9)
}
  0x36   :  { %s9287_s28 = smov 128   ;;  %s9288_s21 = smov 8  }
  0x37   :  { %102 = dma.hbm_to_vmem [thread:$0]  %s11205_s8, 6144, %s97_s25, [#allocation11], %s9287_s28, %s9287_s28, %s9288_s21  }
  0x38   :  { %s9115_s29 = scalar_lea.hbm %s11207_s10, 2048 }
  0x39   :  { %p9116_p10 = scmp.ne.s32.totalorder %s11207_s10, %s9115_s29  ;;  %p9119_p11 = scmp.lt.u32.totalorder %s9115_s29, %s11207_s10 }
  0x3b   :  { %p9121_p12 = pnand %p9119_p11, %p9116_p10 }
  0x3d   :  { %9124 = shalt.err (!%p9121_p12)
}
  0x3e   :  { %s9125_s19 = scalar_lea.vmem %s9405_s27, 2048  ;;  %p9130_p0 = scmp.lt.s32.totalorder %s9405_s27, %s9405_s27 }
  0x3f   :  { %p9126_p13 = scmp.ne.s32.totalorder %s9405_s27, %s9125_s19  ;;  %p9131_p1 = scmp.lt.s32.totalorder %s9125_s19, %s9125_s19 }
  0x41   :  { %p9132_p2 = por %p9131_p1, %p9130_p0 }
  0x43   :  { %p9133_p3 = pnand %p9132_p2, %p9126_p13 }
  0x45   :  { %9136 = shalt.err (!%p9133_p3)
}
  0x46   :  { %124 = dma.hbm_to_vmem [thread:$0]  %s11207_s10, 2048, %s9405_s27, [#allocation14], %s9287_s28, %s9287_s28, %s9288_s21  }
  0x47   :  { %s9289_s20 = smov [#allocation2]   ;;  %s9290_s2 = smov [#allocation6]  }
  0x48   :  { %s32_s5 = sshll.u32 %s9289_s20, 4  ;;  %s56_s30 = sshll.u32 %s9290_s2, 4  ;;  %s33_s5 = int_to_ptr.vmem [resolvable:$true] %s32_s5  ;;  %s9442_s30 = int_to_ptr.vmem [resolvable:$true] %s56_s30 }
  0x49   :  { %s9137_s29 = scalar_lea.hbm %s11198_s1, 2048 }
  0x4a   :  { %p9138_p4 = scmp.ne.s32.totalorder %s11198_s1, %s9137_s29  ;;  %p9141_p5 = scmp.lt.u32.totalorder %s9137_s29, %s11198_s1 }
  0x4c   :  { %p9143_p6 = pnand %p9141_p5, %p9138_p4 }
  0x4e   :  { %9146 = shalt.err (!%p9143_p6)
}
  0x4f   :  { %s9147_s10 = scalar_lea.vmem %s33_s5, 2048  ;;  %p9152_p8 = scmp.lt.s32.totalorder %s33_s5, %s33_s5 }
  0x50   :  { %p9148_p7 = scmp.ne.s32.totalorder %s33_s5, %s9147_s10  ;;  %p9153_p9 = scmp.lt.s32.totalorder %s9147_s10, %s9147_s10 }
  0x52   :  { %p9154_p10 = por %p9153_p9, %p9152_p8 }
  0x54   :  { %p9155_p11 = pnand %p9154_p10, %p9148_p7 }
  0x56   :  { %9158 = shalt.err (!%p9155_p11)
}
  0x57   :  { %38 = dma.hbm_to_vmem [thread:$0]  %s11198_s1, 2048, %s33_s5, [#allocation3], %s9287_s28, %s9287_s28, %s9288_s21  }
  0x58   :  { %s9159_s20 = scalar_lea.hbm %s11200_s3, 8192 }
  0x59   :  { %p9160_p12 = scmp.ne.s32.totalorder %s11200_s3, %s9159_s20  ;;  %p9163_p13 = scmp.lt.u32.totalorder %s9159_s20, %s11200_s3 }
  0x5b   :  { %p9165_p0 = pnand %p9163_p13, %p9160_p12 }
  0x5d   :  { %9168 = shalt.err (!%p9165_p0)
}
  0x5e   :  { %s9169_s15 = scalar_lea.vmem %s9442_s30, 8192  ;;  %p9174_p2 = scmp.lt.s32.totalorder %s9442_s30, %s9442_s30 }
  0x5f   :  { %p9170_p1 = scmp.ne.s32.totalorder %s9442_s30, %s9169_s15  ;;  %p9175_p3 = scmp.lt.s32.totalorder %s9169_s15, %s9169_s15 }
  0x61   :  { %p9176_p4 = por %p9175_p3, %p9174_p2 }
  0x63   :  { %p9177_p5 = pnand %p9176_p4, %p9170_p1 }
  0x65   :  { %9180 = shalt.err (!%p9177_p5)
}
  0x66   :  { %62 = dma.hbm_to_vmem [thread:$0]  %s11200_s3, 8192, %s9442_s30, [#allocation5], %s9282_s23, %s9282_s23, %s9283_s24  }
  0x67   :  { %s9291_s21 = smov [#allocation9]   ;;  %s9292_s16 = smov [#allocation12]  }
  0x68   :  { %s82_s5 = sshll.u32 %s9291_s21, 4  ;;  %s109_s17 = sshll.u32 %s9292_s16, 4  ;;  %s83_s5 = int_to_ptr.vmem [resolvable:$true] %s82_s5  ;;  %s110_s17 = int_to_ptr.vmem [resolvable:$true] %s109_s17 }
  0x69   :  { %s9181_s27 = scalar_lea.hbm %s11203_s6, 8192 }
  0x6a   :  { %p9182_p6 = scmp.ne.s32.totalorder %s11203_s6, %s9181_s27  ;;  %p9185_p7 = scmp.lt.u32.totalorder %s9181_s27, %s11203_s6 }
  0x6c   :  { %p9187_p8 = pnand %p9185_p7, %p9182_p6 }
  0x6e   :  { %9190 = shalt.err (!%p9187_p8)
}
  0x6f   :  { %s9191_s3 = scalar_lea.vmem %s83_s5, 8192  ;;  %p9196_p10 = scmp.lt.s32.totalorder %s83_s5, %s83_s5 }
  0x70   :  { %p9192_p9 = scmp.ne.s32.totalorder %s83_s5, %s9191_s3  ;;  %p9197_p11 = scmp.lt.s32.totalorder %s9191_s3, %s9191_s3 }
  0x72   :  { %p9198_p12 = por %p9197_p11, %p9196_p10 }
  0x74   :  { %p9199_p13 = pnand %p9198_p12, %p9192_p9 }
  0x76   :  { %9202 = shalt.err (!%p9199_p13)
}
  0x77   :  { %88 = dma.hbm_to_vmem [thread:$0]  %s11203_s6, 8192, %s83_s5, [#allocation8], %s9282_s23, %s9282_s23, %s9283_s24  }
  0x78   :  { %s9203_s29 = scalar_lea.hbm %s11206_s9, 16 }
  0x79   :  { %p9204_p0 = scmp.ne.s32.totalorder %s11206_s9, %s9203_s29  ;;  %p9207_p1 = scmp.lt.u32.totalorder %s9203_s29, %s11206_s9 }
  0x7b   :  { %p9209_p2 = pnand %p9207_p1, %p9204_p0 }
  0x7d   :  { %9212 = shalt.err (!%p9209_p2)
}
  0x7e   :  { %s9213_s16 = scalar_lea.vmem %s110_s17, 16  ;;  %s9217_s18 = scalar_lea.vmem %s110_s17, 32 }
  0x7f   :  { %p9214_p3 = scmp.ne.s32.totalorder %s110_s17, %s9213_s16  ;;  %p9218_p4 = scmp.lt.s32.totalorder %s110_s17, %s110_s17 }
  0x80   :  { %p9219_p5 = scmp.lt.s32.totalorder %s9217_s18, %s9213_s16 }
  0x82   :  { %p9220_p6 = por %p9219_p5, %p9218_p4 }
  0x84   :  { %p9221_p7 = pnand %p9220_p6, %p9214_p3 }
  0x86   :  { %9224 = shalt.err (!%p9221_p7)
}
  0x87   :  { %112 = dma.hbm_to_vmem [thread:$0]  %s11206_s9, 16, %s110_s17, [#allocation11]  }
  0x88   :  { %s9293_s24 = smov [#allocation15]   ;;  %s9294_s10 = smov [#allocation16]  }
  0x89   :  { %s131_s5 = sshll.u32 %s9293_s24, 4  ;;  %s143_s27 = sshll.u32 %s9294_s10, 4  ;;  %s132_s5 = int_to_ptr.vmem [resolvable:$true] %s131_s5  ;;  %s144_s27 = int_to_ptr.vmem [resolvable:$true] %s143_s27 }
  0x8a   :  { %s9225_s25 = scalar_lea.hbm %s11208_s11, 16 }
  0x8b   :  { %p9226_p8 = scmp.ne.s32.totalorder %s11208_s11, %s9225_s25  ;;  %p9229_p9 = scmp.lt.u32.totalorder %s9225_s25, %s11208_s11 }
  0x8d   :  { %p9231_p10 = pnand %p9229_p9, %p9226_p8 }
  0x8f   :  { %9234 = shalt.err (!%p9231_p10)
}
  0x90   :  { %s9235_s9 = scalar_lea.vmem %s132_s5, 16  ;;  %s9239_s17 = scalar_lea.vmem %s132_s5, 32 }
  0x91   :  { %p9236_p11 = scmp.ne.s32.totalorder %s132_s5, %s9235_s9  ;;  %p9240_p12 = scmp.lt.s32.totalorder %s132_s5, %s132_s5 }
  0x92   :  { %p9241_p13 = scmp.lt.s32.totalorder %s9239_s17, %s9235_s9 }
  0x94   :  { %p9242_p0 = por %p9241_p13, %p9240_p12 }
  0x96   :  { %p9243_p1 = pnand %p9242_p0, %p9236_p11 }
  0x98   :  { %9246 = shalt.err (!%p9243_p1)
}
  0x99   :  { %134 = dma.hbm_to_vmem [thread:$0]  %s11208_s11, 16, %s132_s5, [#allocation14]  }
  0x9a   :  { %s9247_s1 = scalar_lea.hbm %s11210_s13, 16 }
  0x9b   :  { %p9248_p2 = scmp.ne.s32.totalorder %s11210_s13, %s9247_s1  ;;  %p9251_p3 = scmp.lt.u32.totalorder %s9247_s1, %s11210_s13 }
  0x9d   :  { %p9253_p4 = pnand %p9251_p3, %p9248_p2 }
  0x9f   :  { %9256 = shalt.err (!%p9253_p4)
}
  0xa0   :  { %s9257_s6 = scalar_lea.vmem %s144_s27, 16  ;;  %s9261_s23 = scalar_lea.vmem %s144_s27, 32 }
  0xa1   :  { %p9258_p5 = scmp.ne.s32.totalorder %s144_s27, %s9257_s6  ;;  %p9262_p6 = scmp.lt.s32.totalorder %s144_s27, %s144_s27 }
  0xa2   :  { %p9263_p7 = scmp.lt.s32.totalorder %s9261_s23, %s9257_s6 }
  0xa4   :  { %p9264_p8 = por %p9263_p7, %p9262_p6 }
  0xa6   :  { %p9265_p9 = pnand %p9264_p8, %p9258_p5 }
  0xa8   :  { %9268 = shalt.err (!%p9265_p9)
}
  0xa9   :  { %146 = dma.hbm_to_vmem [thread:$0]  %s11210_s13, 16, %s144_s27, [#allocation17]  }
  0xaa   :  { %9269 = dma.done.wait [#allocation3], 2048  }
  0xab   :  { %9270 = vsyncadd [#allocation3], 4294965248 }
  0xac   :  { %9271 = dma.done.wait [#allocation5], 16384  }
  0xad   :  { %9272 = vsyncadd [#allocation5], 4294950912 }
  0xae   :  { %9273 = dma.done.wait [#allocation8], 16384  }
  0xaf   :  { %9274 = vsyncadd [#allocation8], 4294950912 }
  0xb0   :  { %9275 = dma.done.wait [#allocation11], 6160  }
  0xb1   :  { %9276 = vsyncadd [#allocation11], 4294961136 }
  0xb2   :  { %9277 = dma.done.wait [#allocation14], 2064  }
  0xb3   :  { %9278 = vsyncadd [#allocation14], 4294965232 }
  0xb4   :  { %9279 = dma.done.wait [#allocation17], 16  }
  0xb5   :  { %9280 = vsyncadd [#allocation17], 4294967280  ;;  %v9295_v0 = vmov 0   ;;  %v177_v1 = vld [vmem:[%s11197_s0] sm:$0xff]  ;;  %v179_v2 = vld [vmem:[%s11197_s0 + $0x10] sm:$0xff]  ;;  %vm9299_vm8 = vmmov 0  }
  0xb6   :  { %8791 = vset.pattern.permute.xlu0 %v9295_v0  ;;  %8792 = vset.pattern.permute.xlu1 %v9295_v0  ;;  %v178_v3 = vld [vmem:[%s11197_s0 + $0x8] sm:$0xff]  ;;  %v180_v4 = vld [vmem:[%s11197_s0 + $0x18] sm:$0xff]  ;;  %v235_v5 = vld [vmem:[#allocation2] sm:$0xff] }
  0xb7   :  { %188 = vperm.xlu0 %8791, %v177_v1   ;;  %194 = vperm.xlu1 %8792, %v179_v2   ;;  %v236_v6 = vld [vmem:[#allocation2 + $0x8] sm:$0xff]  ;;  %v237_v8 = vld [vmem:[#allocation2 + $0x10] sm:$0xff]  ;;  %v238_v9 = vld [vmem:[#allocation2 + $0x18] sm:$0xff] }
  0xb8   :  { %v6508_v7 = vpack.c.bf16 %v236_v6, %v235_v5  ;;  %v6512_v10 = vpack.c.bf16 %v238_v9, %v237_v8  ;;  %v239_v11 = vld [vmem:[#allocation2 + $0x20] sm:$0xff]  ;;  %v240_v12 = vld [vmem:[#allocation2 + $0x28] sm:$0xff]  ;;  %v241_v16 = vld [vmem:[#allocation2 + $0x30] sm:$0xff] }
  0xb9   :  { %v181_v13 = vld [vmem:[%s11197_s0 + $0x20] sm:$0xff]  ;;  %v182_v14 = vld [vmem:[%s11197_s0 + $0x28] sm:$0xff]  ;;  %v6516_v15 = vpack.c.bf16 %v240_v12, %v239_v11  ;;  %v242_v17 = vld [vmem:[#allocation2 + $0x38] sm:$0xff] }
  0xba   :  { %6509 = vmatprep.subr.bf16.mxu0 %v6508_v7  ;;  %v183_v18 = vld [vmem:[%s11197_s0 + $0x30] sm:$0xff]  ;;  %v6520_v19 = vpack.c.bf16 %v242_v17, %v241_v16  ;;  %v243_v20 = vld [vmem:[#allocation2 + $0x40] sm:$0xff]  ;;  %v244_v21 = vld [vmem:[#allocation2 + $0x48] sm:$0xff] }
  0xbb   :  { %191 = vperm.xlu0 %8791, %v178_v3   ;;  %197 = vperm.xlu1 %8792, %v180_v4   ;;  %v184_v22 = vld [vmem:[%s11197_s0 + $0x38] sm:$0xff]  ;;  %v421_v23 = vld [vmem:[#allocation6 + $0x8] sm:$0xff]  ;;  %v6524_v25 = vpack.c.bf16 %v244_v21, %v243_v20  ;;  %v420_v27 = vld [vmem:[#allocation6] sm:$0xff] }
  0xbc   :  { %6511 = vmatpush3.bf16.msra.mxu0 %v6508_v7  ;;  %v425_v24 = vld [vmem:[#allocation6 + $0x28] sm:$0xff]  ;;  %v245_v28 = vld [vmem:[#allocation2 + $0x50] sm:$0xff]  ;;  %v246_v29 = vld [vmem:[#allocation2 + $0x58] sm:$0xff] }
  0xbd   :  { %6513 = vmatprep.subr.bf16.mxu0 %v6512_v10  ;;  %v9554_v26 = vpack.c.bf16 %v425_v24, %v421_v23  ;;  %v424_v30 = vld [vmem:[#allocation6 + $0x20] sm:$0xff]  ;;  %v429_v32 = vld [vmem:[#allocation6 + $0x48] sm:$0xff]  ;;  %v6528_v37 = vpack.c.bf16 %v246_v29, %v245_v28  ;;  %v249_v49 = vld [vmem:[#allocation2 + $0x70] sm:$0xff] }
  0xbe   :  { %v9557_v31 = vpack.c.bf16 %v424_v30, %v420_v27  ;;  %v433_v33 = vld [vmem:[#allocation6 + $0x68] sm:$0xff]  ;;  %v428_v35 = vld [vmem:[#allocation6 + $0x40] sm:$0xff]  ;;  %v250_v51 = vld [vmem:[#allocation2 + $0x78] sm:$0xff] }
  0xbf   :  { %200 = vperm.xlu0 %8791, %v181_v13   ;;  %203 = vperm.xlu1 %8792, %v182_v14   ;;  %11428 = vst [vmem:[#allocation24_spill] sm:$0xff] %v9554_v26  ;;  %v9559_v34 = vpack.c.bf16 %v433_v33, %v429_v32  ;;  %v432_v36 = vld [vmem:[#allocation6 + $0x60] sm:$0xff]  ;;  %v437_v39 = vld [vmem:[#allocation6 + $0x88] sm:$0xff]  ;;  %v6536_v57 = vpack.c.bf16 %v250_v51, %v249_v49  ;;  %v423_v58 = vld [vmem:[#allocation6 + $0x18] sm:$0xff]  ;;  %v11215_v13 = vmov 0.0  }
  0xc0   :  { %6515 = vmatpush3.bf16.msra.mxu0 %v6512_v10  ;;  %6541 = vmatprep.subr.bf16.mxu1 %v9554_v26  ;;  %v9562_v38 = vpack.c.bf16 %v432_v36, %v428_v35  ;;  %v247_v40 = vld [vmem:[#allocation2 + $0x60] sm:$0xff]  ;;  %v248_v41 = vld [vmem:[#allocation2 + $0x68] sm:$0xff]  ;;  %v427_v60 = vld [vmem:[#allocation6 + $0x38] sm:$0xff] }
  0xc1   :  { %6517 = vmatprep.subr.bf16.mxu0 %v6516_v15  ;;  %6543 = vmatpush1.bf16.msra.mxu1 %v9557_v31  ;;  %v441_v42 = vld [vmem:[#allocation6 + $0xa8] sm:$0xff]  ;;  %v436_v44 = vld [vmem:[#allocation6 + $0x80] sm:$0xff]  ;;  %v6532_v48 = vpack.c.bf16 %v248_v41, %v247_v40  ;;  %v9579_v2 = vpack.c.bf16 %v427_v60, %v423_v58 }
  0xc2   :  { %6545 = vmatprep.subr.bf16.mxu1 %v9559_v34  ;;  %v9565_v43 = vpack.c.bf16 %v441_v42, %v437_v39  ;;  %v440_v45 = vld [vmem:[#allocation6 + $0xa0] sm:$0xff]  ;;  %v445_v46 = vld [vmem:[#allocation6 + $0xc8] sm:$0xff]  ;;  %548 = vmatprep.mubr.f32.mxu1 %v11215_v13 }
  0xc3   :  { %206 = vperm.xlu0 %8791, %v183_v18   ;;  %209 = vperm.xlu1 %8792, %v184_v22   ;;  %v449_v47 = vld [vmem:[#allocation6 + $0xe8] sm:$0xff]  ;;  %v9568_v50 = vpack.c.bf16 %v440_v45, %v436_v44  ;;  %v444_v53 = vld [vmem:[#allocation6 + $0xc0] sm:$0xff]  ;;  %11429 = vst [vmem:[#allocation25_spill] sm:$0xff] %v9579_v2 }
  0xc4   :  { %6519 = vmatpush3.bf16.msra.mxu0 %v6516_v15  ;;  %v9571_v52 = vpack.c.bf16 %v449_v47, %v445_v46  ;;  %v448_v54 = vld [vmem:[#allocation6 + $0xe0] sm:$0xff]  ;;  %v453_v55 = vld [vmem:[#allocation6 + $0x108] sm:$0xff] }
  0xc5   :  { %6521 = vmatprep.subr.bf16.mxu0 %v6520_v19  ;;  %6547 = vmatpush1.bf16.msra.mxu1 %v9562_v38  ;;  %v457_v56 = vld [vmem:[#allocation6 + $0x128] sm:$0xff]  ;;  %v9574_v59 = vpack.c.bf16 %v448_v54, %v444_v53  ;;  %v452_v62 = vld [vmem:[#allocation6 + $0x100] sm:$0xff] }
  0xc6   :  { %6549 = vmatprep.subr.bf16.mxu1 %v9565_v43  ;;  %v9577_v61 = vpack.c.bf16 %v457_v56, %v453_v55  ;;  %v456_v63 = vld [vmem:[#allocation6 + $0x120] sm:$0xff]  ;;  %v461_v0 = vld [vmem:[#allocation6 + $0x148] sm:$0xff] }
  0xc7   :  { %v465_v1 = vld [vmem:[#allocation6 + $0x168] sm:$0xff]  ;;  %v9582_v3 = vpack.c.bf16 %v456_v63, %v452_v62  ;;  %v460_v5 = vld [vmem:[#allocation6 + $0x140] sm:$0xff] }
  0xc8   :  { %6523 = vmatpush3.bf16.msra.mxu0 %v6520_v19  ;;  %v9585_v4 = vpack.c.bf16 %v465_v1, %v461_v0  ;;  %v464_v6 = vld [vmem:[#allocation6 + $0x160] sm:$0xff]  ;;  %v469_v7 = vld [vmem:[#allocation6 + $0x188] sm:$0xff] }
  0xc9   :  { %6525 = vmatprep.subr.bf16.mxu0 %v6524_v25  ;;  %6551 = vmatpush1.bf16.msra.mxu1 %v9568_v50  ;;  %v473_v8 = vld [vmem:[#allocation6 + $0x1a8] sm:$0xff]  ;;  %v9589_v9 = vpack.c.bf16 %v464_v6, %v460_v5  ;;  %v468_v11 = vld [vmem:[#allocation6 + $0x180] sm:$0xff] }
  0xca   :  { %6553 = vmatprep.subr.bf16.mxu1 %v9571_v52  ;;  %v9592_v10 = vpack.c.bf16 %v473_v8, %v469_v7  ;;  %v472_v12 = vld [vmem:[#allocation6 + $0x1a0] sm:$0xff]  ;;  %v477_v14 = vld [vmem:[#allocation6 + $0x1c8] sm:$0xff] }
  0xcb   :  { %v481_v15 = vld [vmem:[#allocation6 + $0x1e8] sm:$0xff]  ;;  %v9596_v16 = vpack.c.bf16 %v472_v12, %v468_v11  ;;  %v476_v18 = vld [vmem:[#allocation6 + $0x1c0] sm:$0xff] }
  0xcc   :  { %6527 = vmatpush3.bf16.msra.mxu0 %v6524_v25  ;;  %v9599_v17 = vpack.c.bf16 %v481_v15, %v477_v14  ;;  %v480_v19 = vld [vmem:[#allocation6 + $0x1e0] sm:$0xff]  ;;  %v357_v20 = vld [vmem:[#allocation4 + $0x8] sm:$0xff] }
  0xcd   :  { %6529 = vmatprep.subr.bf16.mxu0 %v6528_v37  ;;  %6555 = vmatpush1.bf16.msra.mxu1 %v9574_v59  ;;  %v361_v21 = vld [vmem:[#allocation4 + $0x28] sm:$0xff]  ;;  %v9602_v22 = vpack.c.bf16 %v480_v19, %v476_v18  ;;  %v356_v24 = vld [vmem:[#allocation4] sm:$0xff] }
  0xce   :  { %6557 = vmatprep.subr.bf16.mxu1 %v9577_v61  ;;  %v9605_v23 = vpack.c.bf16 %v361_v21, %v357_v20  ;;  %v360_v25 = vld [vmem:[#allocation4 + $0x20] sm:$0xff]  ;;  %v365_v27 = vld [vmem:[#allocation4 + $0x48] sm:$0xff] }
  0xcf   :  { %v369_v28 = vld [vmem:[#allocation4 + $0x68] sm:$0xff]  ;;  %v9608_v29 = vpack.c.bf16 %v360_v25, %v356_v24  ;;  %v364_v32 = vld [vmem:[#allocation4 + $0x40] sm:$0xff]  ;;  %v11212_v24 = vlaneseq }
  0xd0   :  { %6531 = vmatpush3.bf16.msra.mxu0 %v6528_v37  ;;  %v9611_v30 = vpack.c.bf16 %v369_v28, %v365_v27  ;;  %v368_v33 = vld [vmem:[#allocation4 + $0x60] sm:$0xff]  ;;  %v373_v35 = vld [vmem:[#allocation4 + $0x88] sm:$0xff] }
  0xd1   :  { %6533 = vmatprep.subr.bf16.mxu0 %v6532_v48  ;;  %6559 = vmatpush1.bf16.msra.mxu1 %v9582_v3  ;;  %v377_v36 = vld [vmem:[#allocation4 + $0xa8] sm:$0xff]  ;;  %v9615_v37 = vpack.c.bf16 %v368_v33, %v364_v32  ;;  %v372_v40 = vld [vmem:[#allocation4 + $0x80] sm:$0xff]  ;;  %v186_v25 = vand.u32 127, %v11212_v24  ;;  %v422_v32 = vld [vmem:[#allocation6 + $0x10] sm:$0xff] }
  0xd2   :  { %6561 = vmatprep.subr.bf16.mxu1 %v9585_v4  ;;  %v9619_v39 = vpack.c.bf16 %v377_v36, %v373_v35  ;;  %v376_v41 = vld [vmem:[#allocation4 + $0xa0] sm:$0xff]  ;;  %v381_v42 = vld [vmem:[#allocation4 + $0xc8] sm:$0xff]  ;;  %v426_v33 = vld [vmem:[#allocation6 + $0x30] sm:$0xff] }
  0xd3   :  { %11430 = vst [vmem:[#allocation26_spill] sm:$0xff] %v9615_v37  ;;  %v385_v44 = vld [vmem:[#allocation4 + $0xe8] sm:$0xff]  ;;  %v9622_v45 = vpack.c.bf16 %v376_v41, %v372_v40  ;;  %v380_v47 = vld [vmem:[#allocation4 + $0xc0] sm:$0xff]  ;;  %v431_v35 = vld [vmem:[#allocation6 + $0x58] sm:$0xff]  ;;  %v9297_v40 = vmov 1.0   ;;  %v9657_v41 = vpack.c.bf16 %v426_v33, %v422_v32 }
  0xd4   :  { %6535 = vmatpush3.bf16.msra.mxu0 %v6532_v48  ;;  %11431 = vst [vmem:[#allocation27_spill] sm:$0xff] %v9619_v39  ;;  %v9625_v46 = vpack.c.bf16 %v385_v44, %v381_v42  ;;  %v384_v48 = vld [vmem:[#allocation4 + $0xe0] sm:$0xff]  ;;  %v389_v49 = vld [vmem:[#allocation4 + $0x108] sm:$0xff]  ;;  %v435_v36 = vld [vmem:[#allocation6 + $0x78] sm:$0xff] }
  0xd5   :  { %6537 = vmatprep.subr.bf16.mxu0 %v6536_v57  ;;  %6563 = vmatpush1.bf16.msra.mxu1 %v9589_v9  ;;  %11432 = vst [vmem:[#allocation28_spill] sm:$0xff] %v9622_v45  ;;  %v393_v51 = vld [vmem:[#allocation4 + $0x128] sm:$0xff]  ;;  %v9628_v53 = vpack.c.bf16 %v384_v48, %v380_v47  ;;  %v388_v55 = vld [vmem:[#allocation4 + $0x100] sm:$0xff]  ;;  %v9659_v47 = vpack.c.bf16 %v435_v36, %v431_v35  ;;  %v430_v48 = vld [vmem:[#allocation6 + $0x50] sm:$0xff] }
  0xd6   :  { %6565 = vmatprep.subr.bf16.mxu1 %v9592_v10  ;;  %11433 = vst [vmem:[#allocation29_spill] sm:$0xff] %v9625_v46  ;;  %v9631_v54 = vpack.c.bf16 %v393_v51, %v389_v49  ;;  %v392_v56 = vld [vmem:[#allocation4 + $0x120] sm:$0xff]  ;;  %v401_v58 = vld [vmem:[#allocation4 + $0x168] sm:$0xff]  ;;  %v434_v49 = vld [vmem:[#allocation6 + $0x70] sm:$0xff] }
  0xd7   :  { %11434 = vst [vmem:[#allocation30_spill] sm:$0xff] %v9628_v53  ;;  %v9634_v60 = vpack.c.bf16 %v392_v56, %v388_v55  ;;  %v396_v63 = vld [vmem:[#allocation4 + $0x140] sm:$0xff]  ;;  %v405_v1 = vld [vmem:[#allocation4 + $0x188] sm:$0xff]  ;;  %v439_v51 = vld [vmem:[#allocation6 + $0x98] sm:$0xff]  ;;  %v9662_v56 = vpack.c.bf16 %v434_v49, %v430_v48 }
  0xd8   :  { %6539 = vmatpush3.bf16.msra.mxu0 %v6536_v57  ;;  %11435 = vst [vmem:[#allocation31_spill] sm:$0xff] %v9631_v54  ;;  %v397_v57 = vld [vmem:[#allocation4 + $0x148] sm:$0xff]  ;;  %v400_v0 = vld [vmem:[#allocation4 + $0x160] sm:$0xff]  ;;  %v443_v55 = vld [vmem:[#allocation6 + $0xb8] sm:$0xff] }
  0xd9   :  { %6573 = vmatprep.subr.bf16.mxu0 %v9579_v2  ;;  %6567 = vmatpush1.bf16.msra.mxu1 %v9596_v16  ;;  %11436 = vst [vmem:[#allocation32_spill] sm:$0xff] %v9634_v60  ;;  %v9637_v62 = vpack.c.bf16 %v401_v58, %v397_v57  ;;  %v409_v5 = vld [vmem:[#allocation4 + $0x1a8] sm:$0xff]  ;;  %v9640_v6 = vpack.c.bf16 %v400_v0, %v396_v63  ;;  %v404_v8 = vld [vmem:[#allocation4 + $0x180] sm:$0xff]  ;;  %v438_v0 = vld [vmem:[#allocation6 + $0x90] sm:$0xff] }
  0xda   :  { %6569 = vmatprep.subr.bf16.mxu1 %v9599_v17  ;;  %v9643_v7 = vpack.c.bf16 %v409_v5, %v405_v1  ;;  %v408_v11 = vld [vmem:[#allocation4 + $0x1a0] sm:$0xff]  ;;  %v413_v12 = vld [vmem:[#allocation4 + $0x1c8] sm:$0xff]  ;;  %v9665_v63 = vpack.c.bf16 %v443_v55, %v439_v51  ;;  %v442_v1 = vld [vmem:[#allocation6 + $0xb0] sm:$0xff] }
  0xdb   :  { %11437 = vst [vmem:[#allocation33_spill] sm:$0xff] %v9637_v62  ;;  %11438 = vst [vmem:[#allocation34_spill] sm:$0xff] %v9640_v6  ;;  %v417_v14 = vld [vmem:[#allocation4 + $0x1e8] sm:$0xff]  ;;  %v9646_v15 = vpack.c.bf16 %v408_v11, %v404_v8  ;;  %v412_v19 = vld [vmem:[#allocation4 + $0x1c0] sm:$0xff]  ;;  %v9668_v11 = vpack.c.bf16 %v442_v1, %v438_v0 }
  0xdc   :  { %11439 = vst [vmem:[#allocation35_spill] sm:$0xff] %v9643_v7  ;;  %v9649_v18 = vpack.c.bf16 %v417_v14, %v413_v12  ;;  %v416_v20 = vld [vmem:[#allocation4 + $0x1e0] sm:$0xff]  ;;  %v447_v5 = vld [vmem:[#allocation6 + $0xd8] sm:$0xff]  ;;  %v454_v36 = vld [vmem:[#allocation6 + $0x110] sm:$0xff] }
  0xdd   :  { %6571 = vmatpush1.bf16.msra.mxu1 %v9602_v22  ;;  %11440 = vst [vmem:[#allocation36_spill] sm:$0xff] %v9646_v15  ;;  %v9652_v21 = vpack.c.bf16 %v416_v20, %v412_v19  ;;  %v451_v8 = vld [vmem:[#allocation6 + $0xf8] sm:$0xff]  ;;  %v446_v19 = vld [vmem:[#allocation6 + $0xd0] sm:$0xff] }
  0xde   :  { %6605 = vmatprep.subr.bf16.mxu1 %v9605_v23  ;;  %11441 = vst [vmem:[#allocation37_spill] sm:$0xff] %v9649_v18  ;;  %v9671_v14 = vpack.c.bf16 %v451_v8, %v447_v5  ;;  %v450_v20 = vld [vmem:[#allocation6 + $0xf0] sm:$0xff]  ;;  %v467_v48 = vld [vmem:[#allocation6 + $0x178] sm:$0xff] }
  0xdf   :  { %11442 = vst [vmem:[#allocation38_spill] sm:$0xff] %v9652_v21  ;;  %v9674_v32 = vpack.c.bf16 %v450_v20, %v446_v19  ;;  %v462_v55 = vld [vmem:[#allocation6 + $0x150] sm:$0xff]  ;;  %v475_v0 = vld [vmem:[#allocation6 + $0x1b8] sm:$0xff] }
  0xe0   :  { %549 = vmatmul.mubr.f32.vlgmr.msra.gmra.mrb[0].mxu1 %v11215_v13  ;;  %v470_v1 = vld [vmem:[#allocation6 + $0x190] sm:$0xff]  ;;  %v479_v8 = vld [vmem:[#allocation6 + $0x1d8] sm:$0xff] }
  0xe1   :  { %6607 = vmatpush1.bf16.msra.mxu1 %v9608_v29  ;;  %690 = vmatprep.mubr.f32.mxu1 %v11215_v13  ;;  %v474_v5 = vld [vmem:[#allocation6 + $0x1b0] sm:$0xff] }
  0xe2   :  { %6609 = vmatprep.subr.bf16.mxu1 %v9611_v30  ;;  %v9693_v19 = vpack.c.bf16 %v474_v5, %v470_v1  ;;  %v366_v5 = vld [vmem:[#allocation4 + $0x50] sm:$0xff] }
  0xe5   :  { %6611 = vmatpush1.bf16.msra.mxu1 %v9615_v37 }
  0xe6   :  { %6613 = vmatprep.subr.bf16.mxu1 %v9619_v39 }
  0xe9   :  { %6615 = vmatpush1.bf16.msra.mxu1 %v9622_v45  ;;  %v905_v45 = vld [vmem:[#allocation9 + $0xb8] sm:$0xff] }
  0xea   :  { %6617 = vmatprep.subr.bf16.mxu1 %v9625_v46  ;;  %v903_v46 = vld [vmem:[#allocation9 + $0xa8] sm:$0xff] }
  0xed   :  { %6619 = vmatpush1.bf16.msra.mxu1 %v9628_v53  ;;  %v899_v53 = vld [vmem:[#allocation9 + $0x88] sm:$0xff] }
  0xee   :  { %6621 = vmatprep.subr.bf16.mxu1 %v9631_v54 }
  0xf1   :  { %6623 = vmatpush1.bf16.msra.mxu1 %v9634_v60  ;;  %v410_v60 = vld [vmem:[#allocation4 + $0x1b0] sm:$0xff] }
  0xf2   :  { %6625 = vmatprep.subr.bf16.mxu1 %v9637_v62  ;;  %v406_v62 = vld [vmem:[#allocation4 + $0x190] sm:$0xff] }
  0xf5   :  { %6627 = vmatpush1.bf16.msra.mxu1 %v9640_v6  ;;  %v402_v6 = vld [vmem:[#allocation4 + $0x170] sm:$0xff] }
  0xf6   :  { %6629 = vmatprep.subr.bf16.mxu1 %v9643_v7  ;;  %v398_v7 = vld [vmem:[#allocation4 + $0x150] sm:$0xff] }
  0xf9   :  { %6631 = vmatpush1.bf16.msra.mxu1 %v9646_v15  ;;  %v394_v15 = vld [vmem:[#allocation4 + $0x130] sm:$0xff] }
  0xfa   :  { %6633 = vmatprep.subr.bf16.mxu1 %v9649_v18  ;;  %v390_v18 = vld [vmem:[#allocation4 + $0x110] sm:$0xff] }
  0xfd   :  { %6635 = vmatpush1.bf16.msra.mxu1 %v9652_v21  ;;  %v391_v21 = vld [vmem:[#allocation4 + $0x118] sm:$0xff] }
 0x136   :  { %v189_v27 = vpop.permute.xlu0 %188  ;;  %v195_v28 = vpop.permute.xlu1 %194 }
 0x137   :  { %vm211_vm0 = vcmp.eq.s32.totalorder %v189_v27, %v186_v25  ;;  %vm213_vm1 = vcmp.eq.s32.totalorder %v195_v28, %v186_v25  ;;  %v455_v27 = vld [vmem:[#allocation6 + $0x118] sm:$0xff] }
 0x138   :  { %6321 = vmatprep.mubr.msk.f32.mxu0 %vm211_vm0, %v9297_v40  ;;  %v459_v28 = vld [vmem:[#allocation6 + $0x138] sm:$0xff] }
 0x139   :  { %v9677_v35 = vpack.c.bf16 %v459_v28, %v455_v27  ;;  %v478_v27 = vld [vmem:[#allocation6 + $0x1d0] sm:$0xff] }
 0x13a   :  { %v192_v42 = vpop.permute.xlu0 %191  ;;  %v198_v44 = vpop.permute.xlu1 %197  ;;  %v482_v28 = vld [vmem:[#allocation6 + $0x1f0] sm:$0xff] }
 0x13b   :  { %vm212_vm2 = vcmp.eq.s32.totalorder %v192_v42, %v186_v25  ;;  %vm214_vm3 = vcmp.eq.s32.totalorder %v198_v44, %v186_v25  ;;  %v458_v42 = vld [vmem:[#allocation6 + $0x130] sm:$0xff]  ;;  %v463_v44 = vld [vmem:[#allocation6 + $0x158] sm:$0xff] }
 0x13c   :  { %6322 = vmatmul.mubr.msk.f32.vlgmr.msra.gmra.mrb[0].mxu0 %vm212_vm2, %v9297_v40  ;;  %v9680_v49 = vpack.c.bf16 %v458_v42, %v454_v36  ;;  %v9684_v51 = vpack.c.bf16 %v467_v48, %v463_v44  ;;  %v363_v36 = vld [vmem:[#allocation4 + $0x38] sm:$0xff]  ;;  %v9699_v42 = vpack.c.bf16 %v482_v28, %v478_v27  ;;  %v358_v48 = vld [vmem:[#allocation4 + $0x10] sm:$0xff] }
 0x13d   :  { %6324 = vmatprep.mubr.msk.f32.mxu0 %vm213_vm1, %v9297_v40  ;;  %6575 = vmatpush1.bf16.msra.mxu0 %v9657_v41  ;;  %v379_v27 = vld [vmem:[#allocation4 + $0xb8] sm:$0xff] }
 0x13e   :  { %v201_v57 = vpop.permute.xlu0 %200  ;;  %v204_v58 = vpop.permute.xlu1 %203  ;;  %6577 = vmatprep.subr.bf16.mxu0 %v9659_v47 }
 0x13f   :  { %vm215_vm4 = vcmp.eq.s32.totalorder %v201_v57, %v186_v25  ;;  %vm216_vm5 = vcmp.eq.s32.totalorder %v204_v58, %v186_v25  ;;  %v466_v57 = vld [vmem:[#allocation6 + $0x170] sm:$0xff]  ;;  %v471_v58 = vld [vmem:[#allocation6 + $0x198] sm:$0xff] }
 0x140   :  { %6325 = vmatmul.mubr.msk.f32.gmra.mrb[2].mxu0 %vm214_vm3, %v9297_v40 }
 0x141   :  { %6327 = vmatprep.mubr.msk.f32.mxu0 %vm215_vm4, %v9297_v40  ;;  %6579 = vmatpush1.bf16.msra.mxu0 %v9662_v56 }
 0x142   :  { %v207_v12 = vpop.permute.xlu0 %206  ;;  %6581 = vmatprep.subr.bf16.mxu0 %v9665_v63  ;;  %v210_v33 = vpop.permute.xlu1 %209 }
 0x143   :  { %vm217_vm6 = vcmp.eq.s32.totalorder %v207_v12, %v186_v25  ;;  %vm218_vm7 = vcmp.eq.s32.totalorder %v210_v33, %v186_v25  ;;  %v9687_v25 = vpack.c.bf16 %v466_v57, %v462_v55  ;;  %v483_v12 = vld [vmem:[#allocation6 + $0x1f8] sm:$0xff]  ;;  %v362_v55 = vld [vmem:[#allocation4 + $0x30] sm:$0xff] }
 0x144   :  { %6328 = vmatmul.mubr.msk.f32.gmra.mrb[4].mxu0 %vm216_vm5, %v9297_v40  ;;  %v9696_v20 = vpack.c.bf16 %v483_v12, %v479_v8  ;;  %v359_v33 = vld [vmem:[#allocation4 + $0x18] sm:$0xff]  ;;  %v370_v8 = vld [vmem:[#allocation4 + $0x70] sm:$0xff] }
 0x145   :  { %6330 = vmatprep.mubr.msk.f32.mxu0 %vm217_vm6, %v9297_v40  ;;  %6583 = vmatpush1.bf16.msra.mxu0 %v9668_v11  ;;  %v9702_v44 = vpack.c.bf16 %v363_v36, %v359_v33  ;;  %v367_v57 = vld [vmem:[#allocation4 + $0x58] sm:$0xff]  ;;  %v9712_v28 = vpack.c.bf16 %v370_v8, %v366_v5  ;;  %v374_v36 = vld [vmem:[#allocation4 + $0x90] sm:$0xff] }
 0x146   :  { %6585 = vmatprep.subr.bf16.mxu0 %v9671_v14  ;;  %v375_v12 = vld [vmem:[#allocation4 + $0x98] sm:$0xff]  ;;  %v382_v5 = vld [vmem:[#allocation4 + $0xd0] sm:$0xff] }
 0x147   :  { %11444 = vst [vmem:[#allocation40_spill] sm:$0xff] %v9712_v28  ;;  %v9716_v33 = vpack.c.bf16 %v379_v27, %v375_v12  ;;  %v386_v8 = vld [vmem:[#allocation4 + $0xf0] sm:$0xff] }
 0x148   :  { %6331 = vmatmul.mubr.msk.f32.gmra.mrb[6].mxu0 %vm218_vm7, %v9297_v40  ;;  %v9690_v40 = vpack.c.bf16 %v475_v0, %v471_v58  ;;  %v371_v58 = vld [vmem:[#allocation4 + $0x78] sm:$0xff]  ;;  %v9705_v0 = vpack.c.bf16 %v362_v55, %v358_v48  ;;  %v378_v48 = vld [vmem:[#allocation4 + $0xb0] sm:$0xff]  ;;  %v9725_v12 = vpack.c.bf16 %v386_v8, %v382_v5 }
 0x149   :  { %6587 = vmatpush1.bf16.msra.mxu0 %v9674_v32  ;;  %619 = vmatprep.mubr.f32.mxu0 %v11215_v13  ;;  %v9708_v1 = vpack.c.bf16 %v371_v58, %v367_v57  ;;  %11445 = vst [vmem:[#allocation41_spill] sm:$0xff] %v9716_v33  ;;  %v383_v55 = vld [vmem:[#allocation4 + $0xd8] sm:$0xff]  ;;  %v9719_v58 = vpack.c.bf16 %v378_v48, %v374_v36 }
 0x14a   :  { %6589 = vmatprep.subr.bf16.mxu0 %v9677_v35  ;;  %v387_v57 = vld [vmem:[#allocation4 + $0xf8] sm:$0xff]  ;;  %11448 = vst [vmem:[#allocation44_spill] sm:$0xff] %v9725_v12 }
 0x14b   :  { %11443 = vst [vmem:[#allocation39_spill] sm:$0xff] %v9708_v1  ;;  %11446 = vst [vmem:[#allocation42_spill] sm:$0xff] %v9719_v58  ;;  %v9722_v24 = vpack.c.bf16 %v387_v57, %v383_v55  ;;  %v399_v36 = vld [vmem:[#allocation4 + $0x158] sm:$0xff]  ;;  %v9731_v55 = vpack.c.bf16 %v394_v15, %v390_v18 }
 0x14c   :  { %v403_v48 = vld [vmem:[#allocation4 + $0x178] sm:$0xff] }
 0x14d   :  { %6591 = vmatpush1.bf16.msra.mxu0 %v9680_v49  ;;  %11447 = vst [vmem:[#allocation43_spill] sm:$0xff] %v9722_v24  ;;  %11450 = vst [vmem:[#allocation46_spill] sm:$0xff] %v9731_v55  ;;  %v9734_v57 = vpack.c.bf16 %v403_v48, %v399_v36  ;;  %v407_v5 = vld [vmem:[#allocation4 + $0x198] sm:$0xff]  ;;  %v9743_v36 = vpack.c.bf16 %v410_v60, %v406_v62 }
 0x14e   :  { %6593 = vmatprep.subr.bf16.mxu0 %v9684_v51  ;;  %v411_v8 = vld [vmem:[#allocation4 + $0x1b8] sm:$0xff] }
 0x14f   :  { %11451 = vst [vmem:[#allocation47_spill] sm:$0xff] %v9734_v57  ;;  %v415_v15 = vld [vmem:[#allocation4 + $0x1d8] sm:$0xff]  ;;  %11454 = vst [vmem:[#allocation50_spill] sm:$0xff] %v9743_v36 }
 0x150   :  { %v419_v18 = vld [vmem:[#allocation4 + $0x1f8] sm:$0xff] }
 0x151   :  { %6595 = vmatpush1.bf16.msra.mxu0 %v9687_v25  ;;  %v9746_v48 = vpack.c.bf16 %v419_v18, %v415_v15  ;;  %v889_v60 = vld [vmem:[#allocation9 + $0x38] sm:$0xff]  ;;  %v882_v15 = vld [vmem:[#allocation9] sm:$0xff] }
 0x152   :  { %6597 = vmatprep.subr.bf16.mxu0 %v9690_v40  ;;  %v886_v18 = vld [vmem:[#allocation9 + $0x20] sm:$0xff] }
 0x153   :  { %11455 = vst [vmem:[#allocation51_spill] sm:$0xff] %v9746_v48 }
 0x155   :  { %6599 = vmatpush1.bf16.msra.mxu0 %v9693_v19 }
 0x156   :  { %6601 = vmatprep.subr.bf16.mxu0 %v9696_v20 }
 0x159   :  { %6603 = vmatpush1.bf16.msra.mxu0 %v9699_v42 }
 0x15a   :  { %6637 = vmatprep.subr.bf16.mxu0 %v9702_v44 }
 0x15c   :  { %620 = vmatmul.mubr.f32.vlgmr.msra.gmra.mrb[8].mxu0 %v11215_v13 }
 0x15d   :  { %6639 = vmatpush1.bf16.msra.mxu0 %v9705_v0  ;;  %761 = vmatprep.mubr.f32.mxu0 %v11215_v13  ;;  %v395_v13 = vld [vmem:[#allocation4 + $0x138] sm:$0xff] }
 0x15e   :  { %6641 = vmatprep.subr.bf16.mxu0 %v9708_v1  ;;  %v9728_v27 = vpack.c.bf16 %v395_v13, %v391_v21  ;;  %v9737_v13 = vpack.c.bf16 %v402_v6, %v398_v7  ;;  %v9740_v21 = vpack.c.bf16 %v411_v8, %v407_v5  ;;  %v883_v7 = vld [vmem:[#allocation9 + $0x8] sm:$0xff]  ;;  %v885_v8 = vld [vmem:[#allocation9 + $0x18] sm:$0xff] }
 0x15f   :  { %v887_v5 = vld [vmem:[#allocation9 + $0x28] sm:$0xff]  ;;  %v9755_v62 = vpack.c.bf16 %v889_v60, %v885_v8 }
 0x160   :  { %11449 = vst [vmem:[#allocation45_spill] sm:$0xff] %v9728_v27  ;;  %11452 = vst [vmem:[#allocation48_spill] sm:$0xff] %v9737_v13 }
 0x161   :  { %6643 = vmatpush1.bf16.msra.mxu0 %v9712_v28  ;;  %11453 = vst [vmem:[#allocation49_spill] sm:$0xff] %v9740_v21  ;;  %11458 = vst [vmem:[#allocation54_spill] sm:$0xff] %v9755_v62 }
 0x162   :  { %6645 = vmatprep.subr.bf16.mxu0 %v9716_v33 }
 0x165   :  { %6647 = vmatpush1.bf16.msra.mxu0 %v9719_v58  ;;  %v901_v58 = vld [vmem:[#allocation9 + $0x98] sm:$0xff] }
 0x166   :  { %6649 = vmatprep.subr.bf16.mxu0 %v9722_v24 }
 0x169   :  { %6651 = vmatpush1.bf16.msra.mxu0 %v9725_v12  ;;  %v896_v12 = vld [vmem:[#allocation9 + $0x70] sm:$0xff] }
 0x16a   :  { %6653 = vmatprep.subr.bf16.mxu0 %v9728_v27  ;;  %v414_v27 = vld [vmem:[#allocation4 + $0x1d0] sm:$0xff] }
 0x16d   :  { %6655 = vmatpush1.bf16.msra.mxu0 %v9731_v55  ;;  %v418_v55 = vld [vmem:[#allocation4 + $0x1f0] sm:$0xff] }
 0x16e   :  { %6657 = vmatprep.subr.bf16.mxu0 %v9734_v57  ;;  %v9749_v6 = vpack.c.bf16 %v418_v55, %v414_v27  ;;  %v884_v27 = vld [vmem:[#allocation9 + $0x10] sm:$0xff]  ;;  %v9759_v57 = vpack.c.bf16 %v886_v18, %v882_v15 }
 0x16f   :  { %v888_v55 = vld [vmem:[#allocation9 + $0x30] sm:$0xff] }
 0x170   :  { %11456 = vst [vmem:[#allocation52_spill] sm:$0xff] %v9749_v6  ;;  %11459 = vst [vmem:[#allocation55_spill] sm:$0xff] %v9759_v57  ;;  %v9761_v54 = vpack.c.bf16 %v888_v55, %v884_v27  ;;  %v9781_v27 = vpack.c.bf16 %v905_v45, %v901_v58  ;;  %v904_v55 = vld [vmem:[#allocation9 + $0xb0] sm:$0xff]  ;;  %v910_v58 = vld [vmem:[#allocation9 + $0xe0] sm:$0xff] }
 0x171   :  { %6659 = vmatpush1.bf16.msra.mxu0 %v9737_v13  ;;  %v9753_v13 = vpack.c.bf16 %v887_v5, %v883_v7  ;;  %v890_v7 = vld [vmem:[#allocation9 + $0x40] sm:$0xff] }
 0x172   :  { %6661 = vmatprep.subr.bf16.mxu0 %v9740_v21  ;;  %v893_v21 = vld [vmem:[#allocation9 + $0x58] sm:$0xff]  ;;  %11460 = vst [vmem:[#allocation56_spill] sm:$0xff] %v9761_v54  ;;  %v894_v5 = vld [vmem:[#allocation9 + $0x60] sm:$0xff]  ;;  %11468 = vst [vmem:[#allocation64_spill] sm:$0xff] %v9781_v27 }
 0x173   :  { %11457 = vst [vmem:[#allocation53_spill] sm:$0xff] %v9753_v13  ;;  %6669 = vmatprep.subr.bf16.mxu1 %v9753_v13  ;;  %v9771_v15 = vpack.c.bf16 %v894_v5, %v890_v7  ;;  %v911_v7 = vld [vmem:[#allocation9 + $0xe8] sm:$0xff]  ;;  %v11470_v5 = vmov 0.0  }
 0x175   :  { %6663 = vmatpush1.bf16.msra.mxu0 %v9743_v36  ;;  %v891_v36 = vld [vmem:[#allocation9 + $0x48] sm:$0xff]  ;;  %11464 = vst [vmem:[#allocation60_spill] sm:$0xff] %v9771_v15 }
 0x176   :  { %6665 = vmatprep.subr.bf16.mxu0 %v9746_v48  ;;  %v895_v48 = vld [vmem:[#allocation9 + $0x68] sm:$0xff] }
 0x177   :  { %v9765_v60 = vpack.c.bf16 %v895_v48, %v891_v36  ;;  %v898_v36 = vld [vmem:[#allocation9 + $0x80] sm:$0xff] }
 0x179   :  { %6667 = vmatpush1.bf16.msra.mxu0 %v9749_v6  ;;  %v897_v6 = vld [vmem:[#allocation9 + $0x78] sm:$0xff]  ;;  %11462 = vst [vmem:[#allocation58_spill] sm:$0xff] %v9765_v60 }
 0x17a   :  { %6701 = vmatprep.subr.bf16.mxu0 %v9755_v62  ;;  %v9767_v13 = vpack.c.bf16 %v897_v6, %v893_v21  ;;  %v892_v62 = vld [vmem:[#allocation9 + $0x50] sm:$0xff]  ;;  %v902_v21 = vld [vmem:[#allocation9 + $0xa0] sm:$0xff]  ;;  %v9779_v6 = vpack.c.bf16 %v903_v46, %v899_v53 }
 0x17b   :  { %v9773_v18 = vpack.c.bf16 %v896_v12, %v892_v62  ;;  %v909_v12 = vld [vmem:[#allocation9 + $0xd8] sm:$0xff]  ;;  %v9789_v46 = vpack.c.bf16 %v902_v21, %v898_v36  ;;  %v906_v53 = vld [vmem:[#allocation9 + $0xc0] sm:$0xff]  ;;  %v919_v36 = vld [vmem:[#allocation9 + $0x128] sm:$0xff] }
 0x17c   :  { %11463 = vst [vmem:[#allocation59_spill] sm:$0xff] %v9767_v13  ;;  %11467 = vst [vmem:[#allocation63_spill] sm:$0xff] %v9779_v6  ;;  %v913_v62 = vld [vmem:[#allocation9 + $0xf8] sm:$0xff] }
 0x17d   :  { %11465 = vst [vmem:[#allocation61_spill] sm:$0xff] %v9773_v18  ;;  %11471 = vst [vmem:[#allocation66_spill] sm:$0xff] %v9789_v46  ;;  %v917_v21 = vld [vmem:[#allocation9 + $0x118] sm:$0xff] }
 0x20f   :  { %v9763_v8 = vpop.f32.mrb[0].mxu0 }
 0x210   :  { %11461 = vst [vmem:[#allocation57_spill] sm:$0xff] %v9763_v8  ;;  %v317_v24 = vpop.f32.mrb[1].mxu0  ;;  %v915_v8 = vld [vmem:[#allocation9 + $0x108] sm:$0xff] }
 0x211   :  { %691 = vmatmul.mubr.f32.vlgmr.msra.gmra.mrb[0].mxu1 %v317_v24  ;;  %762 = vmatmul.mubr.f32.vlgmr.msra.gmra.mrb[8].mxu0 %v317_v24  ;;  %v900_v24 = vld [vmem:[#allocation9 + $0x90] sm:$0xff] }
 0x212   :  { %6671 = vmatpush1.bf16.msra.mxu1 %v9759_v57  ;;  %6703 = vmatpush1.bf16.msra.mxu0 %v9761_v54  ;;  %v907_v57 = vld [vmem:[#allocation9 + $0xc8] sm:$0xff]  ;;  %v9791_v45 = vpack.c.bf16 %v904_v55, %v900_v24  ;;  %v921_v24 = vld [vmem:[#allocation9 + $0x138] sm:$0xff]  ;;  %v9805_v55 = vpack.c.bf16 %v910_v58, %v906_v53 }
 0x213   :  { %v9775_v48 = vpop.f32.mrb[2].mxu0  ;;  %6673 = vmatprep.subr.bf16.mxu1 %v9765_v60  ;;  %6705 = vmatprep.subr.bf16.mxu0 %v9767_v13  ;;  %v9799_v13 = vpack.c.bf16 %v913_v62, %v909_v12  ;;  %v908_v60 = vld [vmem:[#allocation9 + $0xd0] sm:$0xff]  ;;  %v9813_v12 = vpack.c.bf16 %v919_v36, %v915_v8  ;;  %v9815_v62 = vpack.c.bf16 %v921_v24, %v917_v21  ;;  %v923_v8 = vld [vmem:[#allocation9 + $0x148] sm:$0xff]  ;;  %v925_v58 = vld [vmem:[#allocation9 + $0x158] sm:$0xff] }
 0x214   :  { %11466 = vst [vmem:[#allocation62_spill] sm:$0xff] %v9775_v48  ;;  %v9783_v54 = vpop.f32.mrb[3].mxu0  ;;  %1010 = vmatprep.mubr.f32.mxu1 %v11470_v5  ;;  %1081 = vmatprep.mubr.f32.mxu0 %v11470_v5  ;;  %11472 = vst [vmem:[#allocation67_spill] sm:$0xff] %v9791_v45  ;;  %v927_v53 = vld [vmem:[#allocation9 + $0x168] sm:$0xff]  ;;  %v929_v21 = vld [vmem:[#allocation9 + $0x178] sm:$0xff] }
 0x215   :  { %11469 = vst [vmem:[#allocation65_spill] sm:$0xff] %v9783_v54  ;;  %v9797_v54 = vpack.c.bf16 %v911_v7, %v907_v57  ;;  %11475 = vst [vmem:[#allocation70_spill] sm:$0xff] %v9799_v13  ;;  %v914_v57 = vld [vmem:[#allocation9 + $0x100] sm:$0xff]  ;;  %v9829_v36 = vpack.c.bf16 %v927_v53, %v923_v8  ;;  %v935_v8 = vld [vmem:[#allocation9 + $0x1a8] sm:$0xff] }
 0x216   :  { %6675 = vmatpush1.bf16.msra.mxu1 %v9771_v15  ;;  %6707 = vmatpush1.bf16.msra.mxu0 %v9773_v18  ;;  %v912_v15 = vld [vmem:[#allocation9 + $0xf0] sm:$0xff]  ;;  %11477 = vst [vmem:[#allocation72_spill] sm:$0xff] %v9805_v55  ;;  %11480 = vst [vmem:[#allocation75_spill] sm:$0xff] %v9813_v12  ;;  %v922_v24 = vld [vmem:[#allocation9 + $0x140] sm:$0xff] }
 0x217   :  { %v9793_v48 = vpop.f32.mrb[4].mxu0  ;;  %6677 = vmatprep.subr.bf16.mxu1 %v9779_v6  ;;  %6709 = vmatprep.subr.bf16.mxu0 %v9781_v27  ;;  %11474 = vst [vmem:[#allocation69_spill] sm:$0xff] %v9797_v54  ;;  %11481 = vst [vmem:[#allocation76_spill] sm:$0xff] %v9815_v62  ;;  %v916_v27 = vld [vmem:[#allocation9 + $0x110] sm:$0xff]  ;;  %v933_v53 = vld [vmem:[#allocation9 + $0x198] sm:$0xff] }
 0x218   :  { %11473 = vst [vmem:[#allocation68_spill] sm:$0xff] %v9793_v48  ;;  %v9801_v18 = vpop.f32.mrb[5].mxu0  ;;  %v9807_v48 = vpack.c.bf16 %v912_v15, %v908_v60  ;;  %11485 = vst [vmem:[#allocation80_spill] sm:$0xff] %v9829_v36 }
 0x219   :  { %11476 = vst [vmem:[#allocation71_spill] sm:$0xff] %v9801_v18  ;;  %v918_v18 = vld [vmem:[#allocation9 + $0x120] sm:$0xff] }
 0x21a   :  { %6679 = vmatpush1.bf16.msra.mxu1 %v9789_v46  ;;  %6711 = vmatpush1.bf16.msra.mxu0 %v9791_v45  ;;  %11478 = vst [vmem:[#allocation73_spill] sm:$0xff] %v9807_v48  ;;  %v920_v46 = vld [vmem:[#allocation9 + $0x130] sm:$0xff]  ;;  %v9821_v60 = vpack.c.bf16 %v918_v18, %v914_v57  ;;  %v9831_v18 = vpack.c.bf16 %v929_v21, %v925_v58  ;;  %v937_v58 = vld [vmem:[#allocation9 + $0x1b8] sm:$0xff]  ;;  %v934_v21 = vld [vmem:[#allocation9 + $0x1a0] sm:$0xff] }
 0x21b   :  { %v9809_v7 = vpop.f32.mrb[6].mxu0  ;;  %6681 = vmatprep.subr.bf16.mxu1 %v9797_v54  ;;  %6713 = vmatprep.subr.bf16.mxu0 %v9799_v13  ;;  %v9823_v15 = vpack.c.bf16 %v920_v46, %v916_v27  ;;  %v924_v46 = vld [vmem:[#allocation9 + $0x150] sm:$0xff] }
 0x21c   :  { %11479 = vst [vmem:[#allocation74_spill] sm:$0xff] %v9809_v7  ;;  %v9817_v6 = vpop.f32.mrb[7].mxu0  ;;  %11483 = vst [vmem:[#allocation78_spill] sm:$0xff] %v9821_v60  ;;  %v926_v7 = vld [vmem:[#allocation9 + $0x160] sm:$0xff]  ;;  %v928_v57 = vld [vmem:[#allocation9 + $0x170] sm:$0xff] }
 0x21d   :  { %11482 = vst [vmem:[#allocation77_spill] sm:$0xff] %v9817_v6  ;;  %11484 = vst [vmem:[#allocation79_spill] sm:$0xff] %v9823_v15  ;;  %v9833_v27 = vpack.c.bf16 %v926_v7, %v922_v24  ;;  %v9836_v6 = vpack.c.bf16 %v928_v57, %v924_v46  ;;  %v930_v7 = vld [vmem:[#allocation9 + $0x180] sm:$0xff]  ;;  %v9843_v24 = vpack.c.bf16 %v937_v58, %v933_v53  ;;  %v932_v46 = vld [vmem:[#allocation9 + $0x190] sm:$0xff] }
 0x21e   :  { %6683 = vmatpush1.bf16.msra.mxu1 %v9805_v55  ;;  %6715 = vmatpush1.bf16.msra.mxu0 %v9807_v48  ;;  %11486 = vst [vmem:[#allocation81_spill] sm:$0xff] %v9831_v18  ;;  %v936_v57 = vld [vmem:[#allocation9 + $0x1b0] sm:$0xff]  ;;  %v945_v53 = vld [vmem:[#allocation9 + $0x1f8] sm:$0xff]  ;;  %v938_v58 = vld [vmem:[#allocation9 + $0x1c0] sm:$0xff] }
 0x21f   :  { %6685 = vmatprep.subr.bf16.mxu1 %v9813_v12  ;;  %6717 = vmatprep.subr.bf16.mxu0 %v9815_v62  ;;  %11487 = vst [vmem:[#allocation82_spill] sm:$0xff] %v9833_v27  ;;  %11488 = vst [vmem:[#allocation83_spill] sm:$0xff] %v9836_v6  ;;  %v9845_v62 = vpack.c.bf16 %v934_v21, %v930_v7  ;;  %v942_v7 = vld [vmem:[#allocation9 + $0x1e0] sm:$0xff]  ;;  %v871_v12 = vld [vmem:[#allocation7 + $0x1a8] sm:$0xff] }
 0x220   :  { %11490 = vst [vmem:[#allocation85_spill] sm:$0xff] %v9843_v24  ;;  %v873_v48 = vld [vmem:[#allocation7 + $0x1b8] sm:$0xff] }
 0x221   :  { %11491 = vst [vmem:[#allocation86_spill] sm:$0xff] %v9845_v62 }
 0x222   :  { %6687 = vmatpush1.bf16.msra.mxu1 %v9821_v60  ;;  %6719 = vmatpush1.bf16.msra.mxu0 %v9823_v15  ;;  %v931_v15 = vld [vmem:[#allocation9 + $0x188] sm:$0xff] }
 0x223   :  { %6689 = vmatprep.subr.bf16.mxu1 %v9829_v36  ;;  %6721 = vmatprep.subr.bf16.mxu0 %v9831_v18  ;;  %v9841_v60 = vpack.c.bf16 %v935_v8, %v931_v15  ;;  %v9848_v18 = vpack.c.bf16 %v936_v57, %v932_v46  ;;  %v943_v15 = vld [vmem:[#allocation9 + $0x1e8] sm:$0xff]  ;;  %v941_v8 = vld [vmem:[#allocation9 + $0x1d8] sm:$0xff]  ;;  %v9857_v36 = vpack.c.bf16 %v942_v7, %v938_v58  ;;  %v940_v46 = vld [vmem:[#allocation9 + $0x1d0] sm:$0xff] }
 0x224   :  { %v9855_v21 = vpack.c.bf16 %v945_v53, %v941_v8  ;;  %v944_v57 = vld [vmem:[#allocation9 + $0x1f0] sm:$0xff]  ;;  %v825_v8 = vld [vmem:[#allocation7 + $0x38] sm:$0xff]  ;;  %v818_v53 = vld [vmem:[#allocation7] sm:$0xff] }
 0x225   :  { %11489 = vst [vmem:[#allocation84_spill] sm:$0xff] %v9841_v60  ;;  %11492 = vst [vmem:[#allocation87_spill] sm:$0xff] %v9848_v18  ;;  %v822_v58 = vld [vmem:[#allocation7 + $0x20] sm:$0xff] }
 0x226   :  { %6691 = vmatpush1.bf16.msra.mxu1 %v9833_v27  ;;  %6723 = vmatpush1.bf16.msra.mxu0 %v9836_v6  ;;  %v939_v6 = vld [vmem:[#allocation9 + $0x1c8] sm:$0xff]  ;;  %11494 = vst [vmem:[#allocation89_spill] sm:$0xff] %v9855_v21  ;;  %11495 = vst [vmem:[#allocation90_spill] sm:$0xff] %v9857_v36 }
 0x227   :  { %6693 = vmatprep.subr.bf16.mxu1 %v9841_v60  ;;  %6725 = vmatprep.subr.bf16.mxu0 %v9843_v24  ;;  %v9853_v27 = vpack.c.bf16 %v943_v15, %v939_v6  ;;  %v9860_v24 = vpack.c.bf16 %v944_v57, %v940_v46  ;;  %v823_v6 = vld [vmem:[#allocation7 + $0x28] sm:$0xff]  ;;  %v821_v15 = vld [vmem:[#allocation7 + $0x18] sm:$0xff]  ;;  %v9869_v60 = vpack.c.bf16 %v822_v58, %v818_v53  ;;  %v820_v46 = vld [vmem:[#allocation7 + $0x10] sm:$0xff] }
 0x228   :  { %v9867_v7 = vpack.c.bf16 %v825_v8, %v821_v15  ;;  %v824_v57 = vld [vmem:[#allocation7 + $0x30] sm:$0xff]  ;;  %v833_v8 = vld [vmem:[#allocation7 + $0x78] sm:$0xff]  ;;  %v826_v53 = vld [vmem:[#allocation7 + $0x40] sm:$0xff] }
 0x229   :  { %11493 = vst [vmem:[#allocation88_spill] sm:$0xff] %v9853_v27  ;;  %11496 = vst [vmem:[#allocation91_spill] sm:$0xff] %v9860_v24  ;;  %v830_v58 = vld [vmem:[#allocation7 + $0x60] sm:$0xff] }
 0x22a   :  { %6695 = vmatpush1.bf16.msra.mxu1 %v9845_v62  ;;  %6727 = vmatpush1.bf16.msra.mxu0 %v9848_v18  ;;  %v819_v18 = vld [vmem:[#allocation7 + $0x8] sm:$0xff]  ;;  %11498 = vst [vmem:[#allocation93_spill] sm:$0xff] %v9867_v7  ;;  %11499 = vst [vmem:[#allocation94_spill] sm:$0xff] %v9869_v60 }
 0x22b   :  { %6697 = vmatprep.subr.bf16.mxu1 %v9853_v27  ;;  %6729 = vmatprep.subr.bf16.mxu0 %v9855_v21  ;;  %v9865_v62 = vpack.c.bf16 %v823_v6, %v819_v18  ;;  %v827_v18 = vld [vmem:[#allocation7 + $0x48] sm:$0xff] }
 0x22c   :  { %v831_v6 = vld [vmem:[#allocation7 + $0x68] sm:$0xff] }
 0x22d   :  { %11497 = vst [vmem:[#allocation92_spill] sm:$0xff] %v9865_v62  ;;  %v9879_v15 = vpack.c.bf16 %v831_v6, %v827_v18  ;;  %v835_v18 = vld [vmem:[#allocation7 + $0x88] sm:$0xff] }
 0x22e   :  { %6699 = vmatpush1.bf16.msra.mxu1 %v9857_v36  ;;  %6731 = vmatpush1.bf16.msra.mxu0 %v9860_v24  ;;  %v9873_v36 = vpack.c.bf16 %v824_v57, %v820_v46  ;;  %v829_v24 = vld [vmem:[#allocation7 + $0x58] sm:$0xff]  ;;  %v9883_v46 = vpack.c.bf16 %v830_v58, %v826_v53  ;;  %v828_v57 = vld [vmem:[#allocation7 + $0x50] sm:$0xff]  ;;  %v839_v6 = vld [vmem:[#allocation7 + $0xa8] sm:$0xff] }
 0x22f   :  { %6733 = vmatprep.subr.bf16.mxu1 %v9865_v62  ;;  %6765 = vmatprep.subr.bf16.mxu0 %v9867_v7  ;;  %11501 = vst [vmem:[#allocation96_spill] sm:$0xff] %v9879_v15  ;;  %v9881_v62 = vpack.c.bf16 %v833_v8, %v829_v24  ;;  %v832_v7 = vld [vmem:[#allocation7 + $0x70] sm:$0xff]  ;;  %v9893_v24 = vpack.c.bf16 %v839_v6, %v835_v18  ;;  %v841_v8 = vld [vmem:[#allocation7 + $0xb8] sm:$0xff]  ;;  %v834_v53 = vld [vmem:[#allocation7 + $0x80] sm:$0xff] }
 0x230   :  { %11500 = vst [vmem:[#allocation95_spill] sm:$0xff] %v9873_v36  ;;  %11503 = vst [vmem:[#allocation98_spill] sm:$0xff] %v9883_v46  ;;  %v838_v58 = vld [vmem:[#allocation7 + $0xa0] sm:$0xff] }
 0x231   :  { %1011 = vmatmul.mubr.f32.vlgmr.msra.gmra.mrb[2].mxu1 %v11470_v5  ;;  %1082 = vmatmul.mubr.f32.vlgmr.msra.gmra.mrb[10].mxu0 %v11470_v5  ;;  %11502 = vst [vmem:[#allocation97_spill] sm:$0xff] %v9881_v62  ;;  %11505 = vst [vmem:[#allocation100_spill] sm:$0xff] %v9893_v24  ;;  %v9897_v27 = vpack.c.bf16 %v838_v58, %v834_v53  ;;  %v842_v6 = vld [vmem:[#allocation7 + $0xc0] sm:$0xff] }
 0x232   :  { %6735 = vmatpush1.bf16.msra.mxu1 %v9869_v60  ;;  %6767 = vmatpush1.bf16.msra.mxu0 %v9873_v36  ;;  %v9888_v60 = vpack.c.bf16 %v832_v7, %v828_v57  ;;  %v837_v36 = vld [vmem:[#allocation7 + $0x98] sm:$0xff]  ;;  %v836_v7 = vld [vmem:[#allocation7 + $0x90] sm:$0xff] }
 0x233   :  { %1152 = vmatprep.mubr.f32.mxu1 %v11470_v5  ;;  %1223 = vmatprep.mubr.f32.mxu0 %v11470_v5  ;;  %v9895_v21 = vpack.c.bf16 %v841_v8, %v837_v36  ;;  %11507 = vst [vmem:[#allocation102_spill] sm:$0xff] %v9897_v27  ;;  %v840_v57 = vld [vmem:[#allocation7 + $0xb0] sm:$0xff]  ;;  %v849_v36 = vld [vmem:[#allocation7 + $0xf8] sm:$0xff]  ;;  %v846_v8 = vld [vmem:[#allocation7 + $0xe0] sm:$0xff] }
 0x234   :  { %6737 = vmatprep.subr.bf16.mxu1 %v9879_v15  ;;  %11504 = vst [vmem:[#allocation99_spill] sm:$0xff] %v9888_v60  ;;  %6769 = vmatprep.subr.bf16.mxu0 %v9881_v62  ;;  %v9900_v62 = vpack.c.bf16 %v840_v57, %v836_v7  ;;  %v847_v15 = vld [vmem:[#allocation7 + $0xe8] sm:$0xff]  ;;  %v9909_v58 = vpack.c.bf16 %v846_v8, %v842_v6  ;;  %v844_v7 = vld [vmem:[#allocation7 + $0xd0] sm:$0xff] }
 0x235   :  { %11506 = vst [vmem:[#allocation101_spill] sm:$0xff] %v9895_v21  ;;  %v848_v57 = vld [vmem:[#allocation7 + $0xf0] sm:$0xff] }
 0x236   :  { %6739 = vmatpush1.bf16.msra.mxu1 %v9883_v46  ;;  %6771 = vmatpush1.bf16.msra.mxu0 %v9888_v60  ;;  %11508 = vst [vmem:[#allocation103_spill] sm:$0xff] %v9900_v62  ;;  %v843_v46 = vld [vmem:[#allocation7 + $0xc8] sm:$0xff]  ;;  %v845_v60 = vld [vmem:[#allocation7 + $0xd8] sm:$0xff]  ;;  %11511 = vst [vmem:[#allocation106_spill] sm:$0xff] %v9909_v58 }
 0x237   :  { %6741 = vmatprep.subr.bf16.mxu1 %v9893_v24  ;;  %6773 = vmatprep.subr.bf16.mxu0 %v9895_v21  ;;  %v9905_v18 = vpack.c.bf16 %v847_v15, %v843_v46  ;;  %v9907_v53 = vpack.c.bf16 %v849_v36, %v845_v60  ;;  %v9912_v21 = vpack.c.bf16 %v848_v57, %v844_v7  ;;  %v855_v24 = vld [vmem:[#allocation7 + $0x128] sm:$0xff]  ;;  %v857_v60 = vld [vmem:[#allocation7 + $0x138] sm:$0xff]  ;;  %v850_v46 = vld [vmem:[#allocation7 + $0x100] sm:$0xff] }
 0x238   :  { %v854_v36 = vld [vmem:[#allocation7 + $0x120] sm:$0xff]  ;;  %v852_v7 = vld [vmem:[#allocation7 + $0x110] sm:$0xff] }
 0x239   :  { %11509 = vst [vmem:[#allocation104_spill] sm:$0xff] %v9905_v18  ;;  %11510 = vst [vmem:[#allocation105_spill] sm:$0xff] %v9907_v53  ;;  %v9921_v8 = vpack.c.bf16 %v854_v36, %v850_v46  ;;  %v856_v57 = vld [vmem:[#allocation7 + $0x130] sm:$0xff] }
 0x23a   :  { %6743 = vmatpush1.bf16.msra.mxu1 %v9897_v27  ;;  %6775 = vmatpush1.bf16.msra.mxu0 %v9900_v62  ;;  %11512 = vst [vmem:[#allocation107_spill] sm:$0xff] %v9912_v21  ;;  %v851_v27 = vld [vmem:[#allocation7 + $0x108] sm:$0xff]  ;;  %v853_v62 = vld [vmem:[#allocation7 + $0x118] sm:$0xff] }
 0x23b   :  { %6745 = vmatprep.subr.bf16.mxu1 %v9905_v18  ;;  %6777 = vmatprep.subr.bf16.mxu0 %v9907_v53  ;;  %v9917_v15 = vpack.c.bf16 %v855_v24, %v851_v27  ;;  %v9919_v6 = vpack.c.bf16 %v857_v60, %v853_v62  ;;  %11515 = vst [vmem:[#allocation110_spill] sm:$0xff] %v9921_v8  ;;  %v863_v18 = vld [vmem:[#allocation7 + $0x168] sm:$0xff]  ;;  %v865_v62 = vld [vmem:[#allocation7 + $0x178] sm:$0xff]  ;;  %v858_v24 = vld [vmem:[#allocation7 + $0x140] sm:$0xff] }
 0x23c   :  { %v9924_v53 = vpack.c.bf16 %v856_v57, %v852_v7  ;;  %v862_v60 = vld [vmem:[#allocation7 + $0x160] sm:$0xff]  ;;  %v860_v7 = vld [vmem:[#allocation7 + $0x150] sm:$0xff] }
 0x23d   :  { %11513 = vst [vmem:[#allocation108_spill] sm:$0xff] %v9917_v15  ;;  %11514 = vst [vmem:[#allocation109_spill] sm:$0xff] %v9919_v6  ;;  %v9933_v36 = vpack.c.bf16 %v862_v60, %v858_v24  ;;  %v864_v57 = vld [vmem:[#allocation7 + $0x170] sm:$0xff] }
 0x23e   :  { %6747 = vmatpush1.bf16.msra.mxu1 %v9909_v58  ;;  %6779 = vmatpush1.bf16.msra.mxu0 %v9912_v21  ;;  %11516 = vst [vmem:[#allocation111_spill] sm:$0xff] %v9924_v53  ;;  %v859_v58 = vld [vmem:[#allocation7 + $0x148] sm:$0xff]  ;;  %v861_v21 = vld [vmem:[#allocation7 + $0x158] sm:$0xff]  ;;  %v868_v24 = vld [vmem:[#allocation7 + $0x190] sm:$0xff] }
 0x23f   :  { %6749 = vmatprep.subr.bf16.mxu1 %v9917_v15  ;;  %6781 = vmatprep.subr.bf16.mxu0 %v9919_v6  ;;  %v9929_v27 = vpack.c.bf16 %v863_v18, %v859_v58  ;;  %v9931_v46 = vpack.c.bf16 %v865_v62, %v861_v21  ;;  %11519 = vst [vmem:[#allocation114_spill] sm:$0xff] %v9933_v36  ;;  %v867_v15 = vld [vmem:[#allocation7 + $0x188] sm:$0xff]  ;;  %v866_v21 = vld [vmem:[#allocation7 + $0x180] sm:$0xff] }
 0x240   :  { %v9936_v6 = vpack.c.bf16 %v864_v57, %v860_v7  ;;  %v9939_v18 = vpack.c.bf16 %v871_v12, %v867_v15  ;;  %v870_v62 = vld [vmem:[#allocation7 + $0x1a0] sm:$0xff]  ;;  %v872_v7 = vld [vmem:[#allocation7 + $0x1b0] sm:$0xff]  ;;  %v875_v57 = vld [vmem:[#allocation7 + $0x1c8] sm:$0xff] }
 0x241   :  { %11517 = vst [vmem:[#allocation112_spill] sm:$0xff] %v9929_v27  ;;  %11518 = vst [vmem:[#allocation113_spill] sm:$0xff] %v9931_v46  ;;  %v9945_v60 = vpack.c.bf16 %v870_v62, %v866_v21  ;;  %v9949_v12 = vpack.c.bf16 %v872_v7, %v868_v24  ;;  %v877_v15 = vld [vmem:[#allocation7 + $0x1d8] sm:$0xff]  ;;  %v880_v21 = vld [vmem:[#allocation7 + $0x1f0] sm:$0xff] }
 0x242   :  { %6751 = vmatpush1.bf16.msra.mxu1 %v9921_v8  ;;  %6783 = vmatpush1.bf16.msra.mxu0 %v9924_v53  ;;  %11520 = vst [vmem:[#allocation115_spill] sm:$0xff] %v9936_v6  ;;  %v869_v8 = vld [vmem:[#allocation7 + $0x198] sm:$0xff]  ;;  %11521 = vst [vmem:[#allocation116_spill] sm:$0xff] %v9939_v18 }
 0x243   :  { %6753 = vmatprep.subr.bf16.mxu1 %v9929_v27  ;;  %6785 = vmatprep.subr.bf16.mxu0 %v9931_v46  ;;  %v9941_v58 = vpack.c.bf16 %v873_v48, %v869_v8  ;;  %11523 = vst [vmem:[#allocation118_spill] sm:$0xff] %v9945_v60  ;;  %v879_v27 = vld [vmem:[#allocation7 + $0x1e8] sm:$0xff]  ;;  %11524 = vst [vmem:[#allocation119_spill] sm:$0xff] %v9949_v12  ;;  %v881_v8 = vld [vmem:[#allocation7 + $0x1f8] sm:$0xff] }
 0x244   :  { %v9951_v48 = vpack.c.bf16 %v879_v27, %v875_v57  ;;  %v874_v46 = vld [vmem:[#allocation7 + $0x1c0] sm:$0xff]  ;;  %v9953_v53 = vpack.c.bf16 %v881_v8, %v877_v15  ;;  %v11529_v27 = vlaneseq }
 0x245   :  { %11522 = vst [vmem:[#allocation117_spill] sm:$0xff] %v9941_v58 }
 0x246   :  { %6755 = vmatpush1.bf16.msra.mxu1 %v9933_v36  ;;  %6787 = vmatpush1.bf16.msra.mxu0 %v9936_v6  ;;  %11525 = vst [vmem:[#allocation120_spill] sm:$0xff] %v9951_v48  ;;  %11526 = vst [vmem:[#allocation121_spill] sm:$0xff] %v9953_v53  ;;  %v878_v36 = vld [vmem:[#allocation7 + $0x1e0] sm:$0xff]  ;;  %v876_v6 = vld [vmem:[#allocation7 + $0x1d0] sm:$0xff]  ;;  %v9968_v24 = vshrl.u32 %v11529_v27, 7 }
 0x247   :  { %6757 = vmatprep.subr.bf16.mxu1 %v9939_v18  ;;  %6789 = vmatprep.subr.bf16.mxu0 %v9941_v58  ;;  %v9957_v62 = vpack.c.bf16 %v878_v36, %v874_v46  ;;  %v9959_v18 = vpack.c.bf16 %v880_v21, %v876_v6  ;;  %v768_v6 = vld [vmem:[%s11201_s4] sm:$0xf] }
 0x248   :  { %v11382_v46 = vsub.s32 0, %v9968_v24  ;;  %v11383_v36 = vsub.s32 1, %v9968_v24  ;;  %v11390_v21 = vsub.s32 3, %v9968_v24 }
 0x249   :  { %11527 = vst [vmem:[#allocation122_spill] sm:$0xff] %v9957_v62  ;;  %11528 = vst [vmem:[#allocation123_spill] sm:$0xff] %v9959_v18 }
 0x24a   :  { %6759 = vmatpush1.bf16.msra.mxu1 %v9945_v60  ;;  %6791 = vmatpush1.bf16.msra.mxu0 %v9949_v12  ;;  %v9977_v7 = vrot.slane %v768_v6, %v11382_v46  ;;  %v9981_v57 = vrot.slane %v768_v6, %v11383_v36  ;;  %v9988_v46 = vrot.slane %v768_v6, %v11390_v21  ;;  %v11399_v36 = vsub.s32 2, %v9968_v24 }
 0x24b   :  { %6761 = vmatprep.subr.bf16.mxu1 %v9951_v48  ;;  %6793 = vmatprep.subr.bf16.mxu0 %v9953_v53 }
 0x24c   :  { %11530 = vst [vmem:[#allocation124_spill] sm:$0xff] %v9977_v7  ;;  %11531 = vst [vmem:[#allocation125_spill] sm:$0xff] %v9981_v57  ;;  %v9994_v12 = vrot.slane %v768_v6, %v11399_v36  ;;  %v11549_v36 = vld [vmem:[#allocation49_spill] sm:$0xff] }
 0x24d   :  { %11532 = vst [vmem:[#allocation126_spill] sm:$0xff] %v9988_v46 }
 0x24e   :  { %6763 = vmatpush1.bf16.msra.mxu1 %v9957_v62  ;;  %6795 = vmatpush1.bf16.msra.mxu0 %v9959_v18  ;;  %11533 = vst [vmem:[#allocation127_spill] sm:$0xff] %v9994_v12 }
 0x24f   :  { %6797 = vmatprep.subr.bf16.mxu1 %v9554_v26  ;;  %6829 = vmatprep.subr.bf16.mxu0 %v9579_v2 }
 0x2e4   :  { %v692_v15 = vpop.f32.mrb[0].mxu1  ;;  %v763_v8 = vpop.f32.mrb[8].mxu0 }
 0x2e5   :  { %v790_v27 = vadd.f32 %v9977_v7, %v692_v15  ;;  %v694_v2 = vpop.f32.mrb[1].mxu1  ;;  %v765_v26 = vpop.f32.mrb[9].mxu0  ;;  %v792_v60 = vadd.f32 %v9994_v12, %v763_v8 }
 0x2e6   :  { %v791_v18 = vadd.f32 %v9981_v57, %v694_v2  ;;  %v793_v48 = vadd.f32 %v9988_v46, %v765_v26 }
 0x2e7   :  { %v6129_v62 = vmul.f32 -1.442695, %v790_v27 }
 0x2e8   :  { %v6130_v53 = vmul.f32 -1.442695, %v791_v18  ;;  %v6131_v15 = vmul.f32 -1.442695, %v793_v48 }
 0x2e9   :  { %8793 = vpow2.f32 %v6129_v62 }
 0x2ea   :  { %8795 = vpow2.f32 %v6130_v53 }
 0x2eb   :  { %8797 = vpow2.f32 %v6131_v15  ;;  %v11540_v15 = vld [vmem:[#allocation31_spill] sm:$0xff] }
 0x2ec   :  { %8799 = vtanh.f32 %v792_v60  ;;  %v11535_v60 = vld [vmem:[#allocation42_spill] sm:$0xff] }
 0x2f3   :  { %v8794_v2 = vpop.eup %8793 }
 0x2f4   :  { %v8796_v27 = vpop.eup %8795  ;;  %v797_v18 = vadd.f32 1.0, %v8794_v2 }
 0x2f5   :  { %v803_v21 = vadd.f32 1.0, %v8796_v27  ;;  %v8798_v62 = vpop.eup %8797  ;;  %v11541_v27 = vld [vmem:[#allocation45_spill] sm:$0xff] }
 0x2f6   :  { %8801 = vrcp.f32 %v797_v18  ;;  %v8800_v58 = vpop.eup %8799  ;;  %v810_v46 = vadd.f32 1.0, %v8798_v62  ;;  %v11542_v18 = vld [vmem:[#allocation32_spill] sm:$0xff]  ;;  %v11543_v62 = vld [vmem:[#allocation46_spill] sm:$0xff] }
 0x2f7   :  { %8803 = vrcp.f32 %v803_v21  ;;  %v11539_v21 = vld [vmem:[#allocation44_spill] sm:$0xff] }
 0x2f8   :  { %8805 = vrcp.f32 %v810_v46  ;;  %v11536_v46 = vld [vmem:[#allocation29_spill] sm:$0xff] }
 0x300   :  { %v8802_v53 = vpop.eup %8801 }
 0x301   :  { %v8804_v57 = vpop.eup %8803  ;;  %v814_v26 = vmul.f32 %v8802_v53, %v8800_v58  ;;  %v11534_v58 = vld [vmem:[#allocation28_spill] sm:$0xff]  ;;  %v11544_v53 = vld [vmem:[#allocation33_spill] sm:$0xff] }
 0x302   :  { %v813_v7 = vmul.f32 0.0, %v8804_v57  ;;  %v8806_v48 = vpop.eup %8805  ;;  %v11538_v57 = vld [vmem:[#allocation30_spill] sm:$0xff] }
 0x304   :  { %v9997_v6 = vadd.f32 %v814_v26, %v813_v7  ;;  %v11537_v7 = vld [vmem:[#allocation43_spill] sm:$0xff] }
 0x305   :  { %v11545_v26 = vld [vmem:[#allocation47_spill] sm:$0xff] }
 0x306   :  { %8807 = vtanh.f32 %v9997_v6 }
 0x310   :  { %v8808_v8 = vpop.eup %8807 }
 0x311   :  { %v817_v2 = vmul.f32 %v8808_v8, %v8806_v48  ;;  %v11546_v48 = vld [vmem:[#allocation34_spill] sm:$0xff]  ;;  %v11547_v8 = vld [vmem:[#allocation48_spill] sm:$0xff] }
 0x313   :  { %1153 = vmatmul.mubr.f32.vlgmr.msra.gmra.mrb[2].mxu1 %v817_v2  ;;  %1224 = vmatmul.mubr.f32.vlgmr.msra.gmra.mrb[10].mxu0 %v817_v2 }
 0x314   :  { %6799 = vmatpush1.bf16.msra.mxu1 %v9557_v31  ;;  %6831 = vmatpush1.bf16.msra.mxu0 %v9657_v41 }
 0x315   :  { %6801 = vmatprep.subr.bf16.mxu1 %v9559_v34  ;;  %6833 = vmatprep.subr.bf16.mxu0 %v9659_v47 }
 0x316   :  { %1344 = vmatprep.mubr.f32.mxu1 %v11470_v5  ;;  %1415 = vmatprep.mubr.f32.mxu0 %v11470_v5 }
 0x318   :  { %6803 = vmatpush1.bf16.msra.mxu1 %v9562_v38  ;;  %6835 = vmatpush1.bf16.msra.mxu0 %v9662_v56 }
 0x319   :  { %6805 = vmatprep.subr.bf16.mxu1 %v9565_v43  ;;  %6837 = vmatprep.subr.bf16.mxu0 %v9665_v63 }
 0x31c   :  { %6807 = vmatpush1.bf16.msra.mxu1 %v9568_v50  ;;  %6839 = vmatpush1.bf16.msra.mxu0 %v9668_v11 }
 0x31d   :  { %6809 = vmatprep.subr.bf16.mxu1 %v9571_v52  ;;  %6841 = vmatprep.subr.bf16.mxu0 %v9671_v14 }
 0x320   :  { %6811 = vmatpush1.bf16.msra.mxu1 %v9574_v59  ;;  %6843 = vmatpush1.bf16.msra.mxu0 %v9674_v32 }
 0x321   :  { %6813 = vmatprep.subr.bf16.mxu1 %v9577_v61  ;;  %6845 = vmatprep.subr.bf16.mxu0 %v9677_v35 }
 0x324   :  { %6815 = vmatpush1.bf16.msra.mxu1 %v9582_v3  ;;  %6847 = vmatpush1.bf16.msra.mxu0 %v9680_v49 }
 0x325   :  { %6817 = vmatprep.subr.bf16.mxu1 %v9585_v4  ;;  %6849 = vmatprep.subr.bf16.mxu0 %v9684_v51 }
 0x328   :  { %6819 = vmatpush1.bf16.msra.mxu1 %v9589_v9  ;;  %6851 = vmatpush1.bf16.msra.mxu0 %v9687_v25 }
 0x329   :  { %6821 = vmatprep.subr.bf16.mxu1 %v9592_v10  ;;  %6853 = vmatprep.subr.bf16.mxu0 %v9690_v40 }
 0x32c   :  { %6823 = vmatpush1.bf16.msra.mxu1 %v9596_v16  ;;  %6855 = vmatpush1.bf16.msra.mxu0 %v9693_v19 }
 0x32d   :  { %6825 = vmatprep.subr.bf16.mxu1 %v9599_v17  ;;  %6857 = vmatprep.subr.bf16.mxu0 %v9696_v20 }
 0x330   :  { %6827 = vmatpush1.bf16.msra.mxu1 %v9602_v22  ;;  %6859 = vmatpush1.bf16.msra.mxu0 %v9699_v42 }
 0x331   :  { %6861 = vmatprep.subr.bf16.mxu1 %v9605_v23  ;;  %6893 = vmatprep.subr.bf16.mxu0 %v9702_v44 }
 0x333   :  { %1345 = vmatmul.mubr.f32.vlgmr.msra.gmra.mrb[4].mxu1 %v817_v2  ;;  %1416 = vmatmul.mubr.f32.vlgmr.msra.gmra.mrb[12].mxu0 %v817_v2  ;;  %v11548_v2 = vld [vmem:[#allocation35_spill] sm:$0xff] }
 0x334   :  { %6863 = vmatpush1.bf16.msra.mxu1 %v9608_v29  ;;  %6895 = vmatpush1.bf16.msra.mxu0 %v9705_v0 }
 0x335   :  { %6865 = vmatprep.subr.bf16.mxu1 %v9611_v30  ;;  %6897 = vmatprep.subr.bf16.mxu0 %v9708_v1 }
 0x336   :  { %1486 = vmatprep.mubr.f32.mxu1 %v11470_v5  ;;  %1557 = vmatprep.mubr.f32.mxu0 %v11470_v5 }
 0x338   :  { %6867 = vmatpush1.bf16.msra.mxu1 %v9615_v37  ;;  %6899 = vmatpush1.bf16.msra.mxu0 %v9712_v28 }
 0x339   :  { %6869 = vmatprep.subr.bf16.mxu1 %v9619_v39  ;;  %6901 = vmatprep.subr.bf16.mxu0 %v9716_v33 }
 0x33c   :  { %6871 = vmatpush1.bf16.msra.mxu1 %v11534_v58  ;;  %6903 = vmatpush1.bf16.msra.mxu0 %v11535_v60 }
 0x33d   :  { %6873 = vmatprep.subr.bf16.mxu1 %v11536_v46  ;;  %6905 = vmatprep.subr.bf16.mxu0 %v11537_v7 }
 0x340   :  { %6875 = vmatpush1.bf16.msra.mxu1 %v11538_v57  ;;  %6907 = vmatpush1.bf16.msra.mxu0 %v11539_v21  ;;  %v11550_v21 = vld [vmem:[#allocation36_spill] sm:$0xff] }
 0x341   :  { %6877 = vmatprep.subr.bf16.mxu1 %v11540_v15  ;;  %6909 = vmatprep.subr.bf16.mxu0 %v11541_v27  ;;  %v11551_v15 = vld [vmem:[#allocation50_spill] sm:$0xff]  ;;  %v11552_v27 = vld [vmem:[#allocation37_spill] sm:$0xff] }
 0x344   :  { %6879 = vmatpush1.bf16.msra.mxu1 %v11542_v18  ;;  %6911 = vmatpush1.bf16.msra.mxu0 %v11543_v62  ;;  %v11553_v18 = vld [vmem:[#allocation51_spill] sm:$0xff]  ;;  %v11554_v62 = vld [vmem:[#allocation38_spill] sm:$0xff] }
 0x345   :  { %6881 = vmatprep.subr.bf16.mxu1 %v11544_v53  ;;  %6913 = vmatprep.subr.bf16.mxu0 %v11545_v26  ;;  %v11555_v53 = vld [vmem:[#allocation52_spill] sm:$0xff]  ;;  %v11556_v26 = vld [vmem:[#allocation53_spill] sm:$0xff] }
 0x348   :  { %6883 = vmatpush1.bf16.msra.mxu1 %v11546_v48  ;;  %6915 = vmatpush1.bf16.msra.mxu0 %v11547_v8  ;;  %v11557_v48 = vld [vmem:[#allocation54_spill] sm:$0xff]  ;;  %v11558_v8 = vld [vmem:[#allocation57_spill] sm:$0xff] }
 0x349   :  { %6885 = vmatprep.subr.bf16.mxu1 %v11548_v2  ;;  %6917 = vmatprep.subr.bf16.mxu0 %v11549_v36  ;;  %v11559_v36 = vld [vmem:[#allocation55_spill] sm:$0xff] }
 0x34c   :  { %6887 = vmatpush1.bf16.msra.mxu1 %v11550_v21  ;;  %6919 = vmatpush1.bf16.msra.mxu0 %v11551_v15  ;;  %v11560_v21 = vld [vmem:[#allocation56_spill] sm:$0xff]  ;;  %v11561_v15 = vld [vmem:[#allocation58_spill] sm:$0xff] }
 0x34d   :  { %6889 = vmatprep.subr.bf16.mxu1 %v11552_v27  ;;  %6921 = vmatprep.subr.bf16.mxu0 %v11553_v18  ;;  %v11562_v27 = vld [vmem:[#allocation59_spill] sm:$0xff]  ;;  %v11591_v18 = vsub.s32 3, %v9968_v24 }
 0x350   :  { %6891 = vmatpush1.bf16.msra.mxu1 %v11554_v62  ;;  %6923 = vmatpush1.bf16.msra.mxu0 %v11555_v53  ;;  %v11563_v53 = vld [vmem:[#allocation60_spill] sm:$0xff] }
 0x351   :  { %6925 = vmatprep.subr.bf16.mxu1 %v11556_v26  ;;  %6957 = vmatprep.subr.bf16.mxu0 %v11557_v48  ;;  %v11564_v26 = vld [vmem:[#allocation61_spill] sm:$0xff]  ;;  %v11565_v48 = vld [vmem:[#allocation63_spill] sm:$0xff]  ;;  %v11566_v62 = vld [vmem:[#allocation64_spill] sm:$0xff] }
 0x353   :  { %1487 = vmatmul.mubr.f32.vlgmr.msra.gmra.mrb[4].mxu1 %v11558_v8  ;;  %1558 = vmatmul.mubr.f32.vlgmr.msra.gmra.mrb[12].mxu0 %v11558_v8  ;;  %v11567_v8 = vld [vmem:[#allocation66_spill] sm:$0xff] }
 0x354   :  { %6927 = vmatpush1.bf16.msra.mxu1 %v11559_v36  ;;  %6959 = vmatpush1.bf16.msra.mxu0 %v11560_v21 }
 0x355   :  { %6929 = vmatprep.subr.bf16.mxu1 %v11561_v15  ;;  %6961 = vmatprep.subr.bf16.mxu0 %v11562_v27  ;;  %v11568_v27 = vld [vmem:[#allocation73_spill] sm:$0xff]  ;;  %v11569_v15 = vld [vmem:[#allocation75_spill] sm:$0xff] }
 0x356   :  { %1656 = vmatprep.mubr.f32.mxu1 %v11470_v5  ;;  %1727 = vmatprep.mubr.f32.mxu0 %v11470_v5 }
 0x358   :  { %6931 = vmatpush1.bf16.msra.mxu1 %v11563_v53  ;;  %6963 = vmatpush1.bf16.msra.mxu0 %v11564_v26  ;;  %v11570_v53 = vld [vmem:[#allocation76_spill] sm:$0xff]  ;;  %v11571_v26 = vld [vmem:[#allocation78_spill] sm:$0xff] }
 0x359   :  { %6933 = vmatprep.subr.bf16.mxu1 %v11565_v48  ;;  %6965 = vmatprep.subr.bf16.mxu0 %v11566_v62  ;;  %v11572_v48 = vld [vmem:[#allocation79_spill] sm:$0xff]  ;;  %v11573_v62 = vld [vmem:[#allocation80_spill] sm:$0xff] }
 0x35c   :  { %6935 = vmatpush1.bf16.msra.mxu1 %v11567_v8  ;;  %6967 = vmatpush1.bf16.msra.mxu0 %v9791_v45  ;;  %v11574_v8 = vld [vmem:[#allocation81_spill] sm:$0xff]  ;;  %v11575_v45 = vld [vmem:[#allocation82_spill] sm:$0xff] }
 0x35d   :  { %6937 = vmatprep.subr.bf16.mxu1 %v9797_v54  ;;  %6969 = vmatprep.subr.bf16.mxu0 %v9799_v13  ;;  %v11576_v54 = vld [vmem:[#allocation83_spill] sm:$0xff]  ;;  %v11577_v13 = vld [vmem:[#allocation84_spill] sm:$0xff] }
 0x360   :  { %6939 = vmatpush1.bf16.msra.mxu1 %v9805_v55  ;;  %6971 = vmatpush1.bf16.msra.mxu0 %v11568_v27  ;;  %v11578_v55 = vld [vmem:[#allocation85_spill] sm:$0xff]  ;;  %v11579_v27 = vld [vmem:[#allocation86_spill] sm:$0xff] }
 0x361   :  { %6941 = vmatprep.subr.bf16.mxu1 %v11569_v15  ;;  %6973 = vmatprep.subr.bf16.mxu0 %v11570_v53  ;;  %v11580_v15 = vld [vmem:[#allocation87_spill] sm:$0xff]  ;;  %v11581_v53 = vld [vmem:[#allocation88_spill] sm:$0xff] }
 0x364   :  { %6943 = vmatpush1.bf16.msra.mxu1 %v11571_v26  ;;  %6975 = vmatpush1.bf16.msra.mxu0 %v11572_v48  ;;  %v11582_v26 = vld [vmem:[#allocation89_spill] sm:$0xff]  ;;  %v11583_v48 = vld [vmem:[#allocation90_spill] sm:$0xff] }
 0x365   :  { %6945 = vmatprep.subr.bf16.mxu1 %v11573_v62  ;;  %6977 = vmatprep.subr.bf16.mxu0 %v11574_v8  ;;  %v11584_v62 = vld [vmem:[#allocation91_spill] sm:$0xff]  ;;  %v11585_v8 = vld [vmem:[#allocation92_spill] sm:$0xff] }
 0x368   :  { %6947 = vmatpush1.bf16.msra.mxu1 %v11575_v45  ;;  %6979 = vmatpush1.bf16.msra.mxu0 %v11576_v54  ;;  %v11586_v45 = vld [vmem:[#allocation93_spill] sm:$0xff] }
 0x369   :  { %6949 = vmatprep.subr.bf16.mxu1 %v11577_v13  ;;  %6981 = vmatprep.subr.bf16.mxu0 %v11578_v55  ;;  %v1230_v55 = vld [vmem:[%s11204_s7] sm:$0xf] }
 0x36a   :  { %v10119_v2 = vrot.slane %v1230_v55, %v11591_v18 }
 0x36c   :  { %6951 = vmatpush1.bf16.msra.mxu1 %v11579_v27  ;;  %6983 = vmatpush1.bf16.msra.mxu0 %v11580_v15  ;;  %v11587_v27 = vsub.s32 0, %v9968_v24  ;;  %11592 = vst [vmem:[#allocation129_spill] sm:$0xff] %v10119_v2 }
 0x36d   :  { %6953 = vmatprep.subr.bf16.mxu1 %v11581_v53  ;;  %6985 = vmatprep.subr.bf16.mxu0 %v11582_v26  ;;  %v11589_v53 = vsub.s32 1, %v9968_v24 }
 0x36e   :  { %v10109_v13 = vrot.slane %v1230_v55, %v11587_v27 }
 0x36f   :  { %v10113_v15 = vrot.slane %v1230_v55, %v11589_v53  ;;  %v11593_v53 = vsub.s32 2, %v9968_v24 }
 0x370   :  { %6955 = vmatpush1.bf16.msra.mxu1 %v11583_v48  ;;  %6987 = vmatpush1.bf16.msra.mxu0 %v11584_v62  ;;  %11588 = vst [vmem:[#allocation57_spill] sm:$0xff] %v10109_v13 }
 0x371   :  { %6989 = vmatprep.subr.bf16.mxu1 %v11585_v8  ;;  %7021 = vmatprep.subr.bf16.mxu0 %v11586_v45  ;;  %11590 = vst [vmem:[#allocation128_spill] sm:$0xff] %v10113_v15  ;;  %v10124_v57 = vrot.slane %v1230_v55, %v11593_v53  ;;  %v11597_v53 = vld [vmem:[#allocation96_spill] sm:$0xff] }
 0x3e6   :  { %v1154_v26 = vpop.f32.mrb[2].mxu1  ;;  %v1225_v48 = vpop.f32.mrb[10].mxu0 }
 0x3e7   :  { %v1252_v62 = vadd.f32 %v10109_v13, %v1154_v26  ;;  %v1156_v54 = vpop.f32.mrb[3].mxu1  ;;  %v1227_v8 = vpop.f32.mrb[11].mxu0  ;;  %v1254_v26 = vadd.f32 %v10124_v57, %v1225_v48 }
 0x3e8   :  { %v1253_v45 = vadd.f32 %v10113_v15, %v1156_v54  ;;  %v1255_v27 = vadd.f32 %v10119_v2, %v1227_v8 }
 0x3e9   :  { %v6132_v21 = vmul.f32 -1.442695, %v1252_v62 }
 0x3ea   :  { %v6133_v36 = vmul.f32 -1.442695, %v1253_v45  ;;  %v6134_v7 = vmul.f32 -1.442695, %v1255_v27 }
 0x3eb   :  { %8809 = vpow2.f32 %v6132_v21 }
 0x3ec   :  { %8811 = vpow2.f32 %v6133_v36 }
 0x3ed   :  { %8813 = vpow2.f32 %v6134_v7  ;;  %v11596_v7 = vld [vmem:[#allocation95_spill] sm:$0xff] }
 0x3ee   :  { %8815 = vtanh.f32 %v1254_v26  ;;  %v11598_v26 = vld [vmem:[#allocation97_spill] sm:$0xff] }
 0x3f5   :  { %v8810_v13 = vpop.eup %8809 }
 0x3f6   :  { %v8812_v46 = vpop.eup %8811  ;;  %v1259_v54 = vadd.f32 1.0, %v8810_v13 }
 0x3f7   :  { %v1265_v45 = vadd.f32 1.0, %v8812_v46  ;;  %v8814_v18 = vpop.eup %8813  ;;  %v11595_v46 = vld [vmem:[#allocation94_spill] sm:$0xff] }
 0x3f8   :  { %8817 = vrcp.f32 %v1259_v54  ;;  %v8816_v21 = vpop.eup %8815  ;;  %v1272_v2 = vadd.f32 1.0, %v8814_v18  ;;  %v11600_v54 = vld [vmem:[#allocation99_spill] sm:$0xff]  ;;  %v11602_v18 = vld [vmem:[#allocation101_spill] sm:$0xff] }
 0x3f9   :  { %8819 = vrcp.f32 %v1265_v45  ;;  %v11601_v45 = vld [vmem:[#allocation100_spill] sm:$0xff] }
 0x3fa   :  { %8821 = vrcp.f32 %v1272_v2  ;;  %v11599_v2 = vld [vmem:[#allocation98_spill] sm:$0xff] }
 0x402   :  { %v8818_v36 = vpop.eup %8817 }
 0x403   :  { %v8820_v62 = vpop.eup %8819  ;;  %v1276_v8 = vmul.f32 %v8818_v36, %v8816_v21  ;;  %v11603_v21 = vld [vmem:[#allocation102_spill] sm:$0xff]  ;;  %v11604_v36 = vld [vmem:[#allocation103_spill] sm:$0xff] }
 0x404   :  { %v1275_v24 = vmul.f32 0.0, %v8820_v62  ;;  %v8822_v48 = vpop.eup %8821  ;;  %v11605_v62 = vld [vmem:[#allocation104_spill] sm:$0xff] }
 0x406   :  { %v10127_v55 = vadd.f32 %v1276_v8, %v1275_v24  ;;  %v11606_v8 = vld [vmem:[#allocation105_spill] sm:$0xff]  ;;  %v11607_v24 = vld [vmem:[#allocation106_spill] sm:$0xff] }
 0x408   :  { %11594 = vst [vmem:[#allocation130_spill] sm:$0xff] %v10127_v55  ;;  %8823 = vtanh.f32 %v10127_v55  ;;  %v11622_v55 = vld [vmem:[#allocation118_spill] sm:$0xff] }
 0x412   :  { %v8824_v27 = vpop.eup %8823 }
 0x413   :  { %v1279_v13 = vmul.f32 %v8824_v27, %v8822_v48  ;;  %v11608_v48 = vld [vmem:[#allocation107_spill] sm:$0xff]  ;;  %v11609_v27 = vld [vmem:[#allocation108_spill] sm:$0xff] }
 0x415   :  { %1657 = vmatmul.mubr.f32.vlgmr.msra.gmra.mrb[6].mxu1 %v1279_v13  ;;  %1728 = vmatmul.mubr.f32.vlgmr.msra.gmra.mrb[14].mxu0 %v1279_v13  ;;  %v11610_v13 = vld [vmem:[#allocation109_spill] sm:$0xff] }
 0x416   :  { %6991 = vmatpush1.bf16.msra.mxu1 %v11595_v46  ;;  %7023 = vmatpush1.bf16.msra.mxu0 %v11596_v7  ;;  %v11617_v46 = vld [vmem:[#allocation114_spill] sm:$0xff] }
 0x417   :  { %6993 = vmatprep.subr.bf16.mxu1 %v11597_v53  ;;  %7025 = vmatprep.subr.bf16.mxu0 %v11598_v26  ;;  %v11614_v53 = vld [vmem:[#allocation112_spill] sm:$0xff] }
 0x418   :  { %1798 = vmatprep.mubr.f32.mxu1 %v11470_v5  ;;  %1869 = vmatprep.mubr.f32.mxu0 %v11470_v5 }
 0x41a   :  { %6995 = vmatpush1.bf16.msra.mxu1 %v11599_v2  ;;  %7027 = vmatpush1.bf16.msra.mxu0 %v11600_v54  ;;  %v11611_v2 = vld [vmem:[#allocation110_spill] sm:$0xff] }
 0x41b   :  { %6997 = vmatprep.subr.bf16.mxu1 %v11601_v45  ;;  %7029 = vmatprep.subr.bf16.mxu0 %v11602_v18  ;;  %v11612_v18 = vld [vmem:[#allocation111_spill] sm:$0xff] }
 0x41e   :  { %6999 = vmatpush1.bf16.msra.mxu1 %v11603_v21  ;;  %7031 = vmatpush1.bf16.msra.mxu0 %v11604_v36  ;;  %v11613_v21 = vld [vmem:[#allocation124_spill] sm:$0xff] }
 0x41f   :  { %7001 = vmatprep.subr.bf16.mxu1 %v11605_v62  ;;  %7033 = vmatprep.subr.bf16.mxu0 %v11606_v8  ;;  %v11615_v8 = vld [vmem:[#allocation113_spill] sm:$0xff] }
 0x422   :  { %7003 = vmatpush1.bf16.msra.mxu1 %v11607_v24  ;;  %7035 = vmatpush1.bf16.msra.mxu0 %v11608_v48  ;;  %v11616_v24 = vld [vmem:[#allocation125_spill] sm:$0xff] }
 0x423   :  { %7005 = vmatprep.subr.bf16.mxu1 %v11609_v27  ;;  %7037 = vmatprep.subr.bf16.mxu0 %v11610_v13  ;;  %v11618_v13 = vld [vmem:[#allocation115_spill] sm:$0xff] }
 0x426   :  { %v1488_v54 = vpop.f32.mrb[4].mxu1  ;;  %v1559_v45 = vpop.f32.mrb[12].mxu0  ;;  %7007 = vmatpush1.bf16.msra.mxu1 %v11611_v2  ;;  %7039 = vmatpush1.bf16.msra.mxu0 %v11612_v18  ;;  %v11619_v2 = vld [vmem:[#allocation116_spill] sm:$0xff]  ;;  %v11620_v18 = vld [vmem:[#allocation117_spill] sm:$0xff] }
 0x427   :  { %v1564_v36 = vadd.f32 %v1488_v54, %v11613_v21  ;;  %v1490_v26 = vpop.f32.mrb[5].mxu1  ;;  %v1561_v62 = vpop.f32.mrb[13].mxu0  ;;  %7009 = vmatprep.subr.bf16.mxu1 %v11614_v53  ;;  %7041 = vmatprep.subr.bf16.mxu0 %v11615_v8  ;;  %v11621_v54 = vld [vmem:[#allocation126_spill] sm:$0xff]  ;;  %v11623_v53 = vld [vmem:[#allocation119_spill] sm:$0xff]  ;;  %v11624_v8 = vld [vmem:[#allocation120_spill] sm:$0xff] }
 0x428   :  { %v1565_v48 = vadd.f32 %v1490_v26, %v11616_v24  ;;  %v1567_v21 = vadd.f32 %v1561_v62, %v11621_v54  ;;  %v11625_v26 = vld [vmem:[#allocation121_spill] sm:$0xff] }
 0x429   :  { %v6135_v7 = vmul.f32 -1.442695, %v1564_v36 }
 0x42a   :  { %v6136_v27 = vmul.f32 -1.442695, %v1565_v48  ;;  %7011 = vmatpush1.bf16.msra.mxu1 %v11617_v46  ;;  %7043 = vmatpush1.bf16.msra.mxu0 %v11618_v13  ;;  %v6137_v36 = vmul.f32 -1.442695, %v1567_v21  ;;  %v11626_v48 = vld [vmem:[#allocation122_spill] sm:$0xff]  ;;  %v11627_v13 = vld [vmem:[#allocation123_spill] sm:$0xff] }
 0x42b   :  { %8825 = vpow2.f32 %v6135_v7  ;;  %7013 = vmatprep.subr.bf16.mxu1 %v11619_v2  ;;  %7045 = vmatprep.subr.bf16.mxu0 %v11620_v18  ;;  %v1566_v7 = vadd.f32 %v1559_v45, %v9994_v12  ;;  %v11628_v2 = vld [vmem:[#allocation24_spill] sm:$0xff] }
 0x42c   :  { %8827 = vpow2.f32 %v6136_v27  ;;  %v11629_v27 = vld [vmem:[#allocation25_spill] sm:$0xff] }
 0x42d   :  { %8829 = vpow2.f32 %v6137_v36 }
 0x42e   :  { %7015 = vmatpush1.bf16.msra.mxu1 %v11622_v55  ;;  %7047 = vmatpush1.bf16.msra.mxu0 %v11623_v53  ;;  %8831 = vtanh.f32 %v1566_v7  ;;  %v11639_v7 = vld [vmem:[#allocation47_spill] sm:$0xff] }
 0x42f   :  { %7017 = vmatprep.subr.bf16.mxu1 %v11624_v8  ;;  %7049 = vmatprep.subr.bf16.mxu0 %v11625_v26 }
 0x432   :  { %7019 = vmatpush1.bf16.msra.mxu1 %v11626_v48  ;;  %7051 = vmatpush1.bf16.msra.mxu0 %v11627_v13 }
 0x433   :  { %7053 = vmatprep.subr.bf16.mxu1 %v11628_v2  ;;  %7085 = vmatprep.subr.bf16.mxu0 %v11629_v27 }
 0x435   :  { %v8826_v62 = vpop.eup %8825 }
 0x436   :  { %v8828_v54 = vpop.eup %8827  ;;  %v1571_v55 = vadd.f32 1.0, %v8826_v62 }
 0x437   :  { %v1577_v53 = vadd.f32 1.0, %v8828_v54  ;;  %v8830_v26 = vpop.eup %8829  ;;  %v11636_v54 = vld [vmem:[#allocation32_spill] sm:$0xff] }
 0x438   :  { %8833 = vrcp.f32 %v1571_v55  ;;  %v8832_v21 = vpop.eup %8831  ;;  %v1584_v13 = vadd.f32 1.0, %v8830_v26  ;;  %v11631_v55 = vld [vmem:[#allocation43_spill] sm:$0xff]  ;;  %v11637_v26 = vld [vmem:[#allocation46_spill] sm:$0xff] }
 0x439   :  { %8835 = vrcp.f32 %v1577_v53  ;;  %v11632_v53 = vld [vmem:[#allocation30_spill] sm:$0xff] }
 0x43a   :  { %8837 = vrcp.f32 %v1584_v13  ;;  %v11635_v13 = vld [vmem:[#allocation45_spill] sm:$0xff] }
 0x442   :  { %v8834_v8 = vpop.eup %8833 }
 0x443   :  { %v8836_v48 = vpop.eup %8835  ;;  %v1588_v18 = vmul.f32 %v8834_v8, %v8832_v21  ;;  %v11634_v8 = vld [vmem:[#allocation31_spill] sm:$0xff]  ;;  %v11641_v21 = vld [vmem:[#allocation48_spill] sm:$0xff] }
 0x444   :  { %v1587_v45 = vmul.f32 %v8836_v48, %v9997_v6  ;;  %v8838_v27 = vpop.eup %8837  ;;  %v11630_v6 = vld [vmem:[#allocation29_spill] sm:$0xff] }
 0x445   :  { %v11638_v48 = vld [vmem:[#allocation33_spill] sm:$0xff] }
 0x446   :  { %v10169_v12 = vadd.f32 %v1588_v18, %v1587_v45  ;;  %v11633_v18 = vld [vmem:[#allocation44_spill] sm:$0xff]  ;;  %v11642_v45 = vld [vmem:[#allocation35_spill] sm:$0xff] }
 0x448   :  { %8839 = vtanh.f32 %v10169_v12 }
 0x452   :  { %v8840_v62 = vpop.eup %8839 }
 0x453   :  { %v1591_v36 = vmul.f32 %v8840_v62, %v8838_v27  ;;  %v11640_v27 = vld [vmem:[#allocation34_spill] sm:$0xff]  ;;  %v11643_v62 = vld [vmem:[#allocation49_spill] sm:$0xff] }
 0x455   :  { %1799 = vmatmul.mubr.f32.vlgmr.msra.gmra.mrb[6].mxu1 %v1591_v36  ;;  %1870 = vmatmul.mubr.f32.vlgmr.msra.gmra.mrb[14].mxu0 %v1591_v36 }
 0x456   :  { %7055 = vmatpush1.bf16.msra.mxu1 %v9557_v31  ;;  %7087 = vmatpush1.bf16.msra.mxu0 %v9657_v41 }
 0x457   :  { %7057 = vmatprep.subr.bf16.mxu1 %v9559_v34  ;;  %7089 = vmatprep.subr.bf16.mxu0 %v9659_v47 }
 0x458   :  { %1968 = vmatprep.mubr.f32.mxu1 %v11470_v5  ;;  %2039 = vmatprep.mubr.f32.mxu0 %v11470_v5 }
 0x45a   :  { %7059 = vmatpush1.bf16.msra.mxu1 %v9562_v38  ;;  %7091 = vmatpush1.bf16.msra.mxu0 %v9662_v56 }
 0x45b   :  { %7061 = vmatprep.subr.bf16.mxu1 %v9565_v43  ;;  %7093 = vmatprep.subr.bf16.mxu0 %v9665_v63 }
 0x45e   :  { %7063 = vmatpush1.bf16.msra.mxu1 %v9568_v50  ;;  %7095 = vmatpush1.bf16.msra.mxu0 %v9668_v11 }
 0x45f   :  { %7065 = vmatprep.subr.bf16.mxu1 %v9571_v52  ;;  %7097 = vmatprep.subr.bf16.mxu0 %v9671_v14 }
 0x462   :  { %7067 = vmatpush1.bf16.msra.mxu1 %v9574_v59  ;;  %7099 = vmatpush1.bf16.msra.mxu0 %v9674_v32 }
 0x463   :  { %7069 = vmatprep.subr.bf16.mxu1 %v9577_v61  ;;  %7101 = vmatprep.subr.bf16.mxu0 %v9677_v35 }
 0x466   :  { %7071 = vmatpush1.bf16.msra.mxu1 %v9582_v3  ;;  %7103 = vmatpush1.bf16.msra.mxu0 %v9680_v49 }
 0x467   :  { %7073 = vmatprep.subr.bf16.mxu1 %v9585_v4  ;;  %7105 = vmatprep.subr.bf16.mxu0 %v9684_v51 }
 0x46a   :  { %7075 = vmatpush1.bf16.msra.mxu1 %v9589_v9  ;;  %7107 = vmatpush1.bf16.msra.mxu0 %v9687_v25 }
 0x46b   :  { %7077 = vmatprep.subr.bf16.mxu1 %v9592_v10  ;;  %7109 = vmatprep.subr.bf16.mxu0 %v9690_v40 }
 0x46e   :  { %7079 = vmatpush1.bf16.msra.mxu1 %v9596_v16  ;;  %7111 = vmatpush1.bf16.msra.mxu0 %v9693_v19 }
 0x46f   :  { %7081 = vmatprep.subr.bf16.mxu1 %v9599_v17  ;;  %7113 = vmatprep.subr.bf16.mxu0 %v9696_v20 }
 0x472   :  { %7083 = vmatpush1.bf16.msra.mxu1 %v9602_v22  ;;  %7115 = vmatpush1.bf16.msra.mxu0 %v9699_v42 }
 0x473   :  { %7117 = vmatprep.subr.bf16.mxu1 %v9605_v23  ;;  %7149 = vmatprep.subr.bf16.mxu0 %v9702_v44 }
 0x475   :  { %1969 = vmatmul.mubr.f32.vlgmr.msra.gmra.mrb[8].mxu1 %v1591_v36  ;;  %2040 = vmatmul.mubr.f32.vlgmr.msra.gmra.mrb[16].mxu0 %v1591_v36  ;;  %v11644_v36 = vld [vmem:[#allocation36_spill] sm:$0xff] }
 0x476   :  { %7119 = vmatpush1.bf16.msra.mxu1 %v9608_v29  ;;  %7151 = vmatpush1.bf16.msra.mxu0 %v9705_v0 }
 0x477   :  { %7121 = vmatprep.subr.bf16.mxu1 %v9611_v30  ;;  %7153 = vmatprep.subr.bf16.mxu0 %v9708_v1 }
 0x478   :  { %2110 = vmatprep.mubr.f32.mxu1 %v11470_v5  ;;  %2181 = vmatprep.mubr.f32.mxu0 %v11470_v5 }
 0x47a   :  { %7123 = vmatpush1.bf16.msra.mxu1 %v9615_v37  ;;  %7155 = vmatpush1.bf16.msra.mxu0 %v9712_v28 }
 0x47b   :  { %7125 = vmatprep.subr.bf16.mxu1 %v9619_v39  ;;  %7157 = vmatprep.subr.bf16.mxu0 %v9716_v33 }
 0x47e   :  { %7127 = vmatpush1.bf16.msra.mxu1 %v11534_v58  ;;  %7159 = vmatpush1.bf16.msra.mxu0 %v11535_v60 }
 0x47f   :  { %7129 = vmatprep.subr.bf16.mxu1 %v11630_v6  ;;  %7161 = vmatprep.subr.bf16.mxu0 %v11631_v55 }
 0x482   :  { %7131 = vmatpush1.bf16.msra.mxu1 %v11632_v53  ;;  %7163 = vmatpush1.bf16.msra.mxu0 %v11633_v18  ;;  %v11685_v18 = vld [vmem:[#allocation57_spill] sm:$0xff] }
 0x483   :  { %7133 = vmatprep.subr.bf16.mxu1 %v11634_v8  ;;  %7165 = vmatprep.subr.bf16.mxu0 %v11635_v13  ;;  %v11645_v8 = vld [vmem:[#allocation50_spill] sm:$0xff]  ;;  %v11646_v13 = vld [vmem:[#allocation37_spill] sm:$0xff] }
 0x486   :  { %7135 = vmatpush1.bf16.msra.mxu1 %v11636_v54  ;;  %7167 = vmatpush1.bf16.msra.mxu0 %v11637_v26  ;;  %v11647_v54 = vld [vmem:[#allocation51_spill] sm:$0xff]  ;;  %v11648_v26 = vld [vmem:[#allocation38_spill] sm:$0xff] }
 0x487   :  { %7137 = vmatprep.subr.bf16.mxu1 %v11638_v48  ;;  %7169 = vmatprep.subr.bf16.mxu0 %v11639_v7  ;;  %v11649_v48 = vld [vmem:[#allocation52_spill] sm:$0xff]  ;;  %v11650_v7 = vld [vmem:[#allocation53_spill] sm:$0xff] }
 0x48a   :  { %7139 = vmatpush1.bf16.msra.mxu1 %v11640_v27  ;;  %7171 = vmatpush1.bf16.msra.mxu0 %v11641_v21  ;;  %v11651_v27 = vld [vmem:[#allocation54_spill] sm:$0xff]  ;;  %v11652_v21 = vld [vmem:[#allocation65_spill] sm:$0xff] }
 0x48b   :  { %7141 = vmatprep.subr.bf16.mxu1 %v11642_v45  ;;  %7173 = vmatprep.subr.bf16.mxu0 %v11643_v62  ;;  %v11653_v62 = vld [vmem:[#allocation55_spill] sm:$0xff] }
 0x48c   :  { %v11667_v45 = vld [vmem:[#allocation75_spill] sm:$0xff] }
 0x48e   :  { %7143 = vmatpush1.bf16.msra.mxu1 %v11644_v36  ;;  %7175 = vmatpush1.bf16.msra.mxu0 %v11645_v8  ;;  %v11654_v36 = vld [vmem:[#allocation56_spill] sm:$0xff]  ;;  %v11655_v8 = vld [vmem:[#allocation58_spill] sm:$0xff] }
 0x48f   :  { %7145 = vmatprep.subr.bf16.mxu1 %v11646_v13  ;;  %7177 = vmatprep.subr.bf16.mxu0 %v11647_v54  ;;  %v11656_v13 = vld [vmem:[#allocation59_spill] sm:$0xff]  ;;  %v11666_v54 = vld [vmem:[#allocation73_spill] sm:$0xff] }
 0x492   :  { %7147 = vmatpush1.bf16.msra.mxu1 %v11648_v26  ;;  %7179 = vmatpush1.bf16.msra.mxu0 %v11649_v48  ;;  %v11657_v48 = vld [vmem:[#allocation60_spill] sm:$0xff] }
 0x493   :  { %7181 = vmatprep.subr.bf16.mxu1 %v11650_v7  ;;  %7213 = vmatprep.subr.bf16.mxu0 %v11651_v27  ;;  %v11658_v7 = vld [vmem:[#allocation61_spill] sm:$0xff]  ;;  %v11659_v27 = vld [vmem:[#allocation63_spill] sm:$0xff]  ;;  %v11660_v26 = vld [vmem:[#allocation64_spill] sm:$0xff] }
 0x495   :  { %2111 = vmatmul.mubr.f32.vlgmr.msra.gmra.mrb[8].mxu1 %v11652_v21  ;;  %2182 = vmatmul.mubr.f32.vlgmr.msra.gmra.mrb[16].mxu0 %v11652_v21  ;;  %v11661_v21 = vld [vmem:[#allocation66_spill] sm:$0xff] }
 0x496   :  { %7183 = vmatpush1.bf16.msra.mxu1 %v11653_v62  ;;  %7215 = vmatpush1.bf16.msra.mxu0 %v11654_v36  ;;  %v11662_v62 = vld [vmem:[#allocation67_spill] sm:$0xff]  ;;  %v11663_v36 = vld [vmem:[#allocation69_spill] sm:$0xff] }
 0x497   :  { %7185 = vmatprep.subr.bf16.mxu1 %v11655_v8  ;;  %7217 = vmatprep.subr.bf16.mxu0 %v11656_v13  ;;  %v11664_v8 = vld [vmem:[#allocation70_spill] sm:$0xff]  ;;  %v11665_v13 = vld [vmem:[#allocation72_spill] sm:$0xff] }
 0x498   :  { %2280 = vmatprep.mubr.f32.mxu1 %v11470_v5  ;;  %2351 = vmatprep.mubr.f32.mxu0 %v11470_v5 }
 0x49a   :  { %7187 = vmatpush1.bf16.msra.mxu1 %v11657_v48  ;;  %7219 = vmatpush1.bf16.msra.mxu0 %v11658_v7  ;;  %v11668_v48 = vld [vmem:[#allocation76_spill] sm:$0xff]  ;;  %v11669_v7 = vld [vmem:[#allocation78_spill] sm:$0xff] }
 0x49b   :  { %7189 = vmatprep.subr.bf16.mxu1 %v11659_v27  ;;  %7221 = vmatprep.subr.bf16.mxu0 %v11660_v26  ;;  %v11670_v27 = vld [vmem:[#allocation79_spill] sm:$0xff]  ;;  %v11671_v26 = vld [vmem:[#allocation80_spill] sm:$0xff] }
 0x49e   :  { %7191 = vmatpush1.bf16.msra.mxu1 %v11661_v21  ;;  %7223 = vmatpush1.bf16.msra.mxu0 %v11662_v62  ;;  %v11672_v21 = vld [vmem:[#allocation81_spill] sm:$0xff]  ;;  %v11673_v62 = vld [vmem:[#allocation82_spill] sm:$0xff] }
 0x49f   :  { %7193 = vmatprep.subr.bf16.mxu1 %v11663_v36  ;;  %7225 = vmatprep.subr.bf16.mxu0 %v11664_v8  ;;  %v11674_v36 = vld [vmem:[#allocation83_spill] sm:$0xff]  ;;  %v11675_v8 = vld [vmem:[#allocation84_spill] sm:$0xff] }
 0x4a2   :  { %7195 = vmatpush1.bf16.msra.mxu1 %v11665_v13  ;;  %7227 = vmatpush1.bf16.msra.mxu0 %v11666_v54  ;;  %v11676_v13 = vld [vmem:[#allocation85_spill] sm:$0xff]  ;;  %v11677_v54 = vld [vmem:[#allocation86_spill] sm:$0xff] }
 0x4a3   :  { %7197 = vmatprep.subr.bf16.mxu1 %v11667_v45  ;;  %7229 = vmatprep.subr.bf16.mxu0 %v11668_v48  ;;  %v11678_v45 = vld [vmem:[#allocation87_spill] sm:$0xff]  ;;  %v11679_v48 = vld [vmem:[#allocation88_spill] sm:$0xff] }
 0x4a6   :  { %7199 = vmatpush1.bf16.msra.mxu1 %v11669_v7  ;;  %7231 = vmatpush1.bf16.msra.mxu0 %v11670_v27  ;;  %v11680_v7 = vld [vmem:[#allocation89_spill] sm:$0xff]  ;;  %v11681_v27 = vld [vmem:[#allocation90_spill] sm:$0xff] }
 0x4a7   :  { %7201 = vmatprep.subr.bf16.mxu1 %v11671_v26  ;;  %7233 = vmatprep.subr.bf16.mxu0 %v11672_v21  ;;  %v11682_v26 = vld [vmem:[#allocation91_spill] sm:$0xff]  ;;  %v11683_v21 = vld [vmem:[#allocation92_spill] sm:$0xff] }
 0x4aa   :  { %7203 = vmatpush1.bf16.msra.mxu1 %v11673_v62  ;;  %7235 = vmatpush1.bf16.msra.mxu0 %v11674_v36  ;;  %v11684_v62 = vld [vmem:[#allocation93_spill] sm:$0xff] }
 0x4ab   :  { %7205 = vmatprep.subr.bf16.mxu1 %v11675_v8  ;;  %7237 = vmatprep.subr.bf16.mxu0 %v11676_v13 }
 0x4ae   :  { %7207 = vmatpush1.bf16.msra.mxu1 %v11677_v54  ;;  %7239 = vmatpush1.bf16.msra.mxu0 %v11678_v45 }
 0x4af   :  { %7209 = vmatprep.subr.bf16.mxu1 %v11679_v48  ;;  %7241 = vmatprep.subr.bf16.mxu0 %v11680_v7  ;;  %v11686_v7 = vld [vmem:[#allocation129_spill] sm:$0xff] }
 0x4b2   :  { %7211 = vmatpush1.bf16.msra.mxu1 %v11681_v27  ;;  %7243 = vmatpush1.bf16.msra.mxu0 %v11682_v26 }
 0x4b3   :  { %7245 = vmatprep.subr.bf16.mxu1 %v11683_v21  ;;  %7277 = vmatprep.subr.bf16.mxu0 %v11684_v62 }
 0x528   :  { %v1800_v36 = vpop.f32.mrb[6].mxu1  ;;  %v1871_v8 = vpop.f32.mrb[14].mxu0 }
 0x529   :  { %v1876_v13 = vadd.f32 %v1800_v36, %v11685_v18  ;;  %v1802_v53 = vpop.f32.mrb[7].mxu1  ;;  %v1873_v54 = vpop.f32.mrb[15].mxu0  ;;  %v1878_v26 = vadd.f32 %v1871_v8, %v10124_v57 }
 0x52a   :  { %v1877_v45 = vadd.f32 %v1802_v53, %v10113_v15  ;;  %v1879_v27 = vadd.f32 %v1873_v54, %v11686_v7 }
 0x52b   :  { %v6138_v55 = vmul.f32 -1.442695, %v1876_v13 }
 0x52c   :  { %v6139_v48 = vmul.f32 -1.442695, %v1877_v45  ;;  %v6140_v6 = vmul.f32 -1.442695, %v1879_v27 }
 0x52d   :  { %8841 = vpow2.f32 %v6138_v55 }
 0x52e   :  { %8843 = vpow2.f32 %v6139_v48  ;;  %v11687_v48 = vld [vmem:[#allocation130_spill] sm:$0xff] }
 0x52f   :  { %8845 = vpow2.f32 %v6140_v6 }
 0x530   :  { %8847 = vtanh.f32 %v1878_v26  ;;  %v11690_v26 = vld [vmem:[#allocation96_spill] sm:$0xff] }
 0x537   :  { %v8842_v21 = vpop.eup %8841 }
 0x538   :  { %v8844_v60 = vpop.eup %8843  ;;  %v1883_v62 = vadd.f32 1.0, %v8842_v21  ;;  %v11694_v21 = vld [vmem:[#allocation100_spill] sm:$0xff] }
 0x539   :  { %v1889_v58 = vadd.f32 1.0, %v8844_v60  ;;  %v8846_v36 = vpop.eup %8845  ;;  %v11688_v60 = vld [vmem:[#allocation94_spill] sm:$0xff] }
 0x53a   :  { %8849 = vrcp.f32 %v1883_v62  ;;  %v8848_v18 = vpop.eup %8847  ;;  %v1896_v55 = vadd.f32 1.0, %v8846_v36  ;;  %v11693_v62 = vld [vmem:[#allocation99_spill] sm:$0xff]  ;;  %v11695_v36 = vld [vmem:[#allocation101_spill] sm:$0xff] }
 0x53b   :  { %8851 = vrcp.f32 %v1889_v58  ;;  %v11689_v58 = vld [vmem:[#allocation95_spill] sm:$0xff] }
 0x53c   :  { %8853 = vrcp.f32 %v1896_v55  ;;  %v11699_v55 = vld [vmem:[#allocation105_spill] sm:$0xff] }
 0x544   :  { %v8850_v53 = vpop.eup %8849 }
 0x545   :  { %v8852_v13 = vpop.eup %8851  ;;  %v1900_v45 = vmul.f32 %v8850_v53, %v8848_v18  ;;  %v11691_v18 = vld [vmem:[#allocation97_spill] sm:$0xff]  ;;  %v11696_v53 = vld [vmem:[#allocation102_spill] sm:$0xff] }
 0x546   :  { %v1899_v15 = vmul.f32 %v8852_v13, %v11687_v48  ;;  %v8854_v8 = vpop.eup %8853  ;;  %v11697_v13 = vld [vmem:[#allocation103_spill] sm:$0xff]  ;;  %v11700_v48 = vld [vmem:[#allocation106_spill] sm:$0xff] }
 0x548   :  { %v10281_v54 = vadd.f32 %v1900_v45, %v1899_v15  ;;  %v11692_v15 = vld [vmem:[#allocation98_spill] sm:$0xff]  ;;  %v11698_v45 = vld [vmem:[#allocation104_spill] sm:$0xff] }
 0x54a   :  { %8855 = vtanh.f32 %v10281_v54 }
 0x554   :  { %v8856_v27 = vpop.eup %8855 }
 0x555   :  { %v1903_v6 = vmul.f32 %v8856_v27, %v8854_v8  ;;  %v11701_v8 = vld [vmem:[#allocation107_spill] sm:$0xff]  ;;  %v11702_v27 = vld [vmem:[#allocation108_spill] sm:$0xff] }
 0x557   :  { %2281 = vmatmul.mubr.f32.vlgmr.msra.gmra.mrb[10].mxu1 %v1903_v6  ;;  %2352 = vmatmul.mubr.f32.vlgmr.msra.gmra.mrb[18].mxu0 %v1903_v6  ;;  %v11703_v6 = vld [vmem:[#allocation109_spill] sm:$0xff] }
 0x558   :  { %7247 = vmatpush1.bf16.msra.mxu1 %v11688_v60  ;;  %7279 = vmatpush1.bf16.msra.mxu0 %v11689_v58  ;;  %v11713_v58 = vld [vmem:[#allocation118_spill] sm:$0xff] }
 0x559   :  { %7249 = vmatprep.subr.bf16.mxu1 %v11690_v26  ;;  %7281 = vmatprep.subr.bf16.mxu0 %v11691_v18  ;;  %v11707_v26 = vld [vmem:[#allocation112_spill] sm:$0xff] }
 0x55a   :  { %2422 = vmatprep.mubr.f32.mxu1 %v11470_v5  ;;  %2493 = vmatprep.mubr.f32.mxu0 %v11470_v5 }
 0x55c   :  { %7251 = vmatpush1.bf16.msra.mxu1 %v11692_v15  ;;  %7283 = vmatpush1.bf16.msra.mxu0 %v11693_v62  ;;  %v11704_v15 = vld [vmem:[#allocation110_spill] sm:$0xff] }
 0x55d   :  { %7253 = vmatprep.subr.bf16.mxu1 %v11694_v21  ;;  %7285 = vmatprep.subr.bf16.mxu0 %v11695_v36  ;;  %v11705_v36 = vld [vmem:[#allocation111_spill] sm:$0xff] }
 0x560   :  { %7255 = vmatpush1.bf16.msra.mxu1 %v11696_v53  ;;  %7287 = vmatpush1.bf16.msra.mxu0 %v11697_v13  ;;  %v11706_v53 = vld [vmem:[#allocation124_spill] sm:$0xff] }
 0x561   :  { %7257 = vmatprep.subr.bf16.mxu1 %v11698_v45  ;;  %7289 = vmatprep.subr.bf16.mxu0 %v11699_v55  ;;  %v11708_v55 = vld [vmem:[#allocation113_spill] sm:$0xff] }
 0x564   :  { %7259 = vmatpush1.bf16.msra.mxu1 %v11700_v48  ;;  %7291 = vmatpush1.bf16.msra.mxu0 %v11701_v8 }
 0x565   :  { %7261 = vmatprep.subr.bf16.mxu1 %v11702_v27  ;;  %7293 = vmatprep.subr.bf16.mxu0 %v11703_v6  ;;  %v11709_v6 = vld [vmem:[#allocation115_spill] sm:$0xff] }
 0x568   :  { %v2112_v62 = vpop.f32.mrb[8].mxu1  ;;  %v2183_v21 = vpop.f32.mrb[16].mxu0  ;;  %7263 = vmatpush1.bf16.msra.mxu1 %v11704_v15  ;;  %7295 = vmatpush1.bf16.msra.mxu0 %v11705_v36  ;;  %v11710_v15 = vld [vmem:[#allocation116_spill] sm:$0xff]  ;;  %v11711_v36 = vld [vmem:[#allocation117_spill] sm:$0xff] }
 0x569   :  { %v2188_v13 = vadd.f32 %v2112_v62, %v11706_v53  ;;  %v2114_v18 = vpop.f32.mrb[9].mxu1  ;;  %v2185_v45 = vpop.f32.mrb[17].mxu0  ;;  %7265 = vmatprep.subr.bf16.mxu1 %v11707_v26  ;;  %7297 = vmatprep.subr.bf16.mxu0 %v11708_v55  ;;  %v11712_v62 = vld [vmem:[#allocation126_spill] sm:$0xff]  ;;  %v11714_v26 = vld [vmem:[#allocation119_spill] sm:$0xff]  ;;  %v11715_v55 = vld [vmem:[#allocation120_spill] sm:$0xff] }
 0x56a   :  { %v2189_v8 = vadd.f32 %v2114_v18, %v11616_v24  ;;  %v2191_v53 = vadd.f32 %v2185_v45, %v11712_v62  ;;  %v11716_v18 = vld [vmem:[#allocation121_spill] sm:$0xff] }
 0x56b   :  { %v6141_v48 = vmul.f32 -1.442695, %v2188_v13 }
 0x56c   :  { %v6142_v27 = vmul.f32 -1.442695, %v2189_v8  ;;  %7267 = vmatpush1.bf16.msra.mxu1 %v11617_v46  ;;  %7299 = vmatpush1.bf16.msra.mxu0 %v11709_v6  ;;  %v6143_v13 = vmul.f32 -1.442695, %v2191_v53  ;;  %v11717_v8 = vld [vmem:[#allocation122_spill] sm:$0xff]  ;;  %v11718_v6 = vld [vmem:[#allocation123_spill] sm:$0xff] }
 0x56d   :  { %8857 = vpow2.f32 %v6141_v48  ;;  %7269 = vmatprep.subr.bf16.mxu1 %v11710_v15  ;;  %7301 = vmatprep.subr.bf16.mxu0 %v11711_v36  ;;  %v11719_v48 = vld [vmem:[#allocation127_spill] sm:$0xff] }
 0x56e   :  { %8859 = vpow2.f32 %v6142_v27  ;;  %v2190_v15 = vadd.f32 %v2183_v21, %v11719_v48  ;;  %v11720_v27 = vld [vmem:[#allocation25_spill] sm:$0xff] }
 0x56f   :  { %8861 = vpow2.f32 %v6143_v13 }
 0x570   :  { %7271 = vmatpush1.bf16.msra.mxu1 %v11713_v58  ;;  %7303 = vmatpush1.bf16.msra.mxu0 %v11714_v26  ;;  %8863 = vtanh.f32 %v2190_v15  ;;  %v11724_v15 = vld [vmem:[#allocation43_spill] sm:$0xff] }
 0x571   :  { %7273 = vmatprep.subr.bf16.mxu1 %v11715_v55  ;;  %7305 = vmatprep.subr.bf16.mxu0 %v11716_v18 }
 0x574   :  { %7275 = vmatpush1.bf16.msra.mxu1 %v11717_v8  ;;  %7307 = vmatpush1.bf16.msra.mxu0 %v11718_v6 }
 0x575   :  { %7309 = vmatprep.subr.bf16.mxu1 %v11628_v2  ;;  %7341 = vmatprep.subr.bf16.mxu0 %v11720_v27 }
 0x577   :  { %v8858_v45 = vpop.eup %8857 }
 0x578   :  { %v8860_v62 = vpop.eup %8859  ;;  %v2195_v58 = vadd.f32 1.0, %v8858_v45 }
 0x579   :  { %v2201_v26 = vadd.f32 1.0, %v8860_v62  ;;  %v8862_v18 = vpop.eup %8861  ;;  %v11728_v62 = vld [vmem:[#allocation45_spill] sm:$0xff] }
 0x57a   :  { %8865 = vrcp.f32 %v2195_v58  ;;  %v8864_v53 = vpop.eup %8863  ;;  %v2208_v6 = vadd.f32 1.0, %v8862_v18  ;;  %v11722_v58 = vld [vmem:[#allocation42_spill] sm:$0xff]  ;;  %v11729_v18 = vld [vmem:[#allocation32_spill] sm:$0xff] }
 0x57b   :  { %8867 = vrcp.f32 %v2201_v26  ;;  %v11723_v26 = vld [vmem:[#allocation29_spill] sm:$0xff] }
 0x57c   :  { %8869 = vrcp.f32 %v2208_v6  ;;  %v11727_v6 = vld [vmem:[#allocation31_spill] sm:$0xff] }
 0x584   :  { %v8866_v55 = vpop.eup %8865 }
 0x585   :  { %v8868_v8 = vpop.eup %8867  ;;  %v2212_v36 = vmul.f32 %v8866_v55, %v8864_v53  ;;  %v11726_v55 = vld [vmem:[#allocation44_spill] sm:$0xff]  ;;  %v11732_v53 = vld [vmem:[#allocation47_spill] sm:$0xff] }
 0x586   :  { %v2211_v21 = vmul.f32 %v8868_v8, %v10169_v12  ;;  %v8870_v27 = vpop.eup %8869  ;;  %v11721_v12 = vld [vmem:[#allocation28_spill] sm:$0xff]  ;;  %v11730_v8 = vld [vmem:[#allocation46_spill] sm:$0xff] }
 0x588   :  { %v10323_v48 = vadd.f32 %v2212_v36, %v2211_v21  ;;  %v11725_v36 = vld [vmem:[#allocation30_spill] sm:$0xff] }
 0x589   :  { %v11733_v21 = vld [vmem:[#allocation34_spill] sm:$0xff] }
 0x58a   :  { %8871 = vtanh.f32 %v10323_v48 }
 0x594   :  { %v8872_v45 = vpop.eup %8871 }
 0x595   :  { %v2215_v13 = vmul.f32 %v8872_v45, %v8870_v27  ;;  %v11731_v27 = vld [vmem:[#allocation33_spill] sm:$0xff]  ;;  %v11734_v45 = vld [vmem:[#allocation48_spill] sm:$0xff] }
 0x597   :  { %2423 = vmatmul.mubr.f32.vlgmr.msra.gmra.mrb[10].mxu1 %v2215_v13  ;;  %2494 = vmatmul.mubr.f32.vlgmr.msra.gmra.mrb[18].mxu0 %v2215_v13 }
 0x598   :  { %7311 = vmatpush1.bf16.msra.mxu1 %v9557_v31  ;;  %7343 = vmatpush1.bf16.msra.mxu0 %v9657_v41 }
 0x599   :  { %7313 = vmatprep.subr.bf16.mxu1 %v9559_v34  ;;  %7345 = vmatprep.subr.bf16.mxu0 %v9659_v47 }
 0x59a   :  { %2592 = vmatprep.mubr.f32.mxu1 %v11470_v5  ;;  %2663 = vmatprep.mubr.f32.mxu0 %v11470_v5 }
 0x59c   :  { %7315 = vmatpush1.bf16.msra.mxu1 %v9562_v38  ;;  %7347 = vmatpush1.bf16.msra.mxu0 %v9662_v56 }
 0x59d   :  { %7317 = vmatprep.subr.bf16.mxu1 %v9565_v43  ;;  %7349 = vmatprep.subr.bf16.mxu0 %v9665_v63 }
 0x5a0   :  { %7319 = vmatpush1.bf16.msra.mxu1 %v9568_v50  ;;  %7351 = vmatpush1.bf16.msra.mxu0 %v9668_v11 }
 0x5a1   :  { %7321 = vmatprep.subr.bf16.mxu1 %v9571_v52  ;;  %7353 = vmatprep.subr.bf16.mxu0 %v9671_v14 }
 0x5a4   :  { %7323 = vmatpush1.bf16.msra.mxu1 %v9574_v59  ;;  %7355 = vmatpush1.bf16.msra.mxu0 %v9674_v32 }
 0x5a5   :  { %7325 = vmatprep.subr.bf16.mxu1 %v9577_v61  ;;  %7357 = vmatprep.subr.bf16.mxu0 %v9677_v35 }
 0x5a8   :  { %7327 = vmatpush1.bf16.msra.mxu1 %v9582_v3  ;;  %7359 = vmatpush1.bf16.msra.mxu0 %v9680_v49 }
 0x5a9   :  { %7329 = vmatprep.subr.bf16.mxu1 %v9585_v4  ;;  %7361 = vmatprep.subr.bf16.mxu0 %v9684_v51 }
 0x5ac   :  { %7331 = vmatpush1.bf16.msra.mxu1 %v9589_v9  ;;  %7363 = vmatpush1.bf16.msra.mxu0 %v9687_v25 }
 0x5ad   :  { %7333 = vmatprep.subr.bf16.mxu1 %v9592_v10  ;;  %7365 = vmatprep.subr.bf16.mxu0 %v9690_v40 }
 0x5b0   :  { %7335 = vmatpush1.bf16.msra.mxu1 %v9596_v16  ;;  %7367 = vmatpush1.bf16.msra.mxu0 %v9693_v19 }
 0x5b1   :  { %7337 = vmatprep.subr.bf16.mxu1 %v9599_v17  ;;  %7369 = vmatprep.subr.bf16.mxu0 %v9696_v20 }
 0x5b4   :  { %7339 = vmatpush1.bf16.msra.mxu1 %v9602_v22  ;;  %7371 = vmatpush1.bf16.msra.mxu0 %v9699_v42 }
 0x5b5   :  { %7373 = vmatprep.subr.bf16.mxu1 %v9605_v23  ;;  %7405 = vmatprep.subr.bf16.mxu0 %v9702_v44 }
 0x5b7   :  { %2593 = vmatmul.mubr.f32.vlgmr.msra.gmra.mrb[12].mxu1 %v2215_v13  ;;  %2664 = vmatmul.mubr.f32.vlgmr.msra.gmra.mrb[20].mxu0 %v2215_v13  ;;  %v11735_v13 = vld [vmem:[#allocation35_spill] sm:$0xff] }
 0x5b8   :  { %7375 = vmatpush1.bf16.msra.mxu1 %v9608_v29  ;;  %7407 = vmatpush1.bf16.msra.mxu0 %v9705_v0 }
 0x5b9   :  { %7377 = vmatprep.subr.bf16.mxu1 %v9611_v30  ;;  %7409 = vmatprep.subr.bf16.mxu0 %v9708_v1 }
 0x5ba   :  { %2734 = vmatprep.mubr.f32.mxu1 %v11470_v5  ;;  %2805 = vmatprep.mubr.f32.mxu0 %v11470_v5 }
 0x5bc   :  { %7379 = vmatpush1.bf16.msra.mxu1 %v9615_v37  ;;  %7411 = vmatpush1.bf16.msra.mxu0 %v9712_v28 }
 0x5bd   :  { %7381 = vmatprep.subr.bf16.mxu1 %v9619_v39  ;;  %7413 = vmatprep.subr.bf16.mxu0 %v9716_v33 }
 0x5c0   :  { %7383 = vmatpush1.bf16.msra.mxu1 %v11721_v12  ;;  %7415 = vmatpush1.bf16.msra.mxu0 %v11722_v58  ;;  %v11779_v58 = vld [vmem:[#allocation128_spill] sm:$0xff] }
 0x5c1   :  { %7385 = vmatprep.subr.bf16.mxu1 %v11723_v26  ;;  %7417 = vmatprep.subr.bf16.mxu0 %v11724_v15  ;;  %v11778_v15 = vld [vmem:[#allocation57_spill] sm:$0xff] }
 0x5c4   :  { %7387 = vmatpush1.bf16.msra.mxu1 %v11725_v36  ;;  %7419 = vmatpush1.bf16.msra.mxu0 %v11726_v55  ;;  %v11736_v36 = vld [vmem:[#allocation49_spill] sm:$0xff]  ;;  %v11737_v55 = vld [vmem:[#allocation36_spill] sm:$0xff] }
 0x5c5   :  { %7389 = vmatprep.subr.bf16.mxu1 %v11727_v6  ;;  %7421 = vmatprep.subr.bf16.mxu0 %v11728_v62  ;;  %v11738_v6 = vld [vmem:[#allocation50_spill] sm:$0xff]  ;;  %v11739_v62 = vld [vmem:[#allocation37_spill] sm:$0xff] }
 0x5c8   :  { %7391 = vmatpush1.bf16.msra.mxu1 %v11729_v18  ;;  %7423 = vmatpush1.bf16.msra.mxu0 %v11730_v8  ;;  %v11740_v18 = vld [vmem:[#allocation51_spill] sm:$0xff]  ;;  %v11741_v8 = vld [vmem:[#allocation38_spill] sm:$0xff] }
 0x5c9   :  { %7393 = vmatprep.subr.bf16.mxu1 %v11731_v27  ;;  %7425 = vmatprep.subr.bf16.mxu0 %v11732_v53  ;;  %v11742_v27 = vld [vmem:[#allocation52_spill] sm:$0xff]  ;;  %v11743_v53 = vld [vmem:[#allocation53_spill] sm:$0xff] }
 0x5cc   :  { %7395 = vmatpush1.bf16.msra.mxu1 %v11733_v21  ;;  %7427 = vmatpush1.bf16.msra.mxu0 %v11734_v45  ;;  %v11744_v21 = vld [vmem:[#allocation54_spill] sm:$0xff] }
 0x5cd   :  { %7397 = vmatprep.subr.bf16.mxu1 %v11735_v13  ;;  %7429 = vmatprep.subr.bf16.mxu0 %v11736_v36  ;;  %v11745_v45 = vld [vmem:[#allocation62_spill] sm:$0xff]  ;;  %v11746_v36 = vld [vmem:[#allocation55_spill] sm:$0xff] }
 0x5ce   :  { %v11760_v13 = vld [vmem:[#allocation75_spill] sm:$0xff] }
 0x5d0   :  { %7399 = vmatpush1.bf16.msra.mxu1 %v11737_v55  ;;  %7431 = vmatpush1.bf16.msra.mxu0 %v11738_v6  ;;  %v11747_v55 = vld [vmem:[#allocation56_spill] sm:$0xff]  ;;  %v11748_v6 = vld [vmem:[#allocation58_spill] sm:$0xff] }
 0x5d1   :  { %7401 = vmatprep.subr.bf16.mxu1 %v11739_v62  ;;  %7433 = vmatprep.subr.bf16.mxu0 %v11740_v18  ;;  %v11749_v62 = vld [vmem:[#allocation59_spill] sm:$0xff]  ;;  %v11759_v18 = vld [vmem:[#allocation73_spill] sm:$0xff] }
 0x5d4   :  { %7403 = vmatpush1.bf16.msra.mxu1 %v11741_v8  ;;  %7435 = vmatpush1.bf16.msra.mxu0 %v11742_v27  ;;  %v11750_v27 = vld [vmem:[#allocation60_spill] sm:$0xff] }
 0x5d5   :  { %7437 = vmatprep.subr.bf16.mxu1 %v11743_v53  ;;  %7469 = vmatprep.subr.bf16.mxu0 %v11744_v21  ;;  %v11751_v53 = vld [vmem:[#allocation61_spill] sm:$0xff]  ;;  %v11752_v21 = vld [vmem:[#allocation63_spill] sm:$0xff]  ;;  %v11753_v8 = vld [vmem:[#allocation64_spill] sm:$0xff] }
 0x5d7   :  { %2735 = vmatmul.mubr.f32.vlgmr.msra.gmra.mrb[12].mxu1 %v11745_v45  ;;  %2806 = vmatmul.mubr.f32.vlgmr.msra.gmra.mrb[20].mxu0 %v11745_v45  ;;  %v11754_v45 = vld [vmem:[#allocation66_spill] sm:$0xff] }
 0x5d8   :  { %7439 = vmatpush1.bf16.msra.mxu1 %v11746_v36  ;;  %7471 = vmatpush1.bf16.msra.mxu0 %v11747_v55  ;;  %v11755_v36 = vld [vmem:[#allocation67_spill] sm:$0xff]  ;;  %v11756_v55 = vld [vmem:[#allocation69_spill] sm:$0xff] }
 0x5d9   :  { %7441 = vmatprep.subr.bf16.mxu1 %v11748_v6  ;;  %7473 = vmatprep.subr.bf16.mxu0 %v11749_v62  ;;  %v11757_v6 = vld [vmem:[#allocation70_spill] sm:$0xff]  ;;  %v11758_v62 = vld [vmem:[#allocation72_spill] sm:$0xff] }
 0x5da   :  { %2904 = vmatprep.mubr.f32.mxu1 %v11470_v5  ;;  %2975 = vmatprep.mubr.f32.mxu0 %v11470_v5 }
 0x5dc   :  { %7443 = vmatpush1.bf16.msra.mxu1 %v11750_v27  ;;  %7475 = vmatpush1.bf16.msra.mxu0 %v11751_v53  ;;  %v11761_v27 = vld [vmem:[#allocation76_spill] sm:$0xff]  ;;  %v11762_v53 = vld [vmem:[#allocation78_spill] sm:$0xff] }
 0x5dd   :  { %7445 = vmatprep.subr.bf16.mxu1 %v11752_v21  ;;  %7477 = vmatprep.subr.bf16.mxu0 %v11753_v8  ;;  %v11763_v21 = vld [vmem:[#allocation79_spill] sm:$0xff]  ;;  %v11764_v8 = vld [vmem:[#allocation80_spill] sm:$0xff] }
 0x5e0   :  { %7447 = vmatpush1.bf16.msra.mxu1 %v11754_v45  ;;  %7479 = vmatpush1.bf16.msra.mxu0 %v11755_v36  ;;  %v11765_v45 = vld [vmem:[#allocation81_spill] sm:$0xff]  ;;  %v11766_v36 = vld [vmem:[#allocation82_spill] sm:$0xff] }
 0x5e1   :  { %7449 = vmatprep.subr.bf16.mxu1 %v11756_v55  ;;  %7481 = vmatprep.subr.bf16.mxu0 %v11757_v6  ;;  %v11767_v55 = vld [vmem:[#allocation83_spill] sm:$0xff]  ;;  %v11768_v6 = vld [vmem:[#allocation84_spill] sm:$0xff] }
 0x5e4   :  { %7451 = vmatpush1.bf16.msra.mxu1 %v11758_v62  ;;  %7483 = vmatpush1.bf16.msra.mxu0 %v11759_v18  ;;  %v11769_v62 = vld [vmem:[#allocation85_spill] sm:$0xff]  ;;  %v11770_v18 = vld [vmem:[#allocation86_spill] sm:$0xff] }
 0x5e5   :  { %7453 = vmatprep.subr.bf16.mxu1 %v11760_v13  ;;  %7485 = vmatprep.subr.bf16.mxu0 %v11761_v27  ;;  %v11771_v13 = vld [vmem:[#allocation87_spill] sm:$0xff]  ;;  %v11772_v27 = vld [vmem:[#allocation88_spill] sm:$0xff] }
 0x5e8   :  { %7455 = vmatpush1.bf16.msra.mxu1 %v11762_v53  ;;  %7487 = vmatpush1.bf16.msra.mxu0 %v11763_v21  ;;  %v11773_v53 = vld [vmem:[#allocation89_spill] sm:$0xff]  ;;  %v11774_v21 = vld [vmem:[#allocation90_spill] sm:$0xff] }
 0x5e9   :  { %7457 = vmatprep.subr.bf16.mxu1 %v11764_v8  ;;  %7489 = vmatprep.subr.bf16.mxu0 %v11765_v45  ;;  %v11775_v8 = vld [vmem:[#allocation91_spill] sm:$0xff]  ;;  %v11776_v45 = vld [vmem:[#allocation92_spill] sm:$0xff] }
 0x5ec   :  { %7459 = vmatpush1.bf16.msra.mxu1 %v11766_v36  ;;  %7491 = vmatpush1.bf16.msra.mxu0 %v11767_v55  ;;  %v11777_v36 = vld [vmem:[#allocation93_spill] sm:$0xff] }
 0x5ed   :  { %7461 = vmatprep.subr.bf16.mxu1 %v11768_v6  ;;  %7493 = vmatprep.subr.bf16.mxu0 %v11769_v62 }
 0x5f0   :  { %7463 = vmatpush1.bf16.msra.mxu1 %v11770_v18  ;;  %7495 = vmatpush1.bf16.msra.mxu0 %v11771_v13 }
 0x5f1   :  { %7465 = vmatprep.subr.bf16.mxu1 %v11772_v27  ;;  %7497 = vmatprep.subr.bf16.mxu0 %v11773_v53 }
 0x5f4   :  { %7467 = vmatpush1.bf16.msra.mxu1 %v11774_v21  ;;  %7499 = vmatpush1.bf16.msra.mxu0 %v11775_v8 }
 0x5f5   :  { %7501 = vmatprep.subr.bf16.mxu1 %v11776_v45  ;;  %7533 = vmatprep.subr.bf16.mxu0 %v11777_v36 }
 0x66a   :  { %v2424_v55 = vpop.f32.mrb[10].mxu1  ;;  %v2495_v6 = vpop.f32.mrb[18].mxu0 }
 0x66b   :  { %v2500_v62 = vadd.f32 %v2424_v55, %v11778_v15  ;;  %v2426_v26 = vpop.f32.mrb[11].mxu1  ;;  %v2497_v18 = vpop.f32.mrb[19].mxu0  ;;  %v2502_v8 = vadd.f32 %v2495_v6, %v10124_v57 }
 0x66c   :  { %v2501_v13 = vadd.f32 %v2426_v26, %v11779_v58  ;;  %v2503_v21 = vadd.f32 %v2497_v18, %v11686_v7 }
 0x66d   :  { %v6144_v12 = vmul.f32 -1.442695, %v2500_v62 }
 0x66e   :  { %v6145_v27 = vmul.f32 -1.442695, %v2501_v13  ;;  %v6146_v53 = vmul.f32 -1.442695, %v2503_v21 }
 0x66f   :  { %8873 = vpow2.f32 %v6144_v12 }
 0x670   :  { %8875 = vpow2.f32 %v6145_v27 }
 0x671   :  { %8877 = vpow2.f32 %v6146_v53 }
 0x672   :  { %8879 = vtanh.f32 %v2502_v8  ;;  %v11785_v8 = vld [vmem:[#allocation100_spill] sm:$0xff] }
 0x679   :  { %v8874_v45 = vpop.eup %8873 }
 0x67a   :  { %v8876_v33 = vpop.eup %8875  ;;  %v2507_v36 = vadd.f32 1.0, %v8874_v45  ;;  %v11786_v45 = vld [vmem:[#allocation101_spill] sm:$0xff] }
 0x67b   :  { %v2513_v39 = vadd.f32 1.0, %v8876_v33  ;;  %v8878_v55 = vpop.eup %8877  ;;  %v11781_v33 = vld [vmem:[#allocation96_spill] sm:$0xff] }
 0x67c   :  { %8881 = vrcp.f32 %v2507_v36  ;;  %v8880_v15 = vpop.eup %8879  ;;  %v2520_v12 = vadd.f32 1.0, %v8878_v55  ;;  %v11784_v36 = vld [vmem:[#allocation99_spill] sm:$0xff]  ;;  %v11787_v55 = vld [vmem:[#allocation102_spill] sm:$0xff] }
 0x67d   :  { %8883 = vrcp.f32 %v2513_v39  ;;  %v11780_v39 = vld [vmem:[#allocation95_spill] sm:$0xff] }
 0x67e   :  { %8885 = vrcp.f32 %v2520_v12  ;;  %v11791_v12 = vld [vmem:[#allocation106_spill] sm:$0xff] }
 0x686   :  { %v8882_v26 = vpop.eup %8881 }
 0x687   :  { %v8884_v62 = vpop.eup %8883  ;;  %v2524_v13 = vmul.f32 %v8882_v26, %v8880_v15  ;;  %v11782_v15 = vld [vmem:[#allocation97_spill] sm:$0xff]  ;;  %v11788_v26 = vld [vmem:[#allocation103_spill] sm:$0xff] }
 0x688   :  { %v2523_v27 = vmul.f32 %v8884_v62, %v10281_v54  ;;  %v8886_v6 = vpop.eup %8885  ;;  %v11783_v54 = vld [vmem:[#allocation98_spill] sm:$0xff]  ;;  %v11789_v62 = vld [vmem:[#allocation104_spill] sm:$0xff] }
 0x68a   :  { %v10435_v18 = vadd.f32 %v2524_v13, %v2523_v27  ;;  %v11790_v13 = vld [vmem:[#allocation105_spill] sm:$0xff]  ;;  %v11792_v27 = vld [vmem:[#allocation107_spill] sm:$0xff] }
 0x68c   :  { %8887 = vtanh.f32 %v10435_v18 }
 0x696   :  { %v8888_v21 = vpop.eup %8887 }
 0x697   :  { %v2527_v53 = vmul.f32 %v8888_v21, %v8886_v6  ;;  %v11793_v6 = vld [vmem:[#allocation108_spill] sm:$0xff]  ;;  %v11794_v21 = vld [vmem:[#allocation109_spill] sm:$0xff] }
 0x699   :  { %2905 = vmatmul.mubr.f32.vlgmr.msra.gmra.mrb[14].mxu1 %v2527_v53  ;;  %2976 = vmatmul.mubr.f32.vlgmr.msra.gmra.mrb[22].mxu0 %v2527_v53 }
 0x69a   :  { %7503 = vmatpush1.bf16.msra.mxu1 %v11688_v60  ;;  %7535 = vmatpush1.bf16.msra.mxu0 %v11780_v39 }
 0x69b   :  { %7505 = vmatprep.subr.bf16.mxu1 %v11781_v33  ;;  %7537 = vmatprep.subr.bf16.mxu0 %v11782_v15  ;;  %v11798_v15 = vld [vmem:[#allocation112_spill] sm:$0xff]  ;;  %v11804_v33 = vld [vmem:[#allocation118_spill] sm:$0xff] }
 0x69c   :  { %3046 = vmatprep.mubr.f32.mxu1 %v11470_v5  ;;  %3117 = vmatprep.mubr.f32.mxu0 %v11470_v5 }
 0x69e   :  { %7507 = vmatpush1.bf16.msra.mxu1 %v11783_v54  ;;  %7539 = vmatpush1.bf16.msra.mxu0 %v11784_v36  ;;  %v11795_v36 = vld [vmem:[#allocation110_spill] sm:$0xff] }
 0x69f   :  { %7509 = vmatprep.subr.bf16.mxu1 %v11785_v8  ;;  %7541 = vmatprep.subr.bf16.mxu0 %v11786_v45  ;;  %v11796_v45 = vld [vmem:[#allocation111_spill] sm:$0xff] }
 0x6a2   :  { %7511 = vmatpush1.bf16.msra.mxu1 %v11787_v55  ;;  %7543 = vmatpush1.bf16.msra.mxu0 %v11788_v26  ;;  %v11797_v55 = vld [vmem:[#allocation124_spill] sm:$0xff] }
 0x6a3   :  { %7513 = vmatprep.subr.bf16.mxu1 %v11789_v62  ;;  %7545 = vmatprep.subr.bf16.mxu0 %v11790_v13  ;;  %v11799_v13 = vld [vmem:[#allocation113_spill] sm:$0xff] }
 0x6a6   :  { %7515 = vmatpush1.bf16.msra.mxu1 %v11791_v12  ;;  %7547 = vmatpush1.bf16.msra.mxu0 %v11792_v27 }
 0x6a7   :  { %7517 = vmatprep.subr.bf16.mxu1 %v11793_v6  ;;  %7549 = vmatprep.subr.bf16.mxu0 %v11794_v21  ;;  %v11800_v21 = vld [vmem:[#allocation115_spill] sm:$0xff] }
 0x6aa   :  { %v2736_v53 = vpop.f32.mrb[12].mxu1  ;;  %v2807_v8 = vpop.f32.mrb[20].mxu0  ;;  %7519 = vmatpush1.bf16.msra.mxu1 %v11795_v36  ;;  %7551 = vmatpush1.bf16.msra.mxu0 %v11796_v45  ;;  %v11801_v36 = vld [vmem:[#allocation116_spill] sm:$0xff]  ;;  %v11802_v45 = vld [vmem:[#allocation117_spill] sm:$0xff] }
 0x6ab   :  { %v2812_v26 = vadd.f32 %v2736_v53, %v11797_v55  ;;  %v2738_v54 = vpop.f32.mrb[13].mxu1  ;;  %v2809_v62 = vpop.f32.mrb[21].mxu0  ;;  %7521 = vmatprep.subr.bf16.mxu1 %v11798_v15  ;;  %7553 = vmatprep.subr.bf16.mxu0 %v11799_v13  ;;  %v11803_v53 = vld [vmem:[#allocation126_spill] sm:$0xff]  ;;  %v11805_v15 = vld [vmem:[#allocation119_spill] sm:$0xff]  ;;  %v11806_v13 = vld [vmem:[#allocation120_spill] sm:$0xff] }
 0x6ac   :  { %v2813_v27 = vadd.f32 %v2738_v54, %v11616_v24  ;;  %v2815_v55 = vadd.f32 %v2809_v62, %v11803_v53  ;;  %v11807_v54 = vld [vmem:[#allocation121_spill] sm:$0xff] }
 0x6ad   :  { %v6147_v12 = vmul.f32 -1.442695, %v2812_v26 }
 0x6ae   :  { %v6148_v6 = vmul.f32 -1.442695, %v2813_v27  ;;  %7523 = vmatpush1.bf16.msra.mxu1 %v11617_v46  ;;  %7555 = vmatpush1.bf16.msra.mxu0 %v11800_v21  ;;  %v6149_v26 = vmul.f32 -1.442695, %v2815_v55  ;;  %v11808_v27 = vld [vmem:[#allocation122_spill] sm:$0xff]  ;;  %v11809_v21 = vld [vmem:[#allocation123_spill] sm:$0xff] }
 0x6af   :  { %8889 = vpow2.f32 %v6147_v12  ;;  %7525 = vmatprep.subr.bf16.mxu1 %v11801_v36  ;;  %7557 = vmatprep.subr.bf16.mxu0 %v11802_v45  ;;  %v11810_v12 = vld [vmem:[#allocation127_spill] sm:$0xff] }
 0x6b0   :  { %8891 = vpow2.f32 %v6148_v6  ;;  %v2814_v36 = vadd.f32 %v2807_v8, %v11810_v12  ;;  %v11811_v6 = vld [vmem:[#allocation25_spill] sm:$0xff] }
 0x6b1   :  { %8893 = vpow2.f32 %v6149_v26 }
 0x6b2   :  { %7527 = vmatpush1.bf16.msra.mxu1 %v11804_v33  ;;  %7559 = vmatpush1.bf16.msra.mxu0 %v11805_v15  ;;  %8895 = vtanh.f32 %v2814_v36  ;;  %v11815_v36 = vld [vmem:[#allocation42_spill] sm:$0xff] }
 0x6b3   :  { %7529 = vmatprep.subr.bf16.mxu1 %v11806_v13  ;;  %7561 = vmatprep.subr.bf16.mxu0 %v11807_v54 }
 0x6b6   :  { %7531 = vmatpush1.bf16.msra.mxu1 %v11808_v27  ;;  %7563 = vmatpush1.bf16.msra.mxu0 %v11809_v21 }
 0x6b7   :  { %7565 = vmatprep.subr.bf16.mxu1 %v11628_v2  ;;  %7597 = vmatprep.subr.bf16.mxu0 %v11811_v6 }
 0x6b9   :  { %v8890_v62 = vpop.eup %8889 }
 0x6ba   :  { %v8892_v53 = vpop.eup %8891  ;;  %v2819_v33 = vadd.f32 1.0, %v8890_v62 }
 0x6bb   :  { %v2825_v15 = vadd.f32 1.0, %v8892_v53  ;;  %v8894_v54 = vpop.eup %8893  ;;  %v11819_v53 = vld [vmem:[#allocation44_spill] sm:$0xff] }
 0x6bc   :  { %8897 = vrcp.f32 %v2819_v33  ;;  %v8896_v55 = vpop.eup %8895  ;;  %v2832_v21 = vadd.f32 1.0, %v8894_v54  ;;  %v11813_v33 = vld [vmem:[#allocation41_spill] sm:$0xff]  ;;  %v11820_v54 = vld [vmem:[#allocation31_spill] sm:$0xff] }
 0x6bd   :  { %8899 = vrcp.f32 %v2825_v15  ;;  %v11814_v15 = vld [vmem:[#allocation28_spill] sm:$0xff] }
 0x6be   :  { %8901 = vrcp.f32 %v2832_v21  ;;  %v11818_v21 = vld [vmem:[#allocation30_spill] sm:$0xff] }
 0x6c6   :  { %v8898_v13 = vpop.eup %8897 }
 0x6c7   :  { %v8900_v27 = vpop.eup %8899  ;;  %v2836_v45 = vmul.f32 %v8898_v13, %v8896_v55  ;;  %v11817_v13 = vld [vmem:[#allocation43_spill] sm:$0xff]  ;;  %v11823_v55 = vld [vmem:[#allocation46_spill] sm:$0xff] }
 0x6c8   :  { %v2835_v8 = vmul.f32 %v8900_v27, %v10323_v48  ;;  %v8902_v6 = vpop.eup %8901  ;;  %v11812_v48 = vld [vmem:[#allocation27_spill] sm:$0xff]  ;;  %v11821_v27 = vld [vmem:[#allocation45_spill] sm:$0xff] }
 0x6ca   :  { %v10477_v12 = vadd.f32 %v2836_v45, %v2835_v8  ;;  %v11816_v45 = vld [vmem:[#allocation29_spill] sm:$0xff] }
 0x6cb   :  { %v11824_v8 = vld [vmem:[#allocation33_spill] sm:$0xff] }
 0x6cc   :  { %8903 = vtanh.f32 %v10477_v12 }
 0x6d6   :  { %v8904_v62 = vpop.eup %8903 }
 0x6d7   :  { %v2839_v26 = vmul.f32 %v8904_v62, %v8902_v6  ;;  %v11822_v6 = vld [vmem:[#allocation32_spill] sm:$0xff]  ;;  %v11825_v62 = vld [vmem:[#allocation47_spill] sm:$0xff] }
 0x6d9   :  { %3047 = vmatmul.mubr.f32.vlgmr.msra.gmra.mrb[14].mxu1 %v2839_v26  ;;  %3118 = vmatmul.mubr.f32.vlgmr.msra.gmra.mrb[22].mxu0 %v2839_v26 }
 0x6da   :  { %7567 = vmatpush1.bf16.msra.mxu1 %v9557_v31  ;;  %7599 = vmatpush1.bf16.msra.mxu0 %v9657_v41 }
 0x6db   :  { %7569 = vmatprep.subr.bf16.mxu1 %v9559_v34  ;;  %7601 = vmatprep.subr.bf16.mxu0 %v9659_v47 }
 0x6dc   :  { %3216 = vmatprep.mubr.f32.mxu1 %v11470_v5  ;;  %3287 = vmatprep.mubr.f32.mxu0 %v11470_v5 }
 0x6de   :  { %7571 = vmatpush1.bf16.msra.mxu1 %v9562_v38  ;;  %7603 = vmatpush1.bf16.msra.mxu0 %v9662_v56 }
 0x6df   :  { %7573 = vmatprep.subr.bf16.mxu1 %v9565_v43  ;;  %7605 = vmatprep.subr.bf16.mxu0 %v9665_v63 }
 0x6e2   :  { %7575 = vmatpush1.bf16.msra.mxu1 %v9568_v50  ;;  %7607 = vmatpush1.bf16.msra.mxu0 %v9668_v11 }
 0x6e3   :  { %7577 = vmatprep.subr.bf16.mxu1 %v9571_v52  ;;  %7609 = vmatprep.subr.bf16.mxu0 %v9671_v14 }
 0x6e6   :  { %7579 = vmatpush1.bf16.msra.mxu1 %v9574_v59  ;;  %7611 = vmatpush1.bf16.msra.mxu0 %v9674_v32 }
 0x6e7   :  { %7581 = vmatprep.subr.bf16.mxu1 %v9577_v61  ;;  %7613 = vmatprep.subr.bf16.mxu0 %v9677_v35 }
 0x6ea   :  { %7583 = vmatpush1.bf16.msra.mxu1 %v9582_v3  ;;  %7615 = vmatpush1.bf16.msra.mxu0 %v9680_v49 }
 0x6eb   :  { %7585 = vmatprep.subr.bf16.mxu1 %v9585_v4  ;;  %7617 = vmatprep.subr.bf16.mxu0 %v9684_v51 }
 0x6ee   :  { %7587 = vmatpush1.bf16.msra.mxu1 %v9589_v9  ;;  %7619 = vmatpush1.bf16.msra.mxu0 %v9687_v25 }
 0x6ef   :  { %7589 = vmatprep.subr.bf16.mxu1 %v9592_v10  ;;  %7621 = vmatprep.subr.bf16.mxu0 %v9690_v40 }
 0x6f2   :  { %7591 = vmatpush1.bf16.msra.mxu1 %v9596_v16  ;;  %7623 = vmatpush1.bf16.msra.mxu0 %v9693_v19 }
 0x6f3   :  { %7593 = vmatprep.subr.bf16.mxu1 %v9599_v17  ;;  %7625 = vmatprep.subr.bf16.mxu0 %v9696_v20 }
 0x6f6   :  { %7595 = vmatpush1.bf16.msra.mxu1 %v9602_v22  ;;  %7627 = vmatpush1.bf16.msra.mxu0 %v9699_v42 }
 0x6f7   :  { %7629 = vmatprep.subr.bf16.mxu1 %v9605_v23  ;;  %7661 = vmatprep.subr.bf16.mxu0 %v9702_v44 }
 0x6f9   :  { %3217 = vmatmul.mubr.f32.vlgmr.msra.gmra.mrb[16].mxu1 %v2839_v26  ;;  %3288 = vmatmul.mubr.f32.vlgmr.msra.gmra.mrb[24].mxu0 %v2839_v26  ;;  %v11826_v26 = vld [vmem:[#allocation34_spill] sm:$0xff] }
 0x6fa   :  { %7631 = vmatpush1.bf16.msra.mxu1 %v9608_v29  ;;  %7663 = vmatpush1.bf16.msra.mxu0 %v9705_v0 }
 0x6fb   :  { %7633 = vmatprep.subr.bf16.mxu1 %v9611_v30  ;;  %7665 = vmatprep.subr.bf16.mxu0 %v9708_v1 }
 0x6fc   :  { %3358 = vmatprep.mubr.f32.mxu1 %v11470_v5  ;;  %3429 = vmatprep.mubr.f32.mxu0 %v11470_v5 }
 0x6fe   :  { %7635 = vmatpush1.bf16.msra.mxu1 %v9615_v37  ;;  %7667 = vmatpush1.bf16.msra.mxu0 %v9712_v28 }
 0x6ff   :  { %7637 = vmatprep.subr.bf16.mxu1 %v11812_v48  ;;  %7669 = vmatprep.subr.bf16.mxu0 %v11813_v33 }
 0x702   :  { %7639 = vmatpush1.bf16.msra.mxu1 %v11814_v15  ;;  %7671 = vmatpush1.bf16.msra.mxu0 %v11815_v36  ;;  %v11871_v36 = vld [vmem:[#allocation57_spill] sm:$0xff] }
 0x703   :  { %7641 = vmatprep.subr.bf16.mxu1 %v11816_v45  ;;  %7673 = vmatprep.subr.bf16.mxu0 %v11817_v13  ;;  %v11827_v45 = vld [vmem:[#allocation48_spill] sm:$0xff]  ;;  %v11828_v13 = vld [vmem:[#allocation35_spill] sm:$0xff] }
 0x706   :  { %7643 = vmatpush1.bf16.msra.mxu1 %v11818_v21  ;;  %7675 = vmatpush1.bf16.msra.mxu0 %v11819_v53  ;;  %v11829_v21 = vld [vmem:[#allocation49_spill] sm:$0xff]  ;;  %v11830_v53 = vld [vmem:[#allocation36_spill] sm:$0xff] }
 0x707   :  { %7645 = vmatprep.subr.bf16.mxu1 %v11820_v54  ;;  %7677 = vmatprep.subr.bf16.mxu0 %v11821_v27  ;;  %v11831_v54 = vld [vmem:[#allocation50_spill] sm:$0xff]  ;;  %v11832_v27 = vld [vmem:[#allocation37_spill] sm:$0xff] }
 0x70a   :  { %7647 = vmatpush1.bf16.msra.mxu1 %v11822_v6  ;;  %7679 = vmatpush1.bf16.msra.mxu0 %v11823_v55  ;;  %v11833_v6 = vld [vmem:[#allocation51_spill] sm:$0xff]  ;;  %v11834_v55 = vld [vmem:[#allocation38_spill] sm:$0xff] }
 0x70b   :  { %7649 = vmatprep.subr.bf16.mxu1 %v11824_v8  ;;  %7681 = vmatprep.subr.bf16.mxu0 %v11825_v62  ;;  %v11835_v8 = vld [vmem:[#allocation52_spill] sm:$0xff]  ;;  %v11836_v62 = vld [vmem:[#allocation53_spill] sm:$0xff] }
 0x70e   :  { %7651 = vmatpush1.bf16.msra.mxu1 %v11826_v26  ;;  %7683 = vmatpush1.bf16.msra.mxu0 %v11827_v45  ;;  %v11837_v26 = vld [vmem:[#allocation54_spill] sm:$0xff]  ;;  %v11838_v45 = vld [vmem:[#allocation71_spill] sm:$0xff] }
 0x70f   :  { %7653 = vmatprep.subr.bf16.mxu1 %v11828_v13  ;;  %7685 = vmatprep.subr.bf16.mxu0 %v11829_v21  ;;  %v11839_v21 = vld [vmem:[#allocation55_spill] sm:$0xff] }
 0x710   :  { %v11853_v13 = vld [vmem:[#allocation75_spill] sm:$0xff] }
 0x712   :  { %7655 = vmatpush1.bf16.msra.mxu1 %v11830_v53  ;;  %7687 = vmatpush1.bf16.msra.mxu0 %v11831_v54  ;;  %v11840_v53 = vld [vmem:[#allocation56_spill] sm:$0xff]  ;;  %v11841_v54 = vld [vmem:[#allocation58_spill] sm:$0xff] }
 0x713   :  { %7657 = vmatprep.subr.bf16.mxu1 %v11832_v27  ;;  %7689 = vmatprep.subr.bf16.mxu0 %v11833_v6  ;;  %v11842_v27 = vld [vmem:[#allocation59_spill] sm:$0xff]  ;;  %v11852_v6 = vld [vmem:[#allocation73_spill] sm:$0xff] }
 0x716   :  { %7659 = vmatpush1.bf16.msra.mxu1 %v11834_v55  ;;  %7691 = vmatpush1.bf16.msra.mxu0 %v11835_v8  ;;  %v11843_v8 = vld [vmem:[#allocation60_spill] sm:$0xff] }
 0x717   :  { %7693 = vmatprep.subr.bf16.mxu1 %v11836_v62  ;;  %7725 = vmatprep.subr.bf16.mxu0 %v11837_v26  ;;  %v11844_v62 = vld [vmem:[#allocation61_spill] sm:$0xff]  ;;  %v11845_v26 = vld [vmem:[#allocation63_spill] sm:$0xff]  ;;  %v11846_v55 = vld [vmem:[#allocation64_spill] sm:$0xff] }
 0x719   :  { %3359 = vmatmul.mubr.f32.vlgmr.msra.gmra.mrb[16].mxu1 %v11838_v45  ;;  %3430 = vmatmul.mubr.f32.vlgmr.msra.gmra.mrb[24].mxu0 %v11838_v45  ;;  %v11847_v45 = vld [vmem:[#allocation66_spill] sm:$0xff] }
 0x71a   :  { %7695 = vmatpush1.bf16.msra.mxu1 %v11839_v21  ;;  %7727 = vmatpush1.bf16.msra.mxu0 %v11840_v53  ;;  %v11848_v21 = vld [vmem:[#allocation67_spill] sm:$0xff]  ;;  %v11849_v53 = vld [vmem:[#allocation69_spill] sm:$0xff] }
 0x71b   :  { %7697 = vmatprep.subr.bf16.mxu1 %v11841_v54  ;;  %7729 = vmatprep.subr.bf16.mxu0 %v11842_v27  ;;  %v11850_v54 = vld [vmem:[#allocation70_spill] sm:$0xff]  ;;  %v11851_v27 = vld [vmem:[#allocation72_spill] sm:$0xff] }
 0x71c   :  { %3528 = vmatprep.mubr.f32.mxu1 %v11470_v5  ;;  %3599 = vmatprep.mubr.f32.mxu0 %v11470_v5 }
 0x71e   :  { %7699 = vmatpush1.bf16.msra.mxu1 %v11843_v8  ;;  %7731 = vmatpush1.bf16.msra.mxu0 %v11844_v62  ;;  %v11854_v8 = vld [vmem:[#allocation76_spill] sm:$0xff]  ;;  %v11855_v62 = vld [vmem:[#allocation78_spill] sm:$0xff] }
 0x71f   :  { %7701 = vmatprep.subr.bf16.mxu1 %v11845_v26  ;;  %7733 = vmatprep.subr.bf16.mxu0 %v11846_v55  ;;  %v11856_v26 = vld [vmem:[#allocation79_spill] sm:$0xff]  ;;  %v11857_v55 = vld [vmem:[#allocation80_spill] sm:$0xff] }
 0x722   :  { %7703 = vmatpush1.bf16.msra.mxu1 %v11847_v45  ;;  %7735 = vmatpush1.bf16.msra.mxu0 %v11848_v21  ;;  %v11858_v45 = vld [vmem:[#allocation81_spill] sm:$0xff]  ;;  %v11859_v21 = vld [vmem:[#allocation82_spill] sm:$0xff] }
 0x723   :  { %7705 = vmatprep.subr.bf16.mxu1 %v11849_v53  ;;  %7737 = vmatprep.subr.bf16.mxu0 %v11850_v54  ;;  %v11860_v53 = vld [vmem:[#allocation83_spill] sm:$0xff]  ;;  %v11861_v54 = vld [vmem:[#allocation84_spill] sm:$0xff] }
 0x726   :  { %7707 = vmatpush1.bf16.msra.mxu1 %v11851_v27  ;;  %7739 = vmatpush1.bf16.msra.mxu0 %v11852_v6  ;;  %v11862_v27 = vld [vmem:[#allocation85_spill] sm:$0xff]  ;;  %v11863_v6 = vld [vmem:[#allocation86_spill] sm:$0xff] }
 0x727   :  { %7709 = vmatprep.subr.bf16.mxu1 %v11853_v13  ;;  %7741 = vmatprep.subr.bf16.mxu0 %v11854_v8  ;;  %v11864_v13 = vld [vmem:[#allocation87_spill] sm:$0xff]  ;;  %v11865_v8 = vld [vmem:[#allocation88_spill] sm:$0xff] }
 0x72a   :  { %7711 = vmatpush1.bf16.msra.mxu1 %v11855_v62  ;;  %7743 = vmatpush1.bf16.msra.mxu0 %v11856_v26  ;;  %v11866_v62 = vld [vmem:[#allocation89_spill] sm:$0xff]  ;;  %v11867_v26 = vld [vmem:[#allocation90_spill] sm:$0xff] }
 0x72b   :  { %7713 = vmatprep.subr.bf16.mxu1 %v11857_v55  ;;  %7745 = vmatprep.subr.bf16.mxu0 %v11858_v45  ;;  %v11868_v55 = vld [vmem:[#allocation91_spill] sm:$0xff]  ;;  %v11869_v45 = vld [vmem:[#allocation92_spill] sm:$0xff] }
 0x72e   :  { %7715 = vmatpush1.bf16.msra.mxu1 %v11859_v21  ;;  %7747 = vmatpush1.bf16.msra.mxu0 %v11860_v53  ;;  %v11870_v21 = vld [vmem:[#allocation93_spill] sm:$0xff] }
 0x72f   :  { %7717 = vmatprep.subr.bf16.mxu1 %v11861_v54  ;;  %7749 = vmatprep.subr.bf16.mxu0 %v11862_v27 }
 0x732   :  { %7719 = vmatpush1.bf16.msra.mxu1 %v11863_v6  ;;  %7751 = vmatpush1.bf16.msra.mxu0 %v11864_v13 }
 0x733   :  { %7721 = vmatprep.subr.bf16.mxu1 %v11865_v8  ;;  %7753 = vmatprep.subr.bf16.mxu0 %v11866_v62 }
 0x736   :  { %7723 = vmatpush1.bf16.msra.mxu1 %v11867_v26  ;;  %7755 = vmatpush1.bf16.msra.mxu0 %v11868_v55 }
 0x737   :  { %7757 = vmatprep.subr.bf16.mxu1 %v11869_v45  ;;  %7789 = vmatprep.subr.bf16.mxu0 %v11870_v21 }
 0x7ac   :  { %v3048_v53 = vpop.f32.mrb[14].mxu1  ;;  %v3119_v54 = vpop.f32.mrb[22].mxu0 }
 0x7ad   :  { %v3124_v27 = vadd.f32 %v3048_v53, %v11871_v36  ;;  %v3050_v15 = vpop.f32.mrb[15].mxu1  ;;  %v3121_v6 = vpop.f32.mrb[23].mxu0  ;;  %v3126_v55 = vadd.f32 %v3119_v54, %v10124_v57 }
 0x7ae   :  { %v3125_v13 = vadd.f32 %v3050_v15, %v11779_v58  ;;  %v3127_v26 = vadd.f32 %v3121_v6, %v11686_v7 }
 0x7af   :  { %v6150_v33 = vmul.f32 -1.442695, %v3124_v27 }
 0x7b0   :  { %v6151_v8 = vmul.f32 -1.442695, %v3125_v13  ;;  %v6152_v62 = vmul.f32 -1.442695, %v3127_v26 }
 0x7b1   :  { %8905 = vpow2.f32 %v6150_v33 }
 0x7b2   :  { %8907 = vpow2.f32 %v6151_v8 }
 0x7b3   :  { %8909 = vpow2.f32 %v6152_v62 }
 0x7b4   :  { %8911 = vtanh.f32 %v3126_v55  ;;  %v11877_v55 = vld [vmem:[#allocation101_spill] sm:$0xff] }
 0x7bb   :  { %v8906_v45 = vpop.eup %8905 }
 0x7bc   :  { %v8908_v48 = vpop.eup %8907  ;;  %v3131_v21 = vadd.f32 1.0, %v8906_v45  ;;  %v11878_v45 = vld [vmem:[#allocation102_spill] sm:$0xff] }
 0x7bd   :  { %v3137_v28 = vadd.f32 1.0, %v8908_v48  ;;  %v8910_v53 = vpop.eup %8909  ;;  %v11873_v48 = vld [vmem:[#allocation97_spill] sm:$0xff] }
 0x7be   :  { %8913 = vrcp.f32 %v3131_v21  ;;  %v8912_v36 = vpop.eup %8911  ;;  %v3144_v33 = vadd.f32 1.0, %v8910_v53  ;;  %v11876_v21 = vld [vmem:[#allocation100_spill] sm:$0xff]  ;;  %v11879_v53 = vld [vmem:[#allocation103_spill] sm:$0xff] }
 0x7bf   :  { %8915 = vrcp.f32 %v3137_v28  ;;  %v11872_v28 = vld [vmem:[#allocation96_spill] sm:$0xff] }
 0x7c0   :  { %8917 = vrcp.f32 %v3144_v33  ;;  %v11883_v33 = vld [vmem:[#allocation107_spill] sm:$0xff] }
 0x7c8   :  { %v8914_v15 = vpop.eup %8913 }
 0x7c9   :  { %v8916_v27 = vpop.eup %8915  ;;  %v3148_v13 = vmul.f32 %v8914_v15, %v8912_v36  ;;  %v11875_v36 = vld [vmem:[#allocation99_spill] sm:$0xff]  ;;  %v11880_v15 = vld [vmem:[#allocation104_spill] sm:$0xff] }
 0x7ca   :  { %v3147_v8 = vmul.f32 %v8916_v27, %v10435_v18  ;;  %v8918_v54 = vpop.eup %8917  ;;  %v11874_v18 = vld [vmem:[#allocation98_spill] sm:$0xff]  ;;  %v11881_v27 = vld [vmem:[#allocation105_spill] sm:$0xff] }
 0x7cc   :  { %v10589_v6 = vadd.f32 %v3148_v13, %v3147_v8  ;;  %v11882_v13 = vld [vmem:[#allocation106_spill] sm:$0xff]  ;;  %v11884_v8 = vld [vmem:[#allocation108_spill] sm:$0xff] }
 0x7ce   :  { %8919 = vtanh.f32 %v10589_v6 }
 0x7d8   :  { %v8920_v26 = vpop.eup %8919 }
 0x7d9   :  { %v3151_v62 = vmul.f32 %v8920_v26, %v8918_v54  ;;  %v11885_v54 = vld [vmem:[#allocation109_spill] sm:$0xff] }
 0x7db   :  { %3529 = vmatmul.mubr.f32.vlgmr.msra.gmra.mrb[18].mxu1 %v3151_v62  ;;  %3600 = vmatmul.mubr.f32.vlgmr.msra.gmra.mrb[26].mxu0 %v3151_v62 }
 0x7dc   :  { %7759 = vmatpush1.bf16.msra.mxu1 %v11688_v60  ;;  %7791 = vmatpush1.bf16.msra.mxu0 %v11780_v39 }
 0x7dd   :  { %7761 = vmatprep.subr.bf16.mxu1 %v11872_v28  ;;  %7793 = vmatprep.subr.bf16.mxu0 %v11873_v48  ;;  %v11895_v48 = vld [vmem:[#allocation118_spill] sm:$0xff] }
 0x7de   :  { %3670 = vmatprep.mubr.f32.mxu1 %v11470_v5  ;;  %3741 = vmatprep.mubr.f32.mxu0 %v11470_v5 }
 0x7e0   :  { %7763 = vmatpush1.bf16.msra.mxu1 %v11874_v18  ;;  %7795 = vmatpush1.bf16.msra.mxu0 %v11875_v36  ;;  %v11889_v18 = vld [vmem:[#allocation112_spill] sm:$0xff] }
 0x7e1   :  { %7765 = vmatprep.subr.bf16.mxu1 %v11876_v21  ;;  %7797 = vmatprep.subr.bf16.mxu0 %v11877_v55  ;;  %v11886_v21 = vld [vmem:[#allocation110_spill] sm:$0xff]  ;;  %v11887_v55 = vld [vmem:[#allocation111_spill] sm:$0xff] }
 0x7e4   :  { %7767 = vmatpush1.bf16.msra.mxu1 %v11878_v45  ;;  %7799 = vmatpush1.bf16.msra.mxu0 %v11879_v53  ;;  %v11888_v45 = vld [vmem:[#allocation124_spill] sm:$0xff] }
 0x7e5   :  { %7769 = vmatprep.subr.bf16.mxu1 %v11880_v15  ;;  %7801 = vmatprep.subr.bf16.mxu0 %v11881_v27  ;;  %v11890_v27 = vld [vmem:[#allocation113_spill] sm:$0xff] }
 0x7e8   :  { %7771 = vmatpush1.bf16.msra.mxu1 %v11882_v13  ;;  %7803 = vmatpush1.bf16.msra.mxu0 %v11883_v33 }
 0x7e9   :  { %7773 = vmatprep.subr.bf16.mxu1 %v11884_v8  ;;  %7805 = vmatprep.subr.bf16.mxu0 %v11885_v54  ;;  %v11891_v54 = vld [vmem:[#allocation115_spill] sm:$0xff] }
 0x7ec   :  { %v3360_v26 = vpop.f32.mrb[16].mxu1  ;;  %v3431_v62 = vpop.f32.mrb[24].mxu0  ;;  %7775 = vmatpush1.bf16.msra.mxu1 %v11886_v21  ;;  %7807 = vmatpush1.bf16.msra.mxu0 %v11887_v55  ;;  %v11892_v21 = vld [vmem:[#allocation116_spill] sm:$0xff]  ;;  %v11893_v55 = vld [vmem:[#allocation117_spill] sm:$0xff] }
 0x7ed   :  { %v3436_v53 = vadd.f32 %v3360_v26, %v11888_v45  ;;  %v3362_v36 = vpop.f32.mrb[17].mxu1  ;;  %v3433_v15 = vpop.f32.mrb[25].mxu0  ;;  %7777 = vmatprep.subr.bf16.mxu1 %v11889_v18  ;;  %7809 = vmatprep.subr.bf16.mxu0 %v11890_v27  ;;  %v11894_v26 = vld [vmem:[#allocation126_spill] sm:$0xff]  ;;  %v11896_v18 = vld [vmem:[#allocation119_spill] sm:$0xff]  ;;  %v11897_v27 = vld [vmem:[#allocation120_spill] sm:$0xff] }
 0x7ee   :  { %v3437_v33 = vadd.f32 %v3362_v36, %v11616_v24  ;;  %v3439_v45 = vadd.f32 %v3433_v15, %v11894_v26  ;;  %v11898_v36 = vld [vmem:[#allocation121_spill] sm:$0xff] }
 0x7ef   :  { %v6153_v13 = vmul.f32 -1.442695, %v3436_v53 }
 0x7f0   :  { %v6154_v8 = vmul.f32 -1.442695, %v3437_v33  ;;  %7779 = vmatpush1.bf16.msra.mxu1 %v11617_v46  ;;  %7811 = vmatpush1.bf16.msra.mxu0 %v11891_v54  ;;  %v6155_v53 = vmul.f32 -1.442695, %v3439_v45  ;;  %v11899_v33 = vld [vmem:[#allocation122_spill] sm:$0xff]  ;;  %v11900_v54 = vld [vmem:[#allocation123_spill] sm:$0xff] }
 0x7f1   :  { %8921 = vpow2.f32 %v6153_v13  ;;  %7781 = vmatprep.subr.bf16.mxu1 %v11892_v21  ;;  %7813 = vmatprep.subr.bf16.mxu0 %v11893_v55  ;;  %v11901_v13 = vld [vmem:[#allocation127_spill] sm:$0xff] }
 0x7f2   :  { %8923 = vpow2.f32 %v6154_v8  ;;  %v3438_v21 = vadd.f32 %v3431_v62, %v11901_v13  ;;  %v11902_v8 = vld [vmem:[#allocation25_spill] sm:$0xff] }
 0x7f3   :  { %8925 = vpow2.f32 %v6155_v53 }
 0x7f4   :  { %7783 = vmatpush1.bf16.msra.mxu1 %v11895_v48  ;;  %7815 = vmatpush1.bf16.msra.mxu0 %v11896_v18  ;;  %8927 = vtanh.f32 %v3438_v21  ;;  %v11906_v21 = vld [vmem:[#allocation28_spill] sm:$0xff] }
 0x7f5   :  { %7785 = vmatprep.subr.bf16.mxu1 %v11897_v27  ;;  %7817 = vmatprep.subr.bf16.mxu0 %v11898_v36 }
 0x7f8   :  { %7787 = vmatpush1.bf16.msra.mxu1 %v11899_v33  ;;  %7819 = vmatpush1.bf16.msra.mxu0 %v11900_v54 }
 0x7f9   :  { %7821 = vmatprep.subr.bf16.mxu1 %v11628_v2  ;;  %7853 = vmatprep.subr.bf16.mxu0 %v11902_v8 }
 0x7fb   :  { %v8922_v15 = vpop.eup %8921 }
 0x7fc   :  { %v8924_v26 = vpop.eup %8923  ;;  %v3443_v48 = vadd.f32 1.0, %v8922_v15 }
 0x7fd   :  { %v3449_v18 = vadd.f32 1.0, %v8924_v26  ;;  %v8926_v36 = vpop.eup %8925  ;;  %v11910_v26 = vld [vmem:[#allocation30_spill] sm:$0xff] }
 0x7fe   :  { %8929 = vrcp.f32 %v3443_v48  ;;  %v8928_v45 = vpop.eup %8927  ;;  %v3456_v54 = vadd.f32 1.0, %v8926_v36  ;;  %v11904_v48 = vld [vmem:[#allocation27_spill] sm:$0xff]  ;;  %v11911_v36 = vld [vmem:[#allocation44_spill] sm:$0xff] }
 0x7ff   :  { %8931 = vrcp.f32 %v3449_v18  ;;  %v11905_v18 = vld [vmem:[#allocation41_spill] sm:$0xff] }
 0x800   :  { %8933 = vrcp.f32 %v3456_v54  ;;  %v11909_v54 = vld [vmem:[#allocation43_spill] sm:$0xff] }
 0x808   :  { %v8930_v27 = vpop.eup %8929 }
 0x809   :  { %v8932_v33 = vpop.eup %8931  ;;  %v3460_v55 = vmul.f32 %v8930_v27, %v8928_v45  ;;  %v11908_v27 = vld [vmem:[#allocation29_spill] sm:$0xff]  ;;  %v11914_v45 = vld [vmem:[#allocation32_spill] sm:$0xff] }
 0x80a   :  { %v3459_v62 = vmul.f32 %v8932_v33, %v10477_v12  ;;  %v8934_v8 = vpop.eup %8933  ;;  %v11903_v12 = vld [vmem:[#allocation40_spill] sm:$0xff]  ;;  %v11912_v33 = vld [vmem:[#allocation31_spill] sm:$0xff] }
 0x80c   :  { %v10631_v13 = vadd.f32 %v3460_v55, %v3459_v62  ;;  %v11907_v55 = vld [vmem:[#allocation42_spill] sm:$0xff] }
 0x80d   :  { %v11915_v62 = vld [vmem:[#allocation46_spill] sm:$0xff] }
 0x80e   :  { %8935 = vtanh.f32 %v10631_v13 }
 0x818   :  { %v8936_v15 = vpop.eup %8935 }
 0x819   :  { %v3463_v53 = vmul.f32 %v8936_v15, %v8934_v8  ;;  %v11913_v8 = vld [vmem:[#allocation45_spill] sm:$0xff] }
 0x81a   :  { %v11916_v15 = vld [vmem:[#allocation33_spill] sm:$0xff] }
 0x81b   :  { %3671 = vmatmul.mubr.f32.vlgmr.msra.gmra.mrb[18].mxu1 %v3463_v53  ;;  %3742 = vmatmul.mubr.f32.vlgmr.msra.gmra.mrb[26].mxu0 %v3463_v53 }
 0x81c   :  { %7823 = vmatpush1.bf16.msra.mxu1 %v9557_v31  ;;  %7855 = vmatpush1.bf16.msra.mxu0 %v9657_v41 }
 0x81d   :  { %7825 = vmatprep.subr.bf16.mxu1 %v9559_v34  ;;  %7857 = vmatprep.subr.bf16.mxu0 %v9659_v47 }
 0x81e   :  { %3840 = vmatprep.mubr.f32.mxu1 %v11470_v5  ;;  %3911 = vmatprep.mubr.f32.mxu0 %v11470_v5 }
 0x820   :  { %7827 = vmatpush1.bf16.msra.mxu1 %v9562_v38  ;;  %7859 = vmatpush1.bf16.msra.mxu0 %v9662_v56 }
 0x821   :  { %7829 = vmatprep.subr.bf16.mxu1 %v9565_v43  ;;  %7861 = vmatprep.subr.bf16.mxu0 %v9665_v63 }
 0x824   :  { %7831 = vmatpush1.bf16.msra.mxu1 %v9568_v50  ;;  %7863 = vmatpush1.bf16.msra.mxu0 %v9668_v11 }
 0x825   :  { %7833 = vmatprep.subr.bf16.mxu1 %v9571_v52  ;;  %7865 = vmatprep.subr.bf16.mxu0 %v9671_v14 }
 0x828   :  { %7835 = vmatpush1.bf16.msra.mxu1 %v9574_v59  ;;  %7867 = vmatpush1.bf16.msra.mxu0 %v9674_v32 }
 0x829   :  { %7837 = vmatprep.subr.bf16.mxu1 %v9577_v61  ;;  %7869 = vmatprep.subr.bf16.mxu0 %v9677_v35 }
 0x82c   :  { %7839 = vmatpush1.bf16.msra.mxu1 %v9582_v3  ;;  %7871 = vmatpush1.bf16.msra.mxu0 %v9680_v49 }
 0x82d   :  { %7841 = vmatprep.subr.bf16.mxu1 %v9585_v4  ;;  %7873 = vmatprep.subr.bf16.mxu0 %v9684_v51 }
 0x830   :  { %7843 = vmatpush1.bf16.msra.mxu1 %v9589_v9  ;;  %7875 = vmatpush1.bf16.msra.mxu0 %v9687_v25 }
 0x831   :  { %7845 = vmatprep.subr.bf16.mxu1 %v9592_v10  ;;  %7877 = vmatprep.subr.bf16.mxu0 %v9690_v40 }
 0x834   :  { %7847 = vmatpush1.bf16.msra.mxu1 %v9596_v16  ;;  %7879 = vmatpush1.bf16.msra.mxu0 %v9693_v19 }
 0x835   :  { %7849 = vmatprep.subr.bf16.mxu1 %v9599_v17  ;;  %7881 = vmatprep.subr.bf16.mxu0 %v9696_v20 }
 0x838   :  { %7851 = vmatpush1.bf16.msra.mxu1 %v9602_v22  ;;  %7883 = vmatpush1.bf16.msra.mxu0 %v9699_v42 }
 0x839   :  { %7885 = vmatprep.subr.bf16.mxu1 %v9605_v23  ;;  %7917 = vmatprep.subr.bf16.mxu0 %v9702_v44 }
 0x83b   :  { %3841 = vmatmul.mubr.f32.vlgmr.msra.gmra.mrb[20].mxu1 %v3463_v53  ;;  %3912 = vmatmul.mubr.f32.vlgmr.msra.gmra.mrb[28].mxu0 %v3463_v53  ;;  %v11917_v53 = vld [vmem:[#allocation47_spill] sm:$0xff] }
 0x83c   :  { %7887 = vmatpush1.bf16.msra.mxu1 %v9608_v29  ;;  %7919 = vmatpush1.bf16.msra.mxu0 %v9705_v0 }
 0x83d   :  { %7889 = vmatprep.subr.bf16.mxu1 %v9611_v30  ;;  %7921 = vmatprep.subr.bf16.mxu0 %v9708_v1 }
 0x83e   :  { %3982 = vmatprep.mubr.f32.mxu1 %v11470_v5  ;;  %4053 = vmatprep.mubr.f32.mxu0 %v11470_v5 }
 0x840   :  { %7891 = vmatpush1.bf16.msra.mxu1 %v9615_v37  ;;  %7923 = vmatpush1.bf16.msra.mxu0 %v11903_v12 }
 0x841   :  { %7893 = vmatprep.subr.bf16.mxu1 %v11904_v48  ;;  %7925 = vmatprep.subr.bf16.mxu0 %v11905_v18 }
 0x844   :  { %7895 = vmatpush1.bf16.msra.mxu1 %v11906_v21  ;;  %7927 = vmatpush1.bf16.msra.mxu0 %v11907_v55  ;;  %v11918_v55 = vld [vmem:[#allocation34_spill] sm:$0xff]  ;;  %v11963_v21 = vld [vmem:[#allocation57_spill] sm:$0xff] }
 0x845   :  { %7897 = vmatprep.subr.bf16.mxu1 %v11908_v27  ;;  %7929 = vmatprep.subr.bf16.mxu0 %v11909_v54  ;;  %v11919_v27 = vld [vmem:[#allocation48_spill] sm:$0xff]  ;;  %v11920_v54 = vld [vmem:[#allocation35_spill] sm:$0xff] }
 0x848   :  { %7899 = vmatpush1.bf16.msra.mxu1 %v11910_v26  ;;  %7931 = vmatpush1.bf16.msra.mxu0 %v11911_v36  ;;  %v11921_v26 = vld [vmem:[#allocation49_spill] sm:$0xff]  ;;  %v11922_v36 = vld [vmem:[#allocation36_spill] sm:$0xff] }
 0x849   :  { %7901 = vmatprep.subr.bf16.mxu1 %v11912_v33  ;;  %7933 = vmatprep.subr.bf16.mxu0 %v11913_v8  ;;  %v11923_v33 = vld [vmem:[#allocation50_spill] sm:$0xff]  ;;  %v11924_v8 = vld [vmem:[#allocation37_spill] sm:$0xff] }
 0x84c   :  { %7903 = vmatpush1.bf16.msra.mxu1 %v11914_v45  ;;  %7935 = vmatpush1.bf16.msra.mxu0 %v11915_v62  ;;  %v11925_v45 = vld [vmem:[#allocation51_spill] sm:$0xff]  ;;  %v11926_v62 = vld [vmem:[#allocation38_spill] sm:$0xff] }
 0x84d   :  { %7905 = vmatprep.subr.bf16.mxu1 %v11916_v15  ;;  %7937 = vmatprep.subr.bf16.mxu0 %v11917_v53  ;;  %v11927_v15 = vld [vmem:[#allocation52_spill] sm:$0xff]  ;;  %v11928_v53 = vld [vmem:[#allocation53_spill] sm:$0xff] }
 0x850   :  { %7907 = vmatpush1.bf16.msra.mxu1 %v11918_v55  ;;  %7939 = vmatpush1.bf16.msra.mxu0 %v11919_v27  ;;  %v11929_v55 = vld [vmem:[#allocation54_spill] sm:$0xff]  ;;  %v11930_v27 = vld [vmem:[#allocation68_spill] sm:$0xff] }
 0x851   :  { %7909 = vmatprep.subr.bf16.mxu1 %v11920_v54  ;;  %7941 = vmatprep.subr.bf16.mxu0 %v11921_v26  ;;  %v11931_v26 = vld [vmem:[#allocation55_spill] sm:$0xff] }
 0x852   :  { %v11945_v54 = vld [vmem:[#allocation75_spill] sm:$0xff] }
 0x854   :  { %7911 = vmatpush1.bf16.msra.mxu1 %v11922_v36  ;;  %7943 = vmatpush1.bf16.msra.mxu0 %v11923_v33  ;;  %v11932_v36 = vld [vmem:[#allocation56_spill] sm:$0xff]  ;;  %v11933_v33 = vld [vmem:[#allocation58_spill] sm:$0xff] }
 0x855   :  { %7913 = vmatprep.subr.bf16.mxu1 %v11924_v8  ;;  %7945 = vmatprep.subr.bf16.mxu0 %v11925_v45  ;;  %v11934_v8 = vld [vmem:[#allocation59_spill] sm:$0xff]  ;;  %v11944_v45 = vld [vmem:[#allocation73_spill] sm:$0xff] }
 0x858   :  { %7915 = vmatpush1.bf16.msra.mxu1 %v11926_v62  ;;  %7947 = vmatpush1.bf16.msra.mxu0 %v11927_v15  ;;  %v11935_v15 = vld [vmem:[#allocation60_spill] sm:$0xff] }
 0x859   :  { %7949 = vmatprep.subr.bf16.mxu1 %v11928_v53  ;;  %7981 = vmatprep.subr.bf16.mxu0 %v11929_v55  ;;  %v11936_v53 = vld [vmem:[#allocation61_spill] sm:$0xff]  ;;  %v11937_v55 = vld [vmem:[#allocation63_spill] sm:$0xff]  ;;  %v11938_v62 = vld [vmem:[#allocation64_spill] sm:$0xff] }
 0x85b   :  { %3983 = vmatmul.mubr.f32.vlgmr.msra.gmra.mrb[20].mxu1 %v11930_v27  ;;  %4054 = vmatmul.mubr.f32.vlgmr.msra.gmra.mrb[28].mxu0 %v11930_v27  ;;  %v11939_v27 = vld [vmem:[#allocation66_spill] sm:$0xff] }
 0x85c   :  { %7951 = vmatpush1.bf16.msra.mxu1 %v11931_v26  ;;  %7983 = vmatpush1.bf16.msra.mxu0 %v11932_v36  ;;  %v11940_v26 = vld [vmem:[#allocation67_spill] sm:$0xff]  ;;  %v11941_v36 = vld [vmem:[#allocation69_spill] sm:$0xff] }
 0x85d   :  { %7953 = vmatprep.subr.bf16.mxu1 %v11933_v33  ;;  %7985 = vmatprep.subr.bf16.mxu0 %v11934_v8  ;;  %v11942_v33 = vld [vmem:[#allocation70_spill] sm:$0xff]  ;;  %v11943_v8 = vld [vmem:[#allocation72_spill] sm:$0xff] }
 0x85e   :  { %4152 = vmatprep.mubr.f32.mxu1 %v11470_v5  ;;  %4223 = vmatprep.mubr.f32.mxu0 %v11470_v5 }
 0x860   :  { %7955 = vmatpush1.bf16.msra.mxu1 %v11935_v15  ;;  %7987 = vmatpush1.bf16.msra.mxu0 %v11936_v53  ;;  %v11946_v15 = vld [vmem:[#allocation76_spill] sm:$0xff]  ;;  %v11947_v53 = vld [vmem:[#allocation78_spill] sm:$0xff] }
 0x861   :  { %7957 = vmatprep.subr.bf16.mxu1 %v11937_v55  ;;  %7989 = vmatprep.subr.bf16.mxu0 %v11938_v62  ;;  %v11948_v55 = vld [vmem:[#allocation79_spill] sm:$0xff]  ;;  %v11949_v62 = vld [vmem:[#allocation80_spill] sm:$0xff] }
 0x864   :  { %7959 = vmatpush1.bf16.msra.mxu1 %v11939_v27  ;;  %7991 = vmatpush1.bf16.msra.mxu0 %v11940_v26  ;;  %v11950_v27 = vld [vmem:[#allocation81_spill] sm:$0xff]  ;;  %v11951_v26 = vld [vmem:[#allocation82_spill] sm:$0xff] }
 0x865   :  { %7961 = vmatprep.subr.bf16.mxu1 %v11941_v36  ;;  %7993 = vmatprep.subr.bf16.mxu0 %v11942_v33  ;;  %v11952_v36 = vld [vmem:[#allocation83_spill] sm:$0xff]  ;;  %v11953_v33 = vld [vmem:[#allocation84_spill] sm:$0xff] }
 0x868   :  { %7963 = vmatpush1.bf16.msra.mxu1 %v11943_v8  ;;  %7995 = vmatpush1.bf16.msra.mxu0 %v11944_v45  ;;  %v11954_v8 = vld [vmem:[#allocation85_spill] sm:$0xff]  ;;  %v11955_v45 = vld [vmem:[#allocation86_spill] sm:$0xff] }
 0x869   :  { %7965 = vmatprep.subr.bf16.mxu1 %v11945_v54  ;;  %7997 = vmatprep.subr.bf16.mxu0 %v11946_v15  ;;  %v11956_v54 = vld [vmem:[#allocation87_spill] sm:$0xff]  ;;  %v11957_v15 = vld [vmem:[#allocation88_spill] sm:$0xff] }
 0x86c   :  { %7967 = vmatpush1.bf16.msra.mxu1 %v11947_v53  ;;  %7999 = vmatpush1.bf16.msra.mxu0 %v11948_v55  ;;  %v11958_v53 = vld [vmem:[#allocation89_spill] sm:$0xff]  ;;  %v11959_v55 = vld [vmem:[#allocation90_spill] sm:$0xff] }
 0x86d   :  { %7969 = vmatprep.subr.bf16.mxu1 %v11949_v62  ;;  %8001 = vmatprep.subr.bf16.mxu0 %v11950_v27  ;;  %v11960_v62 = vld [vmem:[#allocation91_spill] sm:$0xff]  ;;  %v11961_v27 = vld [vmem:[#allocation92_spill] sm:$0xff] }
 0x870   :  { %7971 = vmatpush1.bf16.msra.mxu1 %v11951_v26  ;;  %8003 = vmatpush1.bf16.msra.mxu0 %v11952_v36  ;;  %v11962_v26 = vld [vmem:[#allocation93_spill] sm:$0xff] }
 0x871   :  { %7973 = vmatprep.subr.bf16.mxu1 %v11953_v33  ;;  %8005 = vmatprep.subr.bf16.mxu0 %v11954_v8 }
 0x874   :  { %7975 = vmatpush1.bf16.msra.mxu1 %v11955_v45  ;;  %8007 = vmatpush1.bf16.msra.mxu0 %v11956_v54 }
 0x875   :  { %7977 = vmatprep.subr.bf16.mxu1 %v11957_v15  ;;  %8009 = vmatprep.subr.bf16.mxu0 %v11958_v53 }
 0x878   :  { %7979 = vmatpush1.bf16.msra.mxu1 %v11959_v55  ;;  %8011 = vmatpush1.bf16.msra.mxu0 %v11960_v62 }
 0x879   :  { %8013 = vmatprep.subr.bf16.mxu1 %v11961_v27  ;;  %8045 = vmatprep.subr.bf16.mxu0 %v11962_v26 }
 0x8ee   :  { %v3672_v36 = vpop.f32.mrb[18].mxu1  ;;  %v3743_v33 = vpop.f32.mrb[26].mxu0 }
 0x8ef   :  { %v3748_v8 = vadd.f32 %v3672_v36, %v11963_v21  ;;  %v3674_v18 = vpop.f32.mrb[19].mxu1  ;;  %v3745_v45 = vpop.f32.mrb[27].mxu0  ;;  %v3750_v62 = vadd.f32 %v3743_v33, %v10124_v57 }
 0x8f0   :  { %v3749_v54 = vadd.f32 %v3674_v18, %v11779_v58  ;;  %v3751_v55 = vadd.f32 %v3745_v45, %v11686_v7 }
 0x8f1   :  { %v6156_v48 = vmul.f32 -1.442695, %v3748_v8 }
 0x8f2   :  { %v6157_v15 = vmul.f32 -1.442695, %v3749_v54  ;;  %v6158_v53 = vmul.f32 -1.442695, %v3751_v55 }
 0x8f3   :  { %8937 = vpow2.f32 %v6156_v48 }
 0x8f4   :  { %8939 = vpow2.f32 %v6157_v15 }
 0x8f5   :  { %8941 = vpow2.f32 %v6158_v53 }
 0x8f6   :  { %8943 = vtanh.f32 %v3750_v62  ;;  %v11969_v62 = vld [vmem:[#allocation102_spill] sm:$0xff] }
 0x8fd   :  { %v8938_v27 = vpop.eup %8937 }
 0x8fe   :  { %v8940_v12 = vpop.eup %8939  ;;  %v3755_v26 = vadd.f32 1.0, %v8938_v27  ;;  %v11970_v27 = vld [vmem:[#allocation103_spill] sm:$0xff] }
 0x8ff   :  { %v3761_v37 = vadd.f32 1.0, %v8940_v12  ;;  %v8942_v36 = vpop.eup %8941  ;;  %v11966_v12 = vld [vmem:[#allocation99_spill] sm:$0xff] }
 0x900   :  { %8945 = vrcp.f32 %v3755_v26  ;;  %v8944_v21 = vpop.eup %8943  ;;  %v3768_v48 = vadd.f32 1.0, %v8942_v36  ;;  %v11968_v26 = vld [vmem:[#allocation101_spill] sm:$0xff]  ;;  %v11971_v36 = vld [vmem:[#allocation104_spill] sm:$0xff] }
 0x901   :  { %8947 = vrcp.f32 %v3761_v37  ;;  %v11964_v37 = vld [vmem:[#allocation97_spill] sm:$0xff] }
 0x902   :  { %8949 = vrcp.f32 %v3768_v48  ;;  %v11975_v48 = vld [vmem:[#allocation108_spill] sm:$0xff] }
 0x90a   :  { %v8946_v18 = vpop.eup %8945 }
 0x90b   :  { %v8948_v8 = vpop.eup %8947  ;;  %v3772_v54 = vmul.f32 %v8946_v18, %v8944_v21  ;;  %v11967_v21 = vld [vmem:[#allocation100_spill] sm:$0xff]  ;;  %v11972_v18 = vld [vmem:[#allocation105_spill] sm:$0xff] }
 0x90c   :  { %v3771_v15 = vmul.f32 %v8948_v8, %v10589_v6  ;;  %v8950_v55 = vpop.eup %8949  ;;  %v11965_v6 = vld [vmem:[#allocation98_spill] sm:$0xff] }
 0x90d   :  { %v11973_v8 = vld [vmem:[#allocation106_spill] sm:$0xff] }
 0x90e   :  { %v10743_v45 = vadd.f32 %v3772_v54, %v3771_v15  ;;  %v11974_v54 = vld [vmem:[#allocation107_spill] sm:$0xff]  ;;  %v11976_v15 = vld [vmem:[#allocation109_spill] sm:$0xff] }
 0x910   :  { %8951 = vtanh.f32 %v10743_v45 }
 0x91a   :  { %v8952_v33 = vpop.eup %8951 }
 0x91b   :  { %v3775_v53 = vmul.f32 %v8952_v33, %v8950_v55 }
 0x91d   :  { %4153 = vmatmul.mubr.f32.vlgmr.msra.gmra.mrb[22].mxu1 %v3775_v53  ;;  %4224 = vmatmul.mubr.f32.vlgmr.msra.gmra.mrb[30].mxu0 %v3775_v53  ;;  %v11977_v53 = vld [vmem:[#allocation110_spill] sm:$0xff] }
 0x91e   :  { %8015 = vmatpush1.bf16.msra.mxu1 %v11688_v60  ;;  %8047 = vmatpush1.bf16.msra.mxu0 %v11780_v39 }
 0x91f   :  { %8017 = vmatprep.subr.bf16.mxu1 %v11872_v28  ;;  %8049 = vmatprep.subr.bf16.mxu0 %v11964_v37 }
 0x920   :  { %4294 = vmatprep.mubr.f32.mxu1 %v11470_v5  ;;  %4365 = vmatprep.mubr.f32.mxu0 %v11470_v5 }
 0x922   :  { %8019 = vmatpush1.bf16.msra.mxu1 %v11965_v6  ;;  %8051 = vmatpush1.bf16.msra.mxu0 %v11966_v12  ;;  %v11980_v12 = vld [vmem:[#allocation112_spill] sm:$0xff]  ;;  %v11986_v6 = vld [vmem:[#allocation118_spill] sm:$0xff] }
 0x923   :  { %8021 = vmatprep.subr.bf16.mxu1 %v11967_v21  ;;  %8053 = vmatprep.subr.bf16.mxu0 %v11968_v26  ;;  %v11978_v26 = vld [vmem:[#allocation111_spill] sm:$0xff] }
 0x926   :  { %8023 = vmatpush1.bf16.msra.mxu1 %v11969_v62  ;;  %8055 = vmatpush1.bf16.msra.mxu0 %v11970_v27  ;;  %v11979_v62 = vld [vmem:[#allocation124_spill] sm:$0xff] }
 0x927   :  { %8025 = vmatprep.subr.bf16.mxu1 %v11971_v36  ;;  %8057 = vmatprep.subr.bf16.mxu0 %v11972_v18  ;;  %v11981_v18 = vld [vmem:[#allocation113_spill] sm:$0xff] }
 0x92a   :  { %8027 = vmatpush1.bf16.msra.mxu1 %v11973_v8  ;;  %8059 = vmatpush1.bf16.msra.mxu0 %v11974_v54 }
 0x92b   :  { %8029 = vmatprep.subr.bf16.mxu1 %v11975_v48  ;;  %8061 = vmatprep.subr.bf16.mxu0 %v11976_v15  ;;  %v11982_v15 = vld [vmem:[#allocation115_spill] sm:$0xff] }
 0x92e   :  { %v3984_v55 = vpop.f32.mrb[20].mxu1  ;;  %v4055_v33 = vpop.f32.mrb[28].mxu0  ;;  %8031 = vmatpush1.bf16.msra.mxu1 %v11977_v53  ;;  %8063 = vmatpush1.bf16.msra.mxu0 %v11978_v26  ;;  %v11983_v53 = vld [vmem:[#allocation116_spill] sm:$0xff]  ;;  %v11984_v26 = vld [vmem:[#allocation117_spill] sm:$0xff] }
 0x92f   :  { %v4060_v27 = vadd.f32 %v3984_v55, %v11979_v62  ;;  %v3986_v21 = vpop.f32.mrb[21].mxu1  ;;  %v4057_v36 = vpop.f32.mrb[29].mxu0  ;;  %8033 = vmatprep.subr.bf16.mxu1 %v11980_v12  ;;  %8065 = vmatprep.subr.bf16.mxu0 %v11981_v18  ;;  %v11985_v55 = vld [vmem:[#allocation126_spill] sm:$0xff]  ;;  %v11987_v12 = vld [vmem:[#allocation119_spill] sm:$0xff]  ;;  %v11988_v18 = vld [vmem:[#allocation120_spill] sm:$0xff] }
 0x930   :  { %v4061_v54 = vadd.f32 %v3986_v21, %v11616_v24  ;;  %v4063_v62 = vadd.f32 %v4057_v36, %v11985_v55  ;;  %v11989_v21 = vld [vmem:[#allocation121_spill] sm:$0xff] }
 0x931   :  { %v6159_v8 = vmul.f32 -1.442695, %v4060_v27 }
 0x932   :  { %v6160_v48 = vmul.f32 -1.442695, %v4061_v54  ;;  %8035 = vmatpush1.bf16.msra.mxu1 %v11617_v46  ;;  %8067 = vmatpush1.bf16.msra.mxu0 %v11982_v15  ;;  %v6161_v27 = vmul.f32 -1.442695, %v4063_v62  ;;  %v11990_v54 = vld [vmem:[#allocation122_spill] sm:$0xff]  ;;  %v11991_v15 = vld [vmem:[#allocation123_spill] sm:$0xff] }
 0x933   :  { %8953 = vpow2.f32 %v6159_v8  ;;  %8037 = vmatprep.subr.bf16.mxu1 %v11983_v53  ;;  %8069 = vmatprep.subr.bf16.mxu0 %v11984_v26  ;;  %v11992_v8 = vld [vmem:[#allocation127_spill] sm:$0xff] }
 0x934   :  { %8955 = vpow2.f32 %v6160_v48  ;;  %v4062_v53 = vadd.f32 %v4055_v33, %v11992_v8  ;;  %v11993_v48 = vld [vmem:[#allocation25_spill] sm:$0xff] }
 0x935   :  { %8957 = vpow2.f32 %v6161_v27 }
 0x936   :  { %8039 = vmatpush1.bf16.msra.mxu1 %v11986_v6  ;;  %8071 = vmatpush1.bf16.msra.mxu0 %v11987_v12  ;;  %8959 = vtanh.f32 %v4062_v53  ;;  %v12000_v53 = vld [vmem:[#allocation29_spill] sm:$0xff] }
 0x937   :  { %8041 = vmatprep.subr.bf16.mxu1 %v11988_v18  ;;  %8073 = vmatprep.subr.bf16.mxu0 %v11989_v21 }
 0x93a   :  { %8043 = vmatpush1.bf16.msra.mxu1 %v11990_v54  ;;  %8075 = vmatpush1.bf16.msra.mxu0 %v11991_v15 }
 0x93b   :  { %8077 = vmatprep.subr.bf16.mxu1 %v11628_v2  ;;  %8109 = vmatprep.subr.bf16.mxu0 %v11993_v48 }
 0x93d   :  { %v8954_v36 = vpop.eup %8953 }
 0x93e   :  { %v8956_v55 = vpop.eup %8955  ;;  %v4067_v6 = vadd.f32 1.0, %v8954_v36 }
 0x93f   :  { %v4073_v12 = vadd.f32 1.0, %v8956_v55  ;;  %v8958_v21 = vpop.eup %8957  ;;  %v12001_v55 = vld [vmem:[#allocation43_spill] sm:$0xff] }
 0x940   :  { %8961 = vrcp.f32 %v4067_v6  ;;  %v8960_v62 = vpop.eup %8959  ;;  %v4080_v15 = vadd.f32 1.0, %v8958_v21  ;;  %v11995_v6 = vld [vmem:[#allocation40_spill] sm:$0xff]  ;;  %v12002_v21 = vld [vmem:[#allocation30_spill] sm:$0xff] }
 0x941   :  { %8963 = vrcp.f32 %v4073_v12  ;;  %v11996_v12 = vld [vmem:[#allocation27_spill] sm:$0xff] }
 0x942   :  { %8965 = vrcp.f32 %v4080_v15  ;;  %v11999_v15 = vld [vmem:[#allocation42_spill] sm:$0xff] }
 0x94a   :  { %v8962_v18 = vpop.eup %8961 }
 0x94b   :  { %v8964_v54 = vpop.eup %8963  ;;  %v4084_v26 = vmul.f32 %v8962_v18, %v8960_v62  ;;  %v11998_v18 = vld [vmem:[#allocation28_spill] sm:$0xff]  ;;  %v12005_v62 = vld [vmem:[#allocation45_spill] sm:$0xff] }
 0x94c   :  { %v4083_v33 = vmul.f32 %v8964_v54, %v10631_v13  ;;  %v8966_v48 = vpop.eup %8965  ;;  %v11994_v13 = vld [vmem:[#allocation26_spill] sm:$0xff]  ;;  %v12003_v54 = vld [vmem:[#allocation44_spill] sm:$0xff] }
 0x94e   :  { %v10785_v8 = vadd.f32 %v4084_v26, %v4083_v33  ;;  %v11997_v26 = vld [vmem:[#allocation41_spill] sm:$0xff]  ;;  %v12006_v33 = vld [vmem:[#allocation32_spill] sm:$0xff] }
 0x950   :  { %8967 = vtanh.f32 %v10785_v8 }
 0x95a   :  { %v8968_v36 = vpop.eup %8967 }
 0x95b   :  { %v4087_v27 = vmul.f32 %v8968_v36, %v8966_v48  ;;  %v12004_v48 = vld [vmem:[#allocation31_spill] sm:$0xff]  ;;  %v12007_v36 = vld [vmem:[#allocation46_spill] sm:$0xff] }
 0x95d   :  { %4295 = vmatmul.mubr.f32.vlgmr.msra.gmra.mrb[22].mxu1 %v4087_v27  ;;  %4366 = vmatmul.mubr.f32.vlgmr.msra.gmra.mrb[30].mxu0 %v4087_v27 }
 0x95e   :  { %8079 = vmatpush1.bf16.msra.mxu1 %v9557_v31  ;;  %8111 = vmatpush1.bf16.msra.mxu0 %v9657_v41 }
 0x95f   :  { %8081 = vmatprep.subr.bf16.mxu1 %v9559_v34  ;;  %8113 = vmatprep.subr.bf16.mxu0 %v9659_v47 }
 0x960   :  { %4464 = vmatprep.mubr.f32.mxu1 %v11470_v5  ;;  %4535 = vmatprep.mubr.f32.mxu0 %v11470_v5 }
 0x962   :  { %8083 = vmatpush1.bf16.msra.mxu1 %v9562_v38  ;;  %8115 = vmatpush1.bf16.msra.mxu0 %v9662_v56 }
 0x963   :  { %8085 = vmatprep.subr.bf16.mxu1 %v9565_v43  ;;  %8117 = vmatprep.subr.bf16.mxu0 %v9665_v63 }
 0x966   :  { %8087 = vmatpush1.bf16.msra.mxu1 %v9568_v50  ;;  %8119 = vmatpush1.bf16.msra.mxu0 %v9668_v11 }
 0x967   :  { %8089 = vmatprep.subr.bf16.mxu1 %v9571_v52  ;;  %8121 = vmatprep.subr.bf16.mxu0 %v9671_v14 }
 0x96a   :  { %8091 = vmatpush1.bf16.msra.mxu1 %v9574_v59  ;;  %8123 = vmatpush1.bf16.msra.mxu0 %v9674_v32 }
 0x96b   :  { %8093 = vmatprep.subr.bf16.mxu1 %v9577_v61  ;;  %8125 = vmatprep.subr.bf16.mxu0 %v9677_v35 }
 0x96e   :  { %8095 = vmatpush1.bf16.msra.mxu1 %v9582_v3  ;;  %8127 = vmatpush1.bf16.msra.mxu0 %v9680_v49 }
 0x96f   :  { %8097 = vmatprep.subr.bf16.mxu1 %v9585_v4  ;;  %8129 = vmatprep.subr.bf16.mxu0 %v9684_v51 }
 0x972   :  { %8099 = vmatpush1.bf16.msra.mxu1 %v9589_v9  ;;  %8131 = vmatpush1.bf16.msra.mxu0 %v9687_v25 }
 0x973   :  { %8101 = vmatprep.subr.bf16.mxu1 %v9592_v10  ;;  %8133 = vmatprep.subr.bf16.mxu0 %v9690_v40 }
 0x976   :  { %8103 = vmatpush1.bf16.msra.mxu1 %v9596_v16  ;;  %8135 = vmatpush1.bf16.msra.mxu0 %v9693_v19 }
 0x977   :  { %8105 = vmatprep.subr.bf16.mxu1 %v9599_v17  ;;  %8137 = vmatprep.subr.bf16.mxu0 %v9696_v20 }
 0x97a   :  { %8107 = vmatpush1.bf16.msra.mxu1 %v9602_v22  ;;  %8139 = vmatpush1.bf16.msra.mxu0 %v9699_v42 }
 0x97b   :  { %8141 = vmatprep.subr.bf16.mxu1 %v9605_v23  ;;  %8173 = vmatprep.subr.bf16.mxu0 %v9702_v44 }
 0x97d   :  { %4465 = vmatmul.mubr.f32.vlgmr.msra.gmra.mrb[24].mxu1 %v4087_v27  ;;  %4536 = vmatmul.mubr.f32.vlgmr.msra.gmra.mrb[32].mxu0 %v4087_v27  ;;  %v12008_v27 = vld [vmem:[#allocation33_spill] sm:$0xff] }
 0x97e   :  { %8143 = vmatpush1.bf16.msra.mxu1 %v9608_v29  ;;  %8175 = vmatpush1.bf16.msra.mxu0 %v9705_v0 }
 0x97f   :  { %8145 = vmatprep.subr.bf16.mxu1 %v9611_v30  ;;  %8177 = vmatprep.subr.bf16.mxu0 %v9708_v1 }
 0x980   :  { %4606 = vmatprep.mubr.f32.mxu1 %v11470_v5  ;;  %4677 = vmatprep.mubr.f32.mxu0 %v11470_v5 }
 0x982   :  { %8147 = vmatpush1.bf16.msra.mxu1 %v11994_v13  ;;  %8179 = vmatpush1.bf16.msra.mxu0 %v11995_v6 }
 0x983   :  { %8149 = vmatprep.subr.bf16.mxu1 %v11996_v12  ;;  %8181 = vmatprep.subr.bf16.mxu0 %v11997_v26  ;;  %v12055_v26 = vld [vmem:[#allocation57_spill] sm:$0xff] }
 0x986   :  { %8151 = vmatpush1.bf16.msra.mxu1 %v11998_v18  ;;  %8183 = vmatpush1.bf16.msra.mxu0 %v11999_v15  ;;  %v12009_v18 = vld [vmem:[#allocation47_spill] sm:$0xff]  ;;  %v12010_v15 = vld [vmem:[#allocation34_spill] sm:$0xff] }
 0x987   :  { %8153 = vmatprep.subr.bf16.mxu1 %v12000_v53  ;;  %8185 = vmatprep.subr.bf16.mxu0 %v12001_v55  ;;  %v12011_v53 = vld [vmem:[#allocation48_spill] sm:$0xff]  ;;  %v12012_v55 = vld [vmem:[#allocation35_spill] sm:$0xff] }
 0x98a   :  { %8155 = vmatpush1.bf16.msra.mxu1 %v12002_v21  ;;  %8187 = vmatpush1.bf16.msra.mxu0 %v12003_v54  ;;  %v12013_v21 = vld [vmem:[#allocation49_spill] sm:$0xff]  ;;  %v12014_v54 = vld [vmem:[#allocation36_spill] sm:$0xff] }
 0x98b   :  { %8157 = vmatprep.subr.bf16.mxu1 %v12004_v48  ;;  %8189 = vmatprep.subr.bf16.mxu0 %v12005_v62  ;;  %v12015_v48 = vld [vmem:[#allocation50_spill] sm:$0xff]  ;;  %v12016_v62 = vld [vmem:[#allocation37_spill] sm:$0xff] }
 0x98e   :  { %8159 = vmatpush1.bf16.msra.mxu1 %v12006_v33  ;;  %8191 = vmatpush1.bf16.msra.mxu0 %v12007_v36  ;;  %v12017_v33 = vld [vmem:[#allocation51_spill] sm:$0xff]  ;;  %v12018_v36 = vld [vmem:[#allocation38_spill] sm:$0xff] }
 0x98f   :  { %8161 = vmatprep.subr.bf16.mxu1 %v12008_v27  ;;  %8193 = vmatprep.subr.bf16.mxu0 %v12009_v18  ;;  %v12019_v27 = vld [vmem:[#allocation52_spill] sm:$0xff]  ;;  %v12020_v18 = vld [vmem:[#allocation53_spill] sm:$0xff] }
 0x992   :  { %8163 = vmatpush1.bf16.msra.mxu1 %v12010_v15  ;;  %8195 = vmatpush1.bf16.msra.mxu0 %v12011_v53  ;;  %v12021_v15 = vld [vmem:[#allocation54_spill] sm:$0xff]  ;;  %v12022_v53 = vld [vmem:[#allocation77_spill] sm:$0xff] }
 0x993   :  { %8165 = vmatprep.subr.bf16.mxu1 %v12012_v55  ;;  %8197 = vmatprep.subr.bf16.mxu0 %v12013_v21  ;;  %v12023_v21 = vld [vmem:[#allocation55_spill] sm:$0xff] }
 0x994   :  { %v12037_v55 = vld [vmem:[#allocation75_spill] sm:$0xff] }
 0x996   :  { %8167 = vmatpush1.bf16.msra.mxu1 %v12014_v54  ;;  %8199 = vmatpush1.bf16.msra.mxu0 %v12015_v48  ;;  %v12024_v54 = vld [vmem:[#allocation56_spill] sm:$0xff]  ;;  %v12025_v48 = vld [vmem:[#allocation58_spill] sm:$0xff] }
 0x997   :  { %8169 = vmatprep.subr.bf16.mxu1 %v12016_v62  ;;  %8201 = vmatprep.subr.bf16.mxu0 %v12017_v33  ;;  %v12026_v62 = vld [vmem:[#allocation59_spill] sm:$0xff]  ;;  %v12036_v33 = vld [vmem:[#allocation73_spill] sm:$0xff] }
 0x99a   :  { %8171 = vmatpush1.bf16.msra.mxu1 %v12018_v36  ;;  %8203 = vmatpush1.bf16.msra.mxu0 %v12019_v27  ;;  %v12027_v27 = vld [vmem:[#allocation60_spill] sm:$0xff] }
 0x99b   :  { %8205 = vmatprep.subr.bf16.mxu1 %v12020_v18  ;;  %8237 = vmatprep.subr.bf16.mxu0 %v12021_v15  ;;  %v12028_v18 = vld [vmem:[#allocation61_spill] sm:$0xff]  ;;  %v12029_v15 = vld [vmem:[#allocation63_spill] sm:$0xff]  ;;  %v12030_v36 = vld [vmem:[#allocation64_spill] sm:$0xff] }
 0x99d   :  { %4607 = vmatmul.mubr.f32.vlgmr.msra.gmra.mrb[24].mxu1 %v12022_v53  ;;  %4678 = vmatmul.mubr.f32.vlgmr.msra.gmra.mrb[32].mxu0 %v12022_v53  ;;  %v12031_v53 = vld [vmem:[#allocation66_spill] sm:$0xff] }
 0x99e   :  { %8207 = vmatpush1.bf16.msra.mxu1 %v12023_v21  ;;  %8239 = vmatpush1.bf16.msra.mxu0 %v12024_v54  ;;  %v12032_v21 = vld [vmem:[#allocation67_spill] sm:$0xff]  ;;  %v12033_v54 = vld [vmem:[#allocation69_spill] sm:$0xff] }
 0x99f   :  { %8209 = vmatprep.subr.bf16.mxu1 %v12025_v48  ;;  %8241 = vmatprep.subr.bf16.mxu0 %v12026_v62  ;;  %v12034_v48 = vld [vmem:[#allocation70_spill] sm:$0xff]  ;;  %v12035_v62 = vld [vmem:[#allocation72_spill] sm:$0xff] }
 0x9a0   :  { %4776 = vmatprep.mubr.f32.mxu1 %v11470_v5  ;;  %4847 = vmatprep.mubr.f32.mxu0 %v11470_v5 }
 0x9a2   :  { %8211 = vmatpush1.bf16.msra.mxu1 %v12027_v27  ;;  %8243 = vmatpush1.bf16.msra.mxu0 %v12028_v18  ;;  %v12038_v27 = vld [vmem:[#allocation76_spill] sm:$0xff]  ;;  %v12039_v18 = vld [vmem:[#allocation78_spill] sm:$0xff] }
 0x9a3   :  { %8213 = vmatprep.subr.bf16.mxu1 %v12029_v15  ;;  %8245 = vmatprep.subr.bf16.mxu0 %v12030_v36  ;;  %v12040_v15 = vld [vmem:[#allocation79_spill] sm:$0xff]  ;;  %v12041_v36 = vld [vmem:[#allocation80_spill] sm:$0xff] }
 0x9a6   :  { %8215 = vmatpush1.bf16.msra.mxu1 %v12031_v53  ;;  %8247 = vmatpush1.bf16.msra.mxu0 %v12032_v21  ;;  %v12042_v53 = vld [vmem:[#allocation81_spill] sm:$0xff]  ;;  %v12043_v21 = vld [vmem:[#allocation82_spill] sm:$0xff] }
 0x9a7   :  { %8217 = vmatprep.subr.bf16.mxu1 %v12033_v54  ;;  %8249 = vmatprep.subr.bf16.mxu0 %v12034_v48  ;;  %v12044_v54 = vld [vmem:[#allocation83_spill] sm:$0xff]  ;;  %v12045_v48 = vld [vmem:[#allocation84_spill] sm:$0xff] }
 0x9aa   :  { %8219 = vmatpush1.bf16.msra.mxu1 %v12035_v62  ;;  %8251 = vmatpush1.bf16.msra.mxu0 %v12036_v33  ;;  %v12046_v62 = vld [vmem:[#allocation85_spill] sm:$0xff]  ;;  %v12047_v33 = vld [vmem:[#allocation86_spill] sm:$0xff] }
 0x9ab   :  { %8221 = vmatprep.subr.bf16.mxu1 %v12037_v55  ;;  %8253 = vmatprep.subr.bf16.mxu0 %v12038_v27  ;;  %v12048_v55 = vld [vmem:[#allocation87_spill] sm:$0xff]  ;;  %v12049_v27 = vld [vmem:[#allocation88_spill] sm:$0xff] }
 0x9ae   :  { %8223 = vmatpush1.bf16.msra.mxu1 %v12039_v18  ;;  %8255 = vmatpush1.bf16.msra.mxu0 %v12040_v15  ;;  %v12050_v18 = vld [vmem:[#allocation89_spill] sm:$0xff]  ;;  %v12051_v15 = vld [vmem:[#allocation90_spill] sm:$0xff] }
 0x9af   :  { %8225 = vmatprep.subr.bf16.mxu1 %v12041_v36  ;;  %8257 = vmatprep.subr.bf16.mxu0 %v12042_v53  ;;  %v12052_v36 = vld [vmem:[#allocation91_spill] sm:$0xff]  ;;  %v12053_v53 = vld [vmem:[#allocation92_spill] sm:$0xff] }
 0x9b2   :  { %8227 = vmatpush1.bf16.msra.mxu1 %v12043_v21  ;;  %8259 = vmatpush1.bf16.msra.mxu0 %v12044_v54  ;;  %v12054_v21 = vld [vmem:[#allocation93_spill] sm:$0xff] }
 0x9b3   :  { %8229 = vmatprep.subr.bf16.mxu1 %v12045_v48  ;;  %8261 = vmatprep.subr.bf16.mxu0 %v12046_v62 }
 0x9b6   :  { %8231 = vmatpush1.bf16.msra.mxu1 %v12047_v33  ;;  %8263 = vmatpush1.bf16.msra.mxu0 %v12048_v55 }
 0x9b7   :  { %8233 = vmatprep.subr.bf16.mxu1 %v12049_v27  ;;  %8265 = vmatprep.subr.bf16.mxu0 %v12050_v18 }
 0x9ba   :  { %8235 = vmatpush1.bf16.msra.mxu1 %v12051_v15  ;;  %8267 = vmatpush1.bf16.msra.mxu0 %v12052_v36 }
 0x9bb   :  { %8269 = vmatprep.subr.bf16.mxu1 %v12053_v53  ;;  %8301 = vmatprep.subr.bf16.mxu0 %v12054_v21 }
 0xa30   :  { %v4296_v54 = vpop.f32.mrb[22].mxu1  ;;  %v4367_v48 = vpop.f32.mrb[30].mxu0 }
 0xa31   :  { %v4372_v62 = vadd.f32 %v4296_v54, %v12055_v26  ;;  %v4298_v12 = vpop.f32.mrb[23].mxu1  ;;  %v4369_v33 = vpop.f32.mrb[31].mxu0  ;;  %v4374_v36 = vadd.f32 %v4367_v48, %v10124_v57 }
 0xa32   :  { %v4373_v55 = vadd.f32 %v4298_v12, %v11779_v58  ;;  %v4375_v15 = vadd.f32 %v4369_v33, %v11686_v7 }
 0xa33   :  { %v6162_v6 = vmul.f32 -1.442695, %v4372_v62 }
 0xa34   :  { %v6163_v27 = vmul.f32 -1.442695, %v4373_v55  ;;  %v6164_v18 = vmul.f32 -1.442695, %v4375_v15 }
 0xa35   :  { %8969 = vpow2.f32 %v6162_v6 }
 0xa36   :  { %8971 = vpow2.f32 %v6163_v27 }
 0xa37   :  { %8973 = vpow2.f32 %v6164_v18 }
 0xa38   :  { %8975 = vtanh.f32 %v4374_v36  ;;  %v12061_v36 = vld [vmem:[#allocation103_spill] sm:$0xff] }
 0xa3f   :  { %v8970_v53 = vpop.eup %8969 }
 0xa40   :  { %v8972_v13 = vpop.eup %8971  ;;  %v4379_v21 = vadd.f32 1.0, %v8970_v53  ;;  %v12062_v53 = vld [vmem:[#allocation104_spill] sm:$0xff] }
 0xa41   :  { %v4385_v1 = vadd.f32 1.0, %v8972_v13  ;;  %v8974_v54 = vpop.eup %8973  ;;  %v12058_v13 = vld [vmem:[#allocation100_spill] sm:$0xff] }
 0xa42   :  { %8977 = vrcp.f32 %v4379_v21  ;;  %v8976_v26 = vpop.eup %8975  ;;  %v4392_v6 = vadd.f32 1.0, %v8974_v54  ;;  %v12060_v21 = vld [vmem:[#allocation102_spill] sm:$0xff]  ;;  %v12063_v54 = vld [vmem:[#allocation105_spill] sm:$0xff] }
 0xa43   :  { %8979 = vrcp.f32 %v4385_v1  ;;  %v12056_v1 = vld [vmem:[#allocation98_spill] sm:$0xff] }
 0xa44   :  { %8981 = vrcp.f32 %v4392_v6  ;;  %v12067_v6 = vld [vmem:[#allocation109_spill] sm:$0xff] }
 0xa4c   :  { %v8978_v12 = vpop.eup %8977 }
 0xa4d   :  { %v8980_v62 = vpop.eup %8979  ;;  %v4396_v55 = vmul.f32 %v8978_v12, %v8976_v26  ;;  %v12059_v26 = vld [vmem:[#allocation101_spill] sm:$0xff]  ;;  %v12064_v12 = vld [vmem:[#allocation106_spill] sm:$0xff] }
 0xa4e   :  { %v4395_v27 = vmul.f32 %v8980_v62, %v10743_v45  ;;  %v8982_v15 = vpop.eup %8981  ;;  %v12057_v45 = vld [vmem:[#allocation99_spill] sm:$0xff] }
 0xa4f   :  { %v12065_v62 = vld [vmem:[#allocation107_spill] sm:$0xff] }
 0xa50   :  { %v10897_v33 = vadd.f32 %v4396_v55, %v4395_v27  ;;  %v12066_v55 = vld [vmem:[#allocation108_spill] sm:$0xff] }
 0xa52   :  { %8983 = vtanh.f32 %v10897_v33 }
 0xa5c   :  { %v8984_v48 = vpop.eup %8983 }
 0xa5d   :  { %v4399_v18 = vmul.f32 %v8984_v48, %v8982_v15  ;;  %v12068_v48 = vld [vmem:[#allocation110_spill] sm:$0xff] }
 0xa5f   :  { %4777 = vmatmul.mubr.f32.vlgmr.msra.gmra.mrb[26].mxu1 %v4399_v18  ;;  %4848 = vmatmul.mubr.f32.vlgmr.msra.gmra.mrb[34].mxu0 %v4399_v18  ;;  %v12069_v18 = vld [vmem:[#allocation111_spill] sm:$0xff] }
 0xa60   :  { %8271 = vmatpush1.bf16.msra.mxu1 %v11688_v60  ;;  %8303 = vmatpush1.bf16.msra.mxu0 %v11780_v39 }
 0xa61   :  { %8273 = vmatprep.subr.bf16.mxu1 %v11872_v28  ;;  %8305 = vmatprep.subr.bf16.mxu0 %v11964_v37 }
 0xa62   :  { %4918 = vmatprep.mubr.f32.mxu1 %v11470_v5  ;;  %4989 = vmatprep.mubr.f32.mxu0 %v11470_v5 }
 0xa64   :  { %8275 = vmatpush1.bf16.msra.mxu1 %v12056_v1  ;;  %8307 = vmatpush1.bf16.msra.mxu0 %v12057_v45  ;;  %v12077_v45 = vld [vmem:[#allocation118_spill] sm:$0xff] }
 0xa65   :  { %8277 = vmatprep.subr.bf16.mxu1 %v12058_v13  ;;  %8309 = vmatprep.subr.bf16.mxu0 %v12059_v26  ;;  %v12071_v13 = vld [vmem:[#allocation112_spill] sm:$0xff] }
 0xa68   :  { %8279 = vmatpush1.bf16.msra.mxu1 %v12060_v21  ;;  %8311 = vmatpush1.bf16.msra.mxu0 %v12061_v36  ;;  %v12070_v21 = vld [vmem:[#allocation124_spill] sm:$0xff] }
 0xa69   :  { %8281 = vmatprep.subr.bf16.mxu1 %v12062_v53  ;;  %8313 = vmatprep.subr.bf16.mxu0 %v12063_v54  ;;  %v12072_v54 = vld [vmem:[#allocation113_spill] sm:$0xff] }
 0xa6c   :  { %8283 = vmatpush1.bf16.msra.mxu1 %v12064_v12  ;;  %8315 = vmatpush1.bf16.msra.mxu0 %v12065_v62 }
 0xa6d   :  { %8285 = vmatprep.subr.bf16.mxu1 %v12066_v55  ;;  %8317 = vmatprep.subr.bf16.mxu0 %v12067_v6  ;;  %v12073_v6 = vld [vmem:[#allocation115_spill] sm:$0xff] }
 0xa70   :  { %v4608_v27 = vpop.f32.mrb[24].mxu1  ;;  %v4679_v15 = vpop.f32.mrb[32].mxu0  ;;  %8287 = vmatpush1.bf16.msra.mxu1 %v12068_v48  ;;  %8319 = vmatpush1.bf16.msra.mxu0 %v12069_v18  ;;  %v12074_v48 = vld [vmem:[#allocation116_spill] sm:$0xff]  ;;  %v12075_v18 = vld [vmem:[#allocation117_spill] sm:$0xff] }
 0xa71   :  { %v4684_v36 = vadd.f32 %v4608_v27, %v12070_v21  ;;  %v4610_v26 = vpop.f32.mrb[25].mxu1  ;;  %v4681_v53 = vpop.f32.mrb[33].mxu0  ;;  %8289 = vmatprep.subr.bf16.mxu1 %v12071_v13  ;;  %8321 = vmatprep.subr.bf16.mxu0 %v12072_v54  ;;  %v12076_v27 = vld [vmem:[#allocation126_spill] sm:$0xff]  ;;  %v12078_v13 = vld [vmem:[#allocation119_spill] sm:$0xff]  ;;  %v12079_v54 = vld [vmem:[#allocation120_spill] sm:$0xff] }
 0xa72   :  { %v4685_v62 = vadd.f32 %v4610_v26, %v11616_v24  ;;  %v4687_v21 = vadd.f32 %v4681_v53, %v12076_v27  ;;  %v12080_v26 = vld [vmem:[#allocation121_spill] sm:$0xff] }
 0xa73   :  { %v6165_v12 = vmul.f32 -1.442695, %v4684_v36 }
 0xa74   :  { %v6166_v55 = vmul.f32 -1.442695, %v4685_v62  ;;  %8291 = vmatpush1.bf16.msra.mxu1 %v11617_v46  ;;  %8323 = vmatpush1.bf16.msra.mxu0 %v12073_v6  ;;  %v6167_v36 = vmul.f32 -1.442695, %v4687_v21  ;;  %v12081_v62 = vld [vmem:[#allocation122_spill] sm:$0xff]  ;;  %v12082_v6 = vld [vmem:[#allocation123_spill] sm:$0xff] }
 0xa75   :  { %8985 = vpow2.f32 %v6165_v12  ;;  %8293 = vmatprep.subr.bf16.mxu1 %v12074_v48  ;;  %8325 = vmatprep.subr.bf16.mxu0 %v12075_v18  ;;  %v12083_v12 = vld [vmem:[#allocation127_spill] sm:$0xff] }
 0xa76   :  { %8987 = vpow2.f32 %v6166_v55  ;;  %v4686_v48 = vadd.f32 %v4679_v15, %v12083_v12  ;;  %v12084_v55 = vld [vmem:[#allocation25_spill] sm:$0xff] }
 0xa77   :  { %8989 = vpow2.f32 %v6167_v36 }
 0xa78   :  { %8295 = vmatpush1.bf16.msra.mxu1 %v12077_v45  ;;  %8327 = vmatpush1.bf16.msra.mxu0 %v12078_v13  ;;  %8991 = vtanh.f32 %v4686_v48  ;;  %v12125_v48 = vld [vmem:[#allocation69_spill] sm:$0xff] }
 0xa79   :  { %8297 = vmatprep.subr.bf16.mxu1 %v12079_v54  ;;  %8329 = vmatprep.subr.bf16.mxu0 %v12080_v26 }
 0xa7c   :  { %8299 = vmatpush1.bf16.msra.mxu1 %v12081_v62  ;;  %8331 = vmatpush1.bf16.msra.mxu0 %v12082_v6 }
 0xa7d   :  { %8333 = vmatprep.subr.bf16.mxu1 %v11628_v2  ;;  %8365 = vmatprep.subr.bf16.mxu0 %v12084_v55 }
 0xa7f   :  { %v8986_v53 = vpop.eup %8985 }
 0xa80   :  { %v8988_v27 = vpop.eup %8987  ;;  %v4691_v45 = vadd.f32 1.0, %v8986_v53  ;;  %v12130_v53 = vld [vmem:[#allocation76_spill] sm:$0xff] }
 0xa81   :  { %v4697_v13 = vadd.f32 1.0, %v8988_v27  ;;  %v8990_v26 = vpop.eup %8989  ;;  %v12127_v27 = vld [vmem:[#allocation72_spill] sm:$0xff] }
 0xa82   :  { %8993 = vrcp.f32 %v4691_v45  ;;  %v8992_v21 = vpop.eup %8991  ;;  %v4704_v6 = vadd.f32 1.0, %v8990_v26  ;;  %v12121_v45 = vld [vmem:[#allocation63_spill] sm:$0xff]  ;;  %v12128_v26 = vld [vmem:[#allocation73_spill] sm:$0xff] }
 0xa83   :  { %8995 = vrcp.f32 %v4697_v13  ;;  %v12122_v13 = vld [vmem:[#allocation64_spill] sm:$0xff] }
 0xa84   :  { %8997 = vrcp.f32 %v4704_v6  ;;  %v12124_v6 = vld [vmem:[#allocation67_spill] sm:$0xff] }
 0xa8c   :  { %v8994_v54 = vpop.eup %8993 }
 0xa8d   :  { %v8996_v62 = vpop.eup %8995  ;;  %v4708_v18 = vmul.f32 %v8994_v54, %v8992_v21  ;;  %v12123_v54 = vld [vmem:[#allocation66_spill] sm:$0xff] }
 0xa8e   :  { %v4707_v15 = vmul.f32 %v8996_v62, %v10785_v8  ;;  %v8998_v2 = vpop.eup %8997  ;;  %v12120_v8 = vld [vmem:[#allocation61_spill] sm:$0xff]  ;;  %v12129_v62 = vld [vmem:[#allocation75_spill] sm:$0xff]  ;;  %v12131_v21 = vld [vmem:[#allocation78_spill] sm:$0xff] }
 0xa90   :  { %v10939_v12 = vadd.f32 %v4708_v18, %v4707_v15  ;;  %v12126_v18 = vld [vmem:[#allocation70_spill] sm:$0xff]  ;;  %v12132_v15 = vld [vmem:[#allocation79_spill] sm:$0xff] }
 0xa92   :  { %8999 = vtanh.f32 %v10939_v12 }
 0xa9c   :  { %v9000_v55 = vpop.eup %8999 }
 0xa9d   :  { %v4711_v36 = vmul.f32 %v9000_v55, %v8998_v2  ;;  %v12133_v2 = vld [vmem:[#allocation80_spill] sm:$0xff]  ;;  %v12134_v55 = vld [vmem:[#allocation81_spill] sm:$0xff] }
 0xa9f   :  { %4919 = vmatmul.mubr.f32.vlgmr.msra.gmra.mrb[26].mxu1 %v4711_v36  ;;  %4990 = vmatmul.mubr.f32.vlgmr.msra.gmra.mrb[34].mxu0 %v4711_v36 }
 0xaa0   :  { %8335 = vmatpush1.bf16.msra.mxu1 %v9557_v31  ;;  %8367 = vmatpush1.bf16.msra.mxu0 %v9657_v41  ;;  %v12085_v31 = vld [vmem:[#allocation39_spill] sm:$0xff]  ;;  %v12103_v41 = vld [vmem:[#allocation48_spill] sm:$0xff] }
 0xaa1   :  { %8337 = vmatprep.subr.bf16.mxu1 %v9559_v34  ;;  %8369 = vmatprep.subr.bf16.mxu0 %v9659_v47  ;;  %v12086_v34 = vld [vmem:[#allocation26_spill] sm:$0xff]  ;;  %v12104_v47 = vld [vmem:[#allocation35_spill] sm:$0xff] }
 0xaa2   :  { %5088 = vmatprep.mubr.f32.mxu1 %v11470_v5  ;;  %5159 = vmatprep.mubr.f32.mxu0 %v11470_v5 }
 0xaa4   :  { %8339 = vmatpush1.bf16.msra.mxu1 %v9562_v38  ;;  %8371 = vmatpush1.bf16.msra.mxu0 %v9662_v56  ;;  %v12087_v38 = vld [vmem:[#allocation40_spill] sm:$0xff]  ;;  %v12105_v56 = vld [vmem:[#allocation49_spill] sm:$0xff] }
 0xaa5   :  { %8341 = vmatprep.subr.bf16.mxu1 %v9565_v43  ;;  %8373 = vmatprep.subr.bf16.mxu0 %v9665_v63  ;;  %v12088_v43 = vld [vmem:[#allocation27_spill] sm:$0xff]  ;;  %v12106_v63 = vld [vmem:[#allocation36_spill] sm:$0xff] }
 0xaa8   :  { %8343 = vmatpush1.bf16.msra.mxu1 %v9568_v50  ;;  %8375 = vmatpush1.bf16.msra.mxu0 %v9668_v11  ;;  %v12089_v50 = vld [vmem:[#allocation41_spill] sm:$0xff]  ;;  %v12107_v11 = vld [vmem:[#allocation50_spill] sm:$0xff] }
 0xaa9   :  { %8345 = vmatprep.subr.bf16.mxu1 %v9571_v52  ;;  %8377 = vmatprep.subr.bf16.mxu0 %v9671_v14  ;;  %v12090_v52 = vld [vmem:[#allocation28_spill] sm:$0xff]  ;;  %v12108_v14 = vld [vmem:[#allocation37_spill] sm:$0xff] }
 0xaac   :  { %8347 = vmatpush1.bf16.msra.mxu1 %v9574_v59  ;;  %8379 = vmatpush1.bf16.msra.mxu0 %v9674_v32  ;;  %v12091_v59 = vld [vmem:[#allocation42_spill] sm:$0xff]  ;;  %v12109_v32 = vld [vmem:[#allocation51_spill] sm:$0xff] }
 0xaad   :  { %8349 = vmatprep.subr.bf16.mxu1 %v9577_v61  ;;  %8381 = vmatprep.subr.bf16.mxu0 %v9677_v35  ;;  %v12092_v61 = vld [vmem:[#allocation29_spill] sm:$0xff]  ;;  %v12110_v35 = vld [vmem:[#allocation38_spill] sm:$0xff] }
 0xab0   :  { %8351 = vmatpush1.bf16.msra.mxu1 %v9582_v3  ;;  %8383 = vmatpush1.bf16.msra.mxu0 %v9680_v49  ;;  %v12093_v3 = vld [vmem:[#allocation43_spill] sm:$0xff]  ;;  %v12111_v49 = vld [vmem:[#allocation52_spill] sm:$0xff] }
 0xab1   :  { %8353 = vmatprep.subr.bf16.mxu1 %v9585_v4  ;;  %8385 = vmatprep.subr.bf16.mxu0 %v9684_v51  ;;  %v12094_v4 = vld [vmem:[#allocation30_spill] sm:$0xff]  ;;  %v12112_v51 = vld [vmem:[#allocation53_spill] sm:$0xff] }
 0xab4   :  { %8355 = vmatpush1.bf16.msra.mxu1 %v9589_v9  ;;  %8387 = vmatpush1.bf16.msra.mxu0 %v9687_v25  ;;  %v12095_v9 = vld [vmem:[#allocation44_spill] sm:$0xff]  ;;  %v12113_v25 = vld [vmem:[#allocation54_spill] sm:$0xff] }
 0xab5   :  { %8357 = vmatprep.subr.bf16.mxu1 %v9592_v10  ;;  %8389 = vmatprep.subr.bf16.mxu0 %v9690_v40  ;;  %v12096_v10 = vld [vmem:[#allocation31_spill] sm:$0xff]  ;;  %v12114_v40 = vld [vmem:[#allocation74_spill] sm:$0xff] }
 0xab8   :  { %8359 = vmatpush1.bf16.msra.mxu1 %v9596_v16  ;;  %8391 = vmatpush1.bf16.msra.mxu0 %v9693_v19  ;;  %v12097_v16 = vld [vmem:[#allocation45_spill] sm:$0xff]  ;;  %v12115_v19 = vld [vmem:[#allocation55_spill] sm:$0xff] }
 0xab9   :  { %8361 = vmatprep.subr.bf16.mxu1 %v9599_v17  ;;  %8393 = vmatprep.subr.bf16.mxu0 %v9696_v20  ;;  %v12098_v17 = vld [vmem:[#allocation32_spill] sm:$0xff] }
 0xaba   :  { %v12116_v20 = vld [vmem:[#allocation56_spill] sm:$0xff] }
 0xabc   :  { %8363 = vmatpush1.bf16.msra.mxu1 %v9602_v22  ;;  %8395 = vmatpush1.bf16.msra.mxu0 %v9699_v42  ;;  %v12099_v22 = vld [vmem:[#allocation46_spill] sm:$0xff] }
 0xabd   :  { %8397 = vmatprep.subr.bf16.mxu1 %v9605_v23  ;;  %8429 = vmatprep.subr.bf16.mxu0 %v9702_v44  ;;  %v12100_v23 = vld [vmem:[#allocation33_spill] sm:$0xff]  ;;  %v12117_v42 = vld [vmem:[#allocation58_spill] sm:$0xff]  ;;  %v12118_v44 = vld [vmem:[#allocation59_spill] sm:$0xff] }
 0xabf   :  { %5089 = vmatmul.mubr.f32.vlgmr.msra.gmra.mrb[28].mxu1 %v4711_v36  ;;  %5160 = vmatmul.mubr.f32.vlgmr.msra.gmra.mrb[36].mxu0 %v4711_v36  ;;  %v12135_v36 = vld [vmem:[#allocation82_spill] sm:$0xff] }
 0xac0   :  { %8399 = vmatpush1.bf16.msra.mxu1 %v9608_v29  ;;  %8431 = vmatpush1.bf16.msra.mxu0 %v9705_v0  ;;  %v12101_v29 = vld [vmem:[#allocation47_spill] sm:$0xff]  ;;  %v12119_v0 = vld [vmem:[#allocation60_spill] sm:$0xff] }
 0xac1   :  { %8401 = vmatprep.subr.bf16.mxu1 %v9611_v30  ;;  %8433 = vmatprep.subr.bf16.mxu0 %v12085_v31  ;;  %v12102_v30 = vld [vmem:[#allocation34_spill] sm:$0xff]  ;;  %v12136_v31 = vld [vmem:[#allocation83_spill] sm:$0xff] }
 0xac2   :  { %5230 = vmatprep.mubr.f32.mxu1 %v11470_v5  ;;  %5301 = vmatprep.mubr.f32.mxu0 %v11470_v5 }
 0xac4   :  { %8403 = vmatpush1.bf16.msra.mxu1 %v12086_v34  ;;  %8435 = vmatpush1.bf16.msra.mxu0 %v12087_v38  ;;  %v12137_v34 = vld [vmem:[#allocation84_spill] sm:$0xff]  ;;  %v12138_v38 = vld [vmem:[#allocation85_spill] sm:$0xff] }
 0xac5   :  { %8405 = vmatprep.subr.bf16.mxu1 %v12088_v43  ;;  %8437 = vmatprep.subr.bf16.mxu0 %v12089_v50  ;;  %v12139_v43 = vld [vmem:[#allocation86_spill] sm:$0xff]  ;;  %v12140_v50 = vld [vmem:[#allocation87_spill] sm:$0xff] }
 0xac8   :  { %8407 = vmatpush1.bf16.msra.mxu1 %v12090_v52  ;;  %8439 = vmatpush1.bf16.msra.mxu0 %v12091_v59  ;;  %v12141_v52 = vld [vmem:[#allocation88_spill] sm:$0xff]  ;;  %v12142_v59 = vld [vmem:[#allocation89_spill] sm:$0xff] }
 0xac9   :  { %8409 = vmatprep.subr.bf16.mxu1 %v12092_v61  ;;  %8441 = vmatprep.subr.bf16.mxu0 %v12093_v3  ;;  %v12143_v61 = vld [vmem:[#allocation90_spill] sm:$0xff]  ;;  %v12144_v3 = vld [vmem:[#allocation91_spill] sm:$0xff] }
 0xacc   :  { %8411 = vmatpush1.bf16.msra.mxu1 %v12094_v4  ;;  %8443 = vmatpush1.bf16.msra.mxu0 %v12095_v9  ;;  %v12145_v4 = vld [vmem:[#allocation92_spill] sm:$0xff]  ;;  %v12146_v9 = vld [vmem:[#allocation93_spill] sm:$0xff] }
 0xacd   :  { %8413 = vmatprep.subr.bf16.mxu1 %v12096_v10  ;;  %8445 = vmatprep.subr.bf16.mxu0 %v12097_v16 }
 0xad0   :  { %8415 = vmatpush1.bf16.msra.mxu1 %v12098_v17  ;;  %8447 = vmatpush1.bf16.msra.mxu0 %v12099_v22  ;;  %v12147_v17 = vld [vmem:[#allocation57_spill] sm:$0xff] }
 0xad1   :  { %8417 = vmatprep.subr.bf16.mxu1 %v12100_v23  ;;  %8449 = vmatprep.subr.bf16.mxu0 %v12101_v29 }
 0xad4   :  { %8419 = vmatpush1.bf16.msra.mxu1 %v12102_v30  ;;  %8451 = vmatpush1.bf16.msra.mxu0 %v12103_v41 }
 0xad5   :  { %8421 = vmatprep.subr.bf16.mxu1 %v12104_v47  ;;  %8453 = vmatprep.subr.bf16.mxu0 %v12105_v56 }
 0xad8   :  { %8423 = vmatpush1.bf16.msra.mxu1 %v12106_v63  ;;  %8455 = vmatpush1.bf16.msra.mxu0 %v12107_v11 }
 0xad9   :  { %8425 = vmatprep.subr.bf16.mxu1 %v12108_v14  ;;  %8457 = vmatprep.subr.bf16.mxu0 %v12109_v32 }
 0xadc   :  { %8427 = vmatpush1.bf16.msra.mxu1 %v12110_v35  ;;  %8459 = vmatpush1.bf16.msra.mxu0 %v12111_v49 }
 0xadd   :  { %8461 = vmatprep.subr.bf16.mxu1 %v12112_v51  ;;  %8493 = vmatprep.subr.bf16.mxu0 %v12113_v25 }
 0xadf   :  { %5231 = vmatmul.mubr.f32.vlgmr.msra.gmra.mrb[28].mxu1 %v12114_v40  ;;  %5302 = vmatmul.mubr.f32.vlgmr.msra.gmra.mrb[36].mxu0 %v12114_v40 }
 0xae0   :  { %8463 = vmatpush1.bf16.msra.mxu1 %v12115_v19  ;;  %8495 = vmatpush1.bf16.msra.mxu0 %v12116_v20 }
 0xae1   :  { %8465 = vmatprep.subr.bf16.mxu1 %v12117_v42  ;;  %8497 = vmatprep.subr.bf16.mxu0 %v12118_v44 }
 0xae2   :  { %5400 = vmatprep.mubr.f32.mxu1 %v11470_v5  ;;  %5471 = vmatprep.mubr.f32.mxu0 %v11470_v5 }
 0xae4   :  { %8467 = vmatpush1.bf16.msra.mxu1 %v12119_v0  ;;  %8499 = vmatpush1.bf16.msra.mxu0 %v12120_v8 }
 0xae5   :  { %8469 = vmatprep.subr.bf16.mxu1 %v12121_v45  ;;  %8501 = vmatprep.subr.bf16.mxu0 %v12122_v13 }
 0xae8   :  { %8471 = vmatpush1.bf16.msra.mxu1 %v12123_v54  ;;  %8503 = vmatpush1.bf16.msra.mxu0 %v12124_v6  ;;  %v12149_v54 = vld [vmem:[#allocation100_spill] sm:$0xff]  ;;  %v12150_v6 = vld [vmem:[#allocation101_spill] sm:$0xff] }
 0xae9   :  { %8473 = vmatprep.subr.bf16.mxu1 %v12125_v48  ;;  %8505 = vmatprep.subr.bf16.mxu0 %v12126_v18  ;;  %v12151_v48 = vld [vmem:[#allocation102_spill] sm:$0xff]  ;;  %v12156_v18 = vld [vmem:[#allocation107_spill] sm:$0xff] }
 0xaec   :  { %8475 = vmatpush1.bf16.msra.mxu1 %v12127_v27  ;;  %8507 = vmatpush1.bf16.msra.mxu0 %v12128_v26  ;;  %v12157_v27 = vld [vmem:[#allocation108_spill] sm:$0xff] }
 0xaed   :  { %8477 = vmatprep.subr.bf16.mxu1 %v12129_v62  ;;  %8509 = vmatprep.subr.bf16.mxu0 %v12130_v53  ;;  %v12159_v53 = vld [vmem:[#allocation110_spill] sm:$0xff] }
 0xaf0   :  { %8479 = vmatpush1.bf16.msra.mxu1 %v12131_v21  ;;  %8511 = vmatpush1.bf16.msra.mxu0 %v12132_v15  ;;  %v12160_v21 = vld [vmem:[#allocation111_spill] sm:$0xff]  ;;  %v12161_v15 = vld [vmem:[#allocation124_spill] sm:$0xff] }
 0xaf1   :  { %8481 = vmatprep.subr.bf16.mxu1 %v12133_v2  ;;  %8513 = vmatprep.subr.bf16.mxu0 %v12134_v55 }
 0xaf4   :  { %8483 = vmatpush1.bf16.msra.mxu1 %v12135_v36  ;;  %8515 = vmatpush1.bf16.msra.mxu0 %v12136_v31  ;;  %v12162_v31 = vld [vmem:[#allocation112_spill] sm:$0xff] }
 0xaf5   :  { %8485 = vmatprep.subr.bf16.mxu1 %v12137_v34  ;;  %8517 = vmatprep.subr.bf16.mxu0 %v12138_v38  ;;  %v12163_v34 = vld [vmem:[#allocation113_spill] sm:$0xff] }
 0xaf8   :  { %8487 = vmatpush1.bf16.msra.mxu1 %v12139_v43  ;;  %8519 = vmatpush1.bf16.msra.mxu0 %v12140_v50 }
 0xaf9   :  { %8489 = vmatprep.subr.bf16.mxu1 %v12141_v52  ;;  %8521 = vmatprep.subr.bf16.mxu0 %v12142_v59  ;;  %v12164_v52 = vld [vmem:[#allocation115_spill] sm:$0xff]  ;;  %v12165_v59 = vld [vmem:[#allocation116_spill] sm:$0xff] }
 0xafc   :  { %8491 = vmatpush1.bf16.msra.mxu1 %v12143_v61  ;;  %8523 = vmatpush1.bf16.msra.mxu0 %v12144_v3  ;;  %v12166_v61 = vld [vmem:[#allocation117_spill] sm:$0xff]  ;;  %v12167_v3 = vld [vmem:[#allocation126_spill] sm:$0xff] }
 0xafd   :  { %8525 = vmatprep.subr.bf16.mxu1 %v12145_v4  ;;  %8557 = vmatprep.subr.bf16.mxu0 %v12146_v9  ;;  %v12168_v9 = vld [vmem:[#allocation118_spill] sm:$0xff] }
 0xb72   :  { %v4920_v10 = vpop.f32.mrb[26].mxu1  ;;  %v4991_v16 = vpop.f32.mrb[34].mxu0 }
 0xb73   :  { %v4996_v22 = vadd.f32 %v4920_v10, %v12147_v17  ;;  %v4922_v23 = vpop.f32.mrb[27].mxu1  ;;  %v4993_v29 = vpop.f32.mrb[35].mxu0  ;;  %v4998_v11 = vadd.f32 %v4991_v16, %v10124_v57  ;;  %v12169_v10 = vld [vmem:[#allocation119_spill] sm:$0xff]  ;;  %v12170_v16 = vld [vmem:[#allocation120_spill] sm:$0xff] }
 0xb74   :  { %v4997_v30 = vadd.f32 %v4922_v23, %v11779_v58  ;;  %v4999_v56 = vadd.f32 %v4993_v29, %v11686_v7  ;;  %v12173_v23 = vld [vmem:[#allocation123_spill] sm:$0xff] }
 0xb75   :  { %v6168_v41 = vmul.f32 -1.442695, %v4996_v22  ;;  %v12174_v29 = vld [vmem:[#allocation127_spill] sm:$0xff] }
 0xb76   :  { %v6169_v47 = vmul.f32 -1.442695, %v4997_v30  ;;  %v6170_v63 = vmul.f32 -1.442695, %v4999_v56 }
 0xb77   :  { %9001 = vpow2.f32 %v6168_v41 }
 0xb78   :  { %9003 = vpow2.f32 %v6169_v47 }
 0xb79   :  { %9005 = vpow2.f32 %v6170_v63 }
 0xb7a   :  { %9007 = vtanh.f32 %v4998_v11 }
 0xb81   :  { %v9002_v14 = vpop.eup %9001 }
 0xb82   :  { %v9004_v32 = vpop.eup %9003  ;;  %v5003_v35 = vadd.f32 1.0, %v9002_v14 }
 0xb83   :  { %v5009_v49 = vadd.f32 1.0, %v9004_v32  ;;  %v9006_v51 = vpop.eup %9005 }
 0xb84   :  { %9009 = vrcp.f32 %v5003_v35  ;;  %v9008_v25 = vpop.eup %9007  ;;  %v5016_v42 = vadd.f32 1.0, %v9006_v51 }
 0xb85   :  { %9011 = vrcp.f32 %v5009_v49 }
 0xb86   :  { %9013 = vrcp.f32 %v5016_v42 }
 0xb8e   :  { %v9010_v40 = vpop.eup %9009 }
 0xb8f   :  { %v9012_v19 = vpop.eup %9011  ;;  %v5020_v20 = vmul.f32 %v9010_v40, %v9008_v25 }
 0xb90   :  { %v5019_v44 = vmul.f32 %v9012_v19, %v10897_v33  ;;  %v9014_v8 = vpop.eup %9013  ;;  %v12148_v33 = vld [vmem:[#allocation99_spill] sm:$0xff] }
 0xb92   :  { %v11051_v0 = vadd.f32 %v5020_v20, %v5019_v44  ;;  %v5664_v44 = vld [vmem:[#allocation10 + $0x80] sm:$0xff] }
 0xb94   :  { %9015 = vtanh.f32 %v11051_v0 }
 0xb9e   :  { %v9016_v45 = vpop.eup %9015 }
 0xb9f   :  { %v5023_v13 = vmul.f32 %v9016_v45, %v9014_v8  ;;  %v5665_v8 = vld [vmem:[#allocation10 + $0x88] sm:$0xff] }
 0xba0   :  { %v8589_v45 = vpack.c.bf16 %v5665_v8, %v5664_v44 }
 0xba1   :  { %5401 = vmatmul.mubr.f32.vlgmr.msra.gmra.mrb[30].mxu1 %v5023_v13  ;;  %5472 = vmatmul.mubr.f32.vlgmr.msra.gmra.mrb[38].mxu0 %v5023_v13  ;;  %v5648_v13 = vld [vmem:[#allocation10] sm:$0xff] }
 0xba2   :  { %8527 = vmatpush1.bf16.msra.mxu1 %v11688_v60  ;;  %8559 = vmatpush1.bf16.msra.mxu0 %v11780_v39  ;;  %v12152_v60 = vld [vmem:[#allocation103_spill] sm:$0xff]  ;;  %v12153_v39 = vld [vmem:[#allocation104_spill] sm:$0xff] }
 0xba3   :  { %8529 = vmatprep.subr.bf16.mxu1 %v11872_v28  ;;  %8561 = vmatprep.subr.bf16.mxu0 %v11964_v37  ;;  %v12154_v28 = vld [vmem:[#allocation105_spill] sm:$0xff]  ;;  %v12155_v37 = vld [vmem:[#allocation106_spill] sm:$0xff] }
 0xba4   :  { %5542 = vmatprep.mubr.f32.mxu1 %v11470_v5  ;;  %5613 = vmatprep.mubr.f32.mxu0 %v11470_v5 }
 0xba6   :  { %8531 = vmatpush1.bf16.msra.mxu1 %v12056_v1  ;;  %8563 = vmatpush1.bf16.msra.mxu0 %v12148_v33  ;;  %v12158_v1 = vld [vmem:[#allocation109_spill] sm:$0xff] }
 0xba7   :  { %8533 = vmatprep.subr.bf16.mxu1 %v12149_v54  ;;  %8565 = vmatprep.subr.bf16.mxu0 %v12150_v6  ;;  %v5649_v33 = vld [vmem:[#allocation10 + $0x8] sm:$0xff]  ;;  %v9298_v54 = vmov 0.0|0.0  }
 0xba8   :  { %v8613_v6 = vpack.c.bf16 %v5649_v33, %v5648_v13 }
 0xbaa   :  { %8535 = vmatpush1.bf16.msra.mxu1 %v12151_v48  ;;  %8567 = vmatpush1.bf16.msra.mxu0 %v12152_v60  ;;  %v5667_v48 = vld [vmem:[#allocation10 + $0x98] sm:$0xff] }
 0xbab   :  { %8537 = vmatprep.subr.bf16.mxu1 %v12153_v39  ;;  %8569 = vmatprep.subr.bf16.mxu0 %v12154_v28  ;;  %v5650_v39 = vld [vmem:[#allocation10 + $0x10] sm:$0xff]  ;;  %v5651_v28 = vld [vmem:[#allocation10 + $0x18] sm:$0xff] }
 0xbae   :  { %8539 = vmatpush1.bf16.msra.mxu1 %v12155_v37  ;;  %8571 = vmatpush1.bf16.msra.mxu0 %v12156_v18  ;;  %v8616_v37 = vpack.c.bf16 %v5651_v28, %v5650_v39  ;;  %v5668_v18 = vld [vmem:[#allocation10 + $0xa0] sm:$0xff] }
 0xbaf   :  { %8541 = vmatprep.subr.bf16.mxu1 %v12157_v27  ;;  %8573 = vmatprep.subr.bf16.mxu0 %v12158_v1  ;;  %v5669_v27 = vld [vmem:[#allocation10 + $0xa8] sm:$0xff] }
 0xbb0   :  { %v8595_v1 = vpack.c.bf16 %v5669_v27, %v5668_v18 }
 0xbb2   :  { %v5232_v26 = vpop.f32.mrb[28].mxu1  ;;  %v5303_v62 = vpop.f32.mrb[36].mxu0  ;;  %8543 = vmatpush1.bf16.msra.mxu1 %v12159_v53  ;;  %8575 = vmatpush1.bf16.msra.mxu0 %v12160_v21  ;;  %v5670_v21 = vld [vmem:[#allocation10 + $0xb0] sm:$0xff] }
 0xbb3   :  { %v5308_v2 = vadd.f32 %v5232_v26, %v12161_v15  ;;  %v5234_v55 = vpop.f32.mrb[29].mxu1  ;;  %v5305_v36 = vpop.f32.mrb[37].mxu0  ;;  %8545 = vmatprep.subr.bf16.mxu1 %v12162_v31  ;;  %8577 = vmatprep.subr.bf16.mxu0 %v12163_v34  ;;  %v5310_v30 = vadd.f32 %v5303_v62, %v12174_v29  ;;  %v5652_v26 = vld [vmem:[#allocation10 + $0x20] sm:$0xff]  ;;  %v5653_v62 = vld [vmem:[#allocation10 + $0x28] sm:$0xff]  ;;  %v5671_v15 = vld [vmem:[#allocation10 + $0xb8] sm:$0xff] }
 0xbb4   :  { %v5309_v38 = vadd.f32 %v5234_v55, %v11616_v24  ;;  %v5311_v4 = vadd.f32 %v5305_v36, %v12167_v3  ;;  %v12171_v24 = vld [vmem:[#allocation121_spill] sm:$0xff]  ;;  %v8619_v53 = vpack.c.bf16 %v5653_v62, %v5652_v26  ;;  %v5655_v36 = vld [vmem:[#allocation10 + $0x38] sm:$0xff]  ;;  %v5672_v34 = vld [vmem:[#allocation10 + $0xc0] sm:$0xff] }
 0xbb5   :  { %v6171_v43 = vmul.f32 -1.442695, %v5308_v2  ;;  %v8598_v2 = vpack.c.bf16 %v5671_v15, %v5670_v21  ;;  %v5654_v55 = vld [vmem:[#allocation10 + $0x30] sm:$0xff]  ;;  %v5675_v3 = vld [vmem:[#allocation10 + $0xd8] sm:$0xff]  ;;  %v5825_v15 = vld [vmem:[#allocation10 + $0x128] sm:$0xff] }
 0xbb6   :  { %v6172_v50 = vmul.f32 -1.442695, %v5309_v38  ;;  %8547 = vmatpush1.bf16.msra.mxu1 %v11617_v46  ;;  %8579 = vmatpush1.bf16.msra.mxu0 %v12164_v52  ;;  %v6173_v22 = vmul.f32 -1.442695, %v5311_v4  ;;  %v12172_v46 = vld [vmem:[#allocation122_spill] sm:$0xff]  ;;  %v8622_v31 = vpack.c.bf16 %v5655_v36, %v5654_v55  ;;  %v5673_v38 = vld [vmem:[#allocation10 + $0xc8] sm:$0xff] }
 0xbb7   :  { %9017 = vpow2.f32 %v6171_v43  ;;  %8549 = vmatprep.subr.bf16.mxu1 %v12165_v59  ;;  %8581 = vmatprep.subr.bf16.mxu0 %v12166_v61  ;;  %v8601_v43 = vpack.c.bf16 %v5673_v38, %v5672_v34  ;;  %v5657_v52 = vld [vmem:[#allocation10 + $0x48] sm:$0xff]  ;;  %v5674_v61 = vld [vmem:[#allocation10 + $0xd0] sm:$0xff]  ;;  %v5827_v36 = vld [vmem:[#allocation10 + $0x138] sm:$0xff] }
 0xbb8   :  { %9019 = vpow2.f32 %v6172_v50  ;;  %v5656_v50 = vld [vmem:[#allocation10 + $0x40] sm:$0xff]  ;;  %v5658_v4 = vld [vmem:[#allocation10 + $0x50] sm:$0xff]  ;;  %v5829_v38 = vld [vmem:[#allocation10 + $0x148] sm:$0xff] }
 0xbb9   :  { %9021 = vpow2.f32 %v6173_v22  ;;  %v8625_v59 = vpack.c.bf16 %v5657_v52, %v5656_v50  ;;  %v5822_v62 = vld [vmem:[#allocation10 + $0x110] sm:$0xff]  ;;  %v5828_v34 = vld [vmem:[#allocation10 + $0x140] sm:$0xff]  ;;  %v5831_v52 = vld [vmem:[#allocation10 + $0x158] sm:$0xff] }
 0xbba   :  { %8551 = vmatpush1.bf16.msra.mxu1 %v12168_v9  ;;  %8583 = vmatpush1.bf16.msra.mxu0 %v12169_v10  ;;  %9023 = vtanh.f32 %v5310_v30  ;;  %v8604_v9 = vpack.c.bf16 %v5675_v3, %v5674_v61  ;;  %v5659_v10 = vld [vmem:[#allocation10 + $0x58] sm:$0xff]  ;;  %v5826_v55 = vld [vmem:[#allocation10 + $0x130] sm:$0xff]  ;;  %v5832_v61 = vld [vmem:[#allocation10 + $0x160] sm:$0xff] }
 0xbbb   :  { %8553 = vmatprep.subr.bf16.mxu1 %v12170_v16  ;;  %8585 = vmatprep.subr.bf16.mxu0 %v12171_v24  ;;  %v5676_v16 = vld [vmem:[#allocation10 + $0xe0] sm:$0xff]  ;;  %v5677_v24 = vld [vmem:[#allocation10 + $0xe8] sm:$0xff]  ;;  %v8628_v22 = vpack.c.bf16 %v5659_v10, %v5658_v4  ;;  %v5830_v50 = vld [vmem:[#allocation10 + $0x150] sm:$0xff] }
 0xbbc   :  { %v8607_v29 = vpack.c.bf16 %v5677_v24, %v5676_v16  ;;  %v5833_v3 = vld [vmem:[#allocation10 + $0x168] sm:$0xff]  ;;  %v5835_v10 = vld [vmem:[#allocation10 + $0x178] sm:$0xff] }
 0xbbd   :  { %v8655_v4 = vpack.c.bf16 %v5833_v3, %v5832_v61  ;;  %v5916_v24 = vld [vmem:[#allocation13] sm:$0xff] }
 0xbbe   :  { %8555 = vmatpush1.bf16.msra.mxu1 %v12172_v46  ;;  %8587 = vmatpush1.bf16.msra.mxu0 %v12173_v23  ;;  %v5660_v46 = vld [vmem:[#allocation10 + $0x60] sm:$0xff]  ;;  %v5661_v23 = vld [vmem:[#allocation10 + $0x68] sm:$0xff] }
 0xbbf   :  { %8588 = vmatprep.subr.bf16.mxu1 %v9298_v54  ;;  %8612 = vmatprep.subr.bf16.mxu0 %v9298_v54  ;;  %v8631_v30 = vpack.c.bf16 %v5661_v23, %v5660_v46  ;;  %v5918_v46 = vld [vmem:[#allocation13 + $0x10] sm:$0xff]  ;;  %v6178_v3 = vld [vmem:[#allocation15] ss:$0 sm:$0xff] }
 0xbc1   :  { %v9018_v41 = vpop.eup %9017 }
 0xbc2   :  { %v9020_v47 = vpop.eup %9019  ;;  %v5315_v56 = vadd.f32 1.0, %v9018_v41  ;;  %v5678_v41 = vld [vmem:[#allocation10 + $0xf0] sm:$0xff] }
 0xbc3   :  { %v5321_v63 = vadd.f32 1.0, %v9020_v47  ;;  %v9022_v11 = vpop.eup %9021  ;;  %v5679_v47 = vld [vmem:[#allocation10 + $0xf8] sm:$0xff] }
 0xbc4   :  { %9025 = vrcp.f32 %v5315_v56  ;;  %v9024_v14 = vpop.eup %9023  ;;  %v5328_v51 = vadd.f32 1.0, %v9022_v11  ;;  %v5662_v56 = vld [vmem:[#allocation10 + $0x70] sm:$0xff]  ;;  %v8610_v11 = vpack.c.bf16 %v5679_v47, %v5678_v41  ;;  %v5920_v41 = vld [vmem:[#allocation13 + $0x20] sm:$0xff] }
 0xbc5   :  { %9027 = vrcp.f32 %v5321_v63  ;;  %v5663_v63 = vld [vmem:[#allocation10 + $0x78] sm:$0xff]  ;;  %v5921_v47 = vld [vmem:[#allocation13 + $0x28] sm:$0xff] }
 0xbc6   :  { %9029 = vrcp.f32 %v5328_v51 }
 0xbce   :  { %v9026_v32 = vpop.eup %9025 }
 0xbcf   :  { %v9028_v35 = vpop.eup %9027  ;;  %v5332_v49 = vmul.f32 %v9026_v32, %v9024_v14  ;;  %v8634_v14 = vpack.c.bf16 %v5663_v63, %v5662_v56  ;;  %v8667_v56 = vpack.c.bf16 %v5921_v47, %v5920_v41  ;;  %v5922_v63 = vld [vmem:[#allocation13 + $0x30] sm:$0xff] }
 0xbd0   :  { %v5331_v25 = vmul.f32 %v9028_v35, %v10939_v12  ;;  %v9030_v19 = vpop.eup %9029  ;;  %v5666_v12 = vld [vmem:[#allocation10 + $0x90] sm:$0xff] }
 0xbd1   :  { %v8592_v60 = vpack.c.bf16 %v5667_v48, %v5666_v12 }
 0xbd2   :  { %v5333_v40 = vadd.f32 %v5332_v49, %v5331_v25 }
 0xbd4   :  { %9031 = vtanh.f32 %v5333_v40 }
 0xbde   :  { %v9032_v20 = vpop.eup %9031 }
 0xbdf   :  { %v5335_v42 = vmul.f32 %v9032_v20, %v9030_v19 }
 0xbe1   :  { %5543 = vmatmul.mubr.f32.vlgmr.msra.gmra.mrb[30].mxu1 %v5335_v42  ;;  %5614 = vmatmul.mubr.f32.vlgmr.msra.gmra.mrb[38].mxu0 %v5335_v42 }
 0xbe2   :  { %8590 = vmatpush3.bf16.msra.mxu1 %v8589_v45  ;;  %8614 = vmatpush3.bf16.msra.mxu0 %v8613_v6 }
 0xbe3   :  { %8591 = vmatprep.subr.bf16.mxu1 %v9298_v54  ;;  %8615 = vmatprep.subr.bf16.mxu0 %v9298_v54 }
 0xbe4   :  { %6365 = vmatprep.mubr.msk.f32.mxu1 %vm9299_vm8, %v11470_v5  ;;  %6400 = vmatprep.mubr.msk.f32.mxu0 %vm9299_vm8, %v11470_v5 }
 0xbe6   :  { %8593 = vmatpush3.bf16.msra.mxu1 %v8592_v60  ;;  %8617 = vmatpush3.bf16.msra.mxu0 %v8616_v37  ;;  %v5821_v37 = vld [vmem:[#allocation10 + $0x108] sm:$0xff] }
 0xbe7   :  { %8594 = vmatprep.subr.bf16.mxu1 %v9298_v54  ;;  %8618 = vmatprep.subr.bf16.mxu0 %v9298_v54 }
 0xbea   :  { %8596 = vmatpush3.bf16.msra.mxu1 %v8595_v1  ;;  %8620 = vmatpush3.bf16.msra.mxu0 %v8619_v53  ;;  %v5823_v53 = vld [vmem:[#allocation10 + $0x118] sm:$0xff] }
 0xbeb   :  { %8597 = vmatprep.subr.bf16.mxu1 %v9298_v54  ;;  %8621 = vmatprep.subr.bf16.mxu0 %v9298_v54  ;;  %v8640_v21 = vpack.c.bf16 %v5823_v53, %v5822_v62  ;;  %v6021_v62 = vld [vmem:[%s11209_s12 + $0x60] sm:$0xff]  ;;  %v6022_v53 = vld [vmem:[%s11209_s12 + $0x68] sm:$0xff] }
 0xbee   :  { %8599 = vmatpush3.bf16.msra.mxu1 %v8598_v2  ;;  %8623 = vmatpush3.bf16.msra.mxu0 %v8622_v31  ;;  %v8646_v31 = vpack.c.bf16 %v5827_v36, %v5826_v55 }
 0xbef   :  { %8600 = vmatprep.subr.bf16.mxu1 %v9298_v54  ;;  %8624 = vmatprep.subr.bf16.mxu0 %v9298_v54 }
 0xbf2   :  { %8602 = vmatpush3.bf16.msra.mxu1 %v8601_v43  ;;  %8626 = vmatpush3.bf16.msra.mxu0 %v8625_v59  ;;  %v8649_v43 = vpack.c.bf16 %v5829_v38, %v5828_v34  ;;  %v8652_v59 = vpack.c.bf16 %v5831_v52, %v5830_v50  ;;  %v6177_v34 = vld [vmem:[#allocation12] ss:$0 sm:$0xff] }
 0xbf3   :  { %8603 = vmatprep.subr.bf16.mxu1 %v9298_v54  ;;  %8627 = vmatprep.subr.bf16.mxu0 %v9298_v54 }
 0xbf6   :  { %8605 = vmatpush3.bf16.msra.mxu1 %v8604_v9  ;;  %8629 = vmatpush3.bf16.msra.mxu0 %v8628_v22  ;;  %v5834_v9 = vld [vmem:[#allocation10 + $0x170] sm:$0xff] }
 0xbf7   :  { %8606 = vmatprep.subr.bf16.mxu1 %v9298_v54  ;;  %8630 = vmatprep.subr.bf16.mxu0 %v9298_v54  ;;  %v8658_v16 = vpack.c.bf16 %v5835_v10, %v5834_v9  ;;  %v5917_v22 = vld [vmem:[#allocation13 + $0x8] sm:$0xff] }
 0xbf8   :  { %v8661_v23 = vpack.c.bf16 %v5917_v22, %v5916_v24 }
 0xbfa   :  { %8608 = vmatpush3.bf16.msra.mxu1 %v8607_v29  ;;  %8632 = vmatpush3.bf16.msra.mxu0 %v8631_v30  ;;  %v5919_v29 = vld [vmem:[#allocation13 + $0x18] sm:$0xff] }
 0xbfb   :  { %8609 = vmatprep.subr.bf16.mxu1 %v9298_v54  ;;  %8633 = vmatprep.subr.bf16.mxu0 %v9298_v54  ;;  %v8664_v30 = vpack.c.bf16 %v5919_v29, %v5918_v46 }
 0xbfe   :  { %8611 = vmatpush3.bf16.msra.mxu1 %v8610_v11  ;;  %8635 = vmatpush3.bf16.msra.mxu0 %v8634_v14  ;;  %v5923_v11 = vld [vmem:[#allocation13 + $0x38] sm:$0xff] }
 0xbff   :  { %8636 = vmatprep.subr.bf16.mxu1 %v9298_v54  ;;  %8660 = vmatprep.subr.bf16.mxu0 %v9298_v54  ;;  %v8670_v14 = vpack.c.bf16 %v5923_v11, %v5922_v63 }
 0xcb4   :  { %v5544_v32 = vpop.f32.mrb[30].mxu1  ;;  %v5615_v35 = vpop.f32.mrb[38].mxu0 }
 0xcb5   :  { %v5620_v49 = vadd.f32 %v5544_v32, %v12147_v17  ;;  %v5546_v51 = vpop.f32.mrb[31].mxu1  ;;  %v5617_v25 = vpop.f32.mrb[39].mxu0  ;;  %v5622_v8 = vadd.f32 %v5615_v35, %v10124_v57  ;;  %v5820_v57 = vld [vmem:[#allocation10 + $0x100] sm:$0xff]  ;;  %v5925_v32 = vld [vmem:[#allocation13 + $0x48] sm:$0xff] }
 0xcb6   :  { %v5621_v40 = vadd.f32 %v5546_v51, %v11779_v58  ;;  %v5623_v42 = vadd.f32 %v5617_v25, %v11686_v7  ;;  %v8637_v1 = vpack.c.bf16 %v5821_v37, %v5820_v57  ;;  %v5927_v51 = vld [vmem:[#allocation13 + $0x58] sm:$0xff]  ;;  %v6018_v37 = vld [vmem:[%s11209_s12 + $0x48] sm:$0xff] }
 0xcb7   :  { %v6174_v19 = vmul.f32 -1.442695, %v5620_v49  ;;  %v5926_v49 = vld [vmem:[#allocation13 + $0x50] sm:$0xff]  ;;  %v6017_v57 = vld [vmem:[%s11209_s12 + $0x40] sm:$0xff] }
 0xcb8   :  { %v6175_v20 = vmul.f32 -1.442695, %v5621_v40  ;;  %v6176_v44 = vmul.f32 -1.442695, %v5623_v42  ;;  %v8676_v25 = vpack.c.bf16 %v5927_v51, %v5926_v49  ;;  %v5928_v40 = vld [vmem:[#allocation13 + $0x60] sm:$0xff]  ;;  %v5930_v42 = vld [vmem:[#allocation13 + $0x70] sm:$0xff] }
 0xcb9   :  { %9033 = vpow2.f32 %v6174_v19  ;;  %v5929_v19 = vld [vmem:[#allocation13 + $0x68] sm:$0xff] }
 0xcba   :  { %9035 = vpow2.f32 %v6175_v20  ;;  %v8679_v20 = vpack.c.bf16 %v5929_v19, %v5928_v40 }
 0xcbb   :  { %9037 = vpow2.f32 %v6176_v44  ;;  %v5931_v44 = vld [vmem:[#allocation13 + $0x78] sm:$0xff] }
 0xcbc   :  { %9039 = vtanh.f32 %v5622_v8  ;;  %v8682_v8 = vpack.c.bf16 %v5931_v44, %v5930_v42 }
 0xcc3   :  { %v9034_v45 = vpop.eup %9033 }
 0xcc4   :  { %v9036_v13 = vpop.eup %9035  ;;  %v5627_v33 = vadd.f32 1.0, %v9034_v45  ;;  %v6009_v45 = vld [vmem:[%s11209_s12] sm:$0xff] }
 0xcc5   :  { %v5633_v6 = vadd.f32 1.0, %v9036_v13  ;;  %v9038_v17 = vpop.eup %9037  ;;  %v6010_v13 = vld [vmem:[%s11209_s12 + $0x8] sm:$0xff] }
 0xcc6   :  { %9041 = vrcp.f32 %v5627_v33  ;;  %v9040_v12 = vpop.eup %9039  ;;  %v5640_v39 = vadd.f32 1.0, %v9038_v17  ;;  %v6011_v33 = vld [vmem:[%s11209_s12 + $0x10] sm:$0xff]  ;;  %v6012_v17 = vld [vmem:[%s11209_s12 + $0x18] sm:$0xff] }
 0xcc7   :  { %9043 = vrcp.f32 %v5633_v6  ;;  %v8685_v6 = vpack.c.bf16 %v6010_v13, %v6009_v45 }
 0xcc8   :  { %9045 = vrcp.f32 %v5640_v39  ;;  %v6015_v39 = vld [vmem:[%s11209_s12 + $0x30] sm:$0xff] }
 0xcd0   :  { %v9042_v58 = vpop.eup %9041 }
 0xcd1   :  { %v9044_v48 = vpop.eup %9043  ;;  %v5644_v60 = vmul.f32 %v9042_v58, %v9040_v12  ;;  %v8688_v12 = vpack.c.bf16 %v6012_v17, %v6011_v33  ;;  %v6013_v58 = vld [vmem:[%s11209_s12 + $0x20] sm:$0xff] }
 0xcd2   :  { %v5643_v28 = vmul.f32 %v9044_v48, %v11051_v0  ;;  %v9046_v18 = vpop.eup %9045  ;;  %v5824_v0 = vld [vmem:[#allocation10 + $0x120] sm:$0xff]  ;;  %v6014_v48 = vld [vmem:[%s11209_s12 + $0x28] sm:$0xff] }
 0xcd3   :  { %v8643_v2 = vpack.c.bf16 %v5825_v15, %v5824_v0 }
 0xcd4   :  { %v5645_v7 = vadd.f32 %v5644_v60, %v5643_v28  ;;  %v8691_v60 = vpack.c.bf16 %v6014_v48, %v6013_v58  ;;  %v6016_v28 = vld [vmem:[%s11209_s12 + $0x38] sm:$0xff] }
 0xcd6   :  { %9047 = vtanh.f32 %v5645_v7 }
 0xce0   :  { %v9048_v27 = vpop.eup %9047 }
 0xce1   :  { %v5647_v26 = vmul.f32 %v9048_v27, %v9046_v18  ;;  %v8697_v18 = vpack.c.bf16 %v6018_v37, %v6017_v57  ;;  %v6019_v27 = vld [vmem:[%s11209_s12 + $0x50] sm:$0xff] }
 0xce3   :  { %6366 = vmatmul.mubr.f32.vlgmr.msra.gmra.mrb[32].mxu1 %v5647_v26  ;;  %6401 = vmatmul.mubr.f32.vlgmr.msra.gmra.mrb[40].mxu0 %v5647_v26 }
 0xce4   :  { %8638 = vmatpush3.bf16.msra.mxu1 %v8637_v1  ;;  %6435 = vmatprep.mubr.msk.f32.mxu1 %vm9299_vm8, %v11470_v5  ;;  %v6020_v1 = vld [vmem:[%s11209_s12 + $0x58] sm:$0xff] }
 0xce5   :  { %8639 = vmatprep.subr.bf16.mxu1 %v9298_v54  ;;  %6470 = vmatprep.mubr.msk.f32.mxu0 %vm9299_vm8, %v11470_v5  ;;  %v8700_v26 = vpack.c.bf16 %v6020_v1, %v6019_v27 }
 0xce6   :  { %8662 = vmatpush3.bf16.msra.mxu0 %v8661_v23 }
 0xce7   :  { %8663 = vmatprep.subr.bf16.mxu0 %v9298_v54 }
 0xce8   :  { %8641 = vmatpush3.bf16.msra.mxu1 %v8640_v21  ;;  %v8703_v21 = vpack.c.bf16 %v6022_v53, %v6021_v62 }
 0xce9   :  { %8642 = vmatprep.subr.bf16.mxu1 %v9298_v54 }
 0xcea   :  { %8665 = vmatpush3.bf16.msra.mxu0 %v8664_v30 }
 0xceb   :  { %8666 = vmatprep.subr.bf16.mxu0 %v9298_v54 }
 0xcec   :  { %8644 = vmatpush3.bf16.msra.mxu1 %v8643_v2 }
 0xced   :  { %8645 = vmatprep.subr.bf16.mxu1 %v9298_v54 }
 0xcee   :  { %8668 = vmatpush3.bf16.msra.mxu0 %v8667_v56 }
 0xcef   :  { %8669 = vmatprep.subr.bf16.mxu0 %v9298_v54 }
 0xcf0   :  { %8647 = vmatpush3.bf16.msra.mxu1 %v8646_v31 }
 0xcf1   :  { %8648 = vmatprep.subr.bf16.mxu1 %v9298_v54 }
 0xcf2   :  { %8671 = vmatpush3.bf16.msra.mxu0 %v8670_v14 }
 0xcf3   :  { %8672 = vmatprep.subr.bf16.mxu0 %v9298_v54 }
 0xcf4   :  { %8650 = vmatpush3.bf16.msra.mxu1 %v8649_v43 }
 0xcf5   :  { %8651 = vmatprep.subr.bf16.mxu1 %v9298_v54 }
 0xcf8   :  { %8653 = vmatpush3.bf16.msra.mxu1 %v8652_v59  ;;  %v6023_v59 = vld [vmem:[%s11209_s12 + $0x70] sm:$0xff] }
 0xcf9   :  { %8654 = vmatprep.subr.bf16.mxu1 %v9298_v54 }
 0xcfc   :  { %8656 = vmatpush3.bf16.msra.mxu1 %v8655_v4 }
 0xcfd   :  { %8657 = vmatprep.subr.bf16.mxu1 %v9298_v54 }
 0xd00   :  { %8659 = vmatpush3.bf16.msra.mxu1 %v8658_v16  ;;  %v6179_v16 = vld [vmem:[#allocation16] ss:$0 sm:$0xff] }
 0xd01   :  { %8684 = vmatprep.subr.bf16.mxu1 %v9298_v54 }
 0xd03   :  { %6436 = vmatmul.mubr.f32.vlgmr.msra.gmra.mrb[34].mxu1 %v5645_v7  ;;  %v8694_v7 = vpack.c.bf16 %v6016_v28, %v6015_v39 }
 0xd04   :  { %6505 = vmatprep.mubr.msk.f32.mxu1 %vm9299_vm8, %v11470_v5  ;;  %v5924_v5 = vld [vmem:[#allocation13 + $0x40] sm:$0xff]  ;;  %8686 = vmatpush3.bf16.msra.mxu1 %v8685_v6 }
 0xd05   :  { %v8673_v35 = vpack.c.bf16 %v5925_v32, %v5924_v5  ;;  %8687 = vmatprep.subr.bf16.mxu1 %v9298_v54 }
 0xd07   :  { %8674 = vmatpush3.bf16.msra.mxu0 %v8673_v35 }
 0xd08   :  { %8675 = vmatprep.subr.bf16.mxu0 %v9298_v54  ;;  %8689 = vmatpush3.bf16.msra.mxu1 %v8688_v12 }
 0xd09   :  { %8690 = vmatprep.subr.bf16.mxu1 %v9298_v54 }
 0xd0b   :  { %8677 = vmatpush3.bf16.msra.mxu0 %v8676_v25 }
 0xd0c   :  { %8678 = vmatprep.subr.bf16.mxu0 %v9298_v54  ;;  %8692 = vmatpush3.bf16.msra.mxu1 %v8691_v60 }
 0xd0d   :  { %8693 = vmatprep.subr.bf16.mxu1 %v9298_v54 }
 0xd0f   :  { %8680 = vmatpush3.bf16.msra.mxu0 %v8679_v20 }
 0xd10   :  { %8681 = vmatprep.subr.bf16.mxu0 %v9298_v54  ;;  %8695 = vmatpush3.bf16.msra.mxu1 %v8694_v7 }
 0xd11   :  { %8696 = vmatprep.subr.bf16.mxu1 %v9298_v54 }
 0xd13   :  { %8683 = vmatpush3.bf16.msra.mxu0 %v8682_v8 }
 0xd14   :  { %8698 = vmatpush3.bf16.msra.mxu1 %v8697_v18 }
 0xd15   :  { %8699 = vmatprep.subr.bf16.mxu1 %v9298_v54 }
 0xd18   :  { %8701 = vmatpush3.bf16.msra.mxu1 %v8700_v26 }
 0xd19   :  { %8702 = vmatprep.subr.bf16.mxu1 %v9298_v54 }
 0xd1c   :  { %8704 = vmatpush3.bf16.msra.mxu1 %v8703_v21 }
 0xd1d   :  { %8705 = vmatprep.subr.bf16.mxu1 %v9298_v54  ;;  %v6024_v54 = vld [vmem:[%s11209_s12 + $0x78] sm:$0xff] }
 0xd1e   :  { %v8706_v61 = vpack.c.bf16 %v6024_v54, %v6023_v59 }
 0xd20   :  { %8707 = vmatpush3.bf16.msra.mxu1 %v8706_v61 }
 0xdb6   :  { %v5746_v0 = vpop.f32.mrb[32].mxu1  ;;  %v5816_v15 = vpop.f32.mrb[40].mxu0 }
 0xdb7   :  { %v5817_v2 = vadd.f32 %v5816_v15, %v5746_v0  ;;  %v6367_v55 = vpop.f32.mrb[33].mxu1  ;;  %v6402_v36 = vpop.f32.mrb[41].mxu0 }
 0xdd6   :  { %v5902_v31 = vpop.f32.mrb[34].mxu1 }
 0xdd7   :  { %v5906_v38 = vadd.f32 %v5902_v31, %v5817_v2  ;;  %v6437_v43 = vpop.f32.mrb[35].mxu1 }
 0xdd9   :  { %v5914_v50 = vadd.f32 %v6177_v34, %v5906_v38 }
 0xddb   :  { %v5915_v52 = vmax.f32 %v5914_v50, 0.0 }
 0xddd   :  { %6471 = vmatmul.mubr.f32.vlgmr.msra.gmra.mrb[42].mxu0 %v5915_v52 }
 0xeb0   :  { %v6005_v4 = vpop.f32.mrb[42].mxu0 }
 0xeb1   :  { %v6006_v9 = vadd.f32 %v6178_v3, %v6005_v4  ;;  %v6472_v10 = vpop.f32.mrb[43].mxu0 }
 0xeb3   :  { %6506 = vmatmul.mubr.f32.vlgmr.msra.gmra.mrb[36].mxu1 %v6006_v9 }
 0xf86   :  { %v6098_v24 = vpop.f32.mrb[36].mxu1 }
 0xf87   :  { %v6099_v22 = vadd.f32 %v6179_v16, %v6098_v24  ;;  %v6507_v46 = vpop.f32.mrb[37].mxu1 }
 0xf89   :  { %6102 = vst [vmem:[%s11211_s14] sm:$0xff] %v6099_v22 }
 0xf8a   :  { %6107 = vsyncpa [#allocation3], 1 }
 0xf8b   :  { %6108 = vsyncpa [#allocation5], 1 }
 0xf8c   :  { %6109 = vsyncpa [#allocation8], 1 }
 0xf8d   :  { %6110 = vsyncpa [#allocation11], 1 }
 0xf8e   :  { %6111 = vsyncpa [#allocation14], 1 }
 0xf8f   :  { %6112 = vsyncpa [#allocation17], 1 }

</bundles_post_ra>
